<compile_context>
chip_gen: v6e
topology: v6e:2x2x1
jax: 0.10.0
libtpu: 0.0.40
codegen_flags: <defaults>
</compile_context>

<pallas_src>
import numpy as np
import jax
import jax.numpy as jnp
from jax import lax
from jax.experimental import pallas as pl
from jax.experimental.pallas import tpu as pltpu

# ------------------------------- configuration ------------------------------
N, C_IN, H, W = 2, 64, 8, 8          # input NCHW
PLANE = 64                           # in_channel == plane  -> hidden = C_IN // 2
STRIDE = 1
HID = C_IN // 2                      # 32
C_OUT = PLANE * 4                    # 256  (matches CBAM2(channel=256))
HW = H * W                           # 64
NHW = N * HW                         # 128  (batch folded onto sublane axis)
EPS = 1e-5


# ------------------------------ helpers (numpy) -------------------------------
def _shift_mat(h, w, dy, dx):
    m = np.zeros((h * w, h * w), np.float32)
    for i in range(h):
        for j in range(w):
            ii, jj = i + dy, j + dx
            if 0 <= ii < h and 0 <= jj < w:
                m[i * w + j, ii * w + jj] = 1.0
    return m


S7_NP = np.stack([_shift_mat(H, W, k // 7 - 3, k % 7 - 3) for k in range(49)])  # (49, HW, HW)


def _mask9_np():
    # mask[k, p] = 1 iff tap k (dy=k//3-1, dx=k%3-1) of output pixel p reads inside
    # its own image (zero padding elsewhere). Also kills cross-image leakage of rolls.
    m = np.zeros((9, NHW), np.float32)
    for k in range(9):
        dy, dx = k // 3 - 1, k % 3 - 1
        for img in range(N):
            for i in range(H):
                for j in range(W):
                    if 0 <= i + dy < H and 0 <= j + dx < W:
                        m[k, img * HW + i * W + j] = 1.0
    return m


MASK9_NP = _mask9_np()


# ------------------------------- Pallas kernel -------------------------------
def ghost_kernel(x_ref, w0_ref, b0_ref, wf1_ref, bdw1_ref, w23_ref, b23_ref,
                 wfc_ref, bc_ref, wm1_ref, wm2_ref, msp_ref, out_ref):
    relu = lambda t: jnp.maximum(t, 0.0)
    f32, bf16 = jnp.float32, jnp.bfloat16

    x = x_ref[...]                                                    # (NHW, C_IN) f32

    # ---- fused [downsample | con1x1one] 1x1 convs (BN folded) ----------------
    y0 = jnp.dot(x.astype(bf16), w0_ref[...],
                 preferred_element_type=f32) + b0_ref[...]            # (NHW, 256 + HID)
    residual = y0[:, :C_OUT]                                          # downsample (no act)
    x1 = jnp.clip(y0[:, C_OUT:], 0.0, 6.0)                            # con1x1one + ReLU6

    # ---- 3x3 depthwise via 8 sublane rolls + mask-folded weights (9 VPU FMAs) -
    def dw3x3(v, wf_ref):
        def tap(k):
            dy, dx = k // 3 - 1, k % 3 - 1
            s = dy * W + dx                                           # read offset
            shifted = v if s == 0 else pltpu.roll(v, shift=(-s) % NHW, axis=0)
            return shifted * wf_ref[k]                                # (NHW, C)
        # pairwise tree reduction (shorter dependent VPU chain)
        t0 = tap(0) + tap(1)
        t1 = tap(2) + tap(3)
        t2 = tap(5) + tap(6)
        t3 = tap(7) + tap(8)
        return ((t0 + t1) + (t2 + t3)) + tap(4)

    x2 = jnp.clip(dw3x3(x1, wf1_ref) + bdw1_ref[...], 0.0, 6.0)       # (NHW, HID)

    # ---- fused [con1x1two | primary_conv] 1x1 convs (BN folded) --------------
    y23 = jnp.dot(x2.astype(bf16), w23_ref[...],
                  preferred_element_type=f32) + b23_ref[...]          # (NHW, 192)
    x3 = jnp.clip(y23[:, :4 * HID], 0.0, 6.0)                         # ReLU6, 128-lane-aligned slice
    x4 = relu(y23[:, 4 * HID:])                                       # ReLU,  (NHW, 64)

    # ---- cheap_operation: second depthwise stage ------------------------------
    x5 = relu(dw3x3(x4, wfc_ref) + bc_ref[...])                       # (NHW, 64)

    # ---- assemble [x3 | x4 | x5] in registers, add residual -------------------
    out = relu(residual + jnp.concatenate([x3, x4, x5], axis=-1))     # (NHW, 256)

    # ---- CBAM2 channel attention (per image, one MLP pass, f32) ---------------
    mx0 = jnp.max(out[:HW], axis=0, keepdims=True)                    # (1, 256) image 0
    mx1 = jnp.max(out[HW:], axis=0, keepdims=True)                    # (1, 256) image 1
    av0 = jnp.mean(out[:HW], axis=0, keepdims=True)
    av1 = jnp.mean(out[HW:], axis=0, keepdims=True)
    pooled = jnp.concatenate([mx0, mx1, av0, av1], axis=0)            # (4, 256)
    hmid = relu(jnp.dot(pooled, wm1_ref[...], preferred_element_type=f32))   # (4, 16)
    mlp = jnp.dot(hmid, wm2_ref[...], preferred_element_type=f32)     # (4, 256)
    ch0 = jax.nn.sigmoid(mlp[0:1] + mlp[2:3])                         # image 0
    ch1 = jax.nn.sigmoid(mlp[1:2] + mlp[3:4])                         # image 1
    xc = jnp.concatenate([ch0 * out[:HW], ch1 * out[HW:]], axis=0)    # (NHW, 256)

    # ---- CBAM2 spatial attention: block-diagonal fused 7x7, single bf16 matmul -
    mmap = jnp.max(xc, axis=1, keepdims=True)                         # (NHW, 1)
    amap = jnp.mean(xc, axis=1, keepdims=True)                        # (NHW, 1)
    stk = jnp.concatenate([mmap, amap], axis=0).astype(bf16)          # (2*NHW, 1)
    sp = jax.nn.sigmoid(jnp.dot(msp_ref[...], stk,
                                preferred_element_type=f32))          # (NHW, 1)

    # final: relu(spatial_attn * xc + out) -- full 256-lane unmasked store
    out_ref[...] = relu(sp * xc + out)


# --------------------------- parameter construction --------------------------
def init_params(key):
    ks = jax.random.split(key, 20)

    def nrm(k, shape, s=0.1):
        return s * jax.random.normal(k, shape, jnp.float32)

    def bn(k, c):
        k1, k2, k3, k4 = jax.random.split(k, 4)
        gamma = 1.0 + 0.1 * jax.random.normal(k1, (c,), jnp.float32)
        beta = 0.05 * jax.random.normal(k2, (c,), jnp.float32)
        mean = 0.05 * jax.random.normal(k3, (c,), jnp.float32)
        var = jax.random.uniform(k4, (c,), jnp.float32, minval=0.5, maxval=1.5)
        return (gamma, beta, mean, var)

    P = {}
    P['w1'] = nrm(ks[0], (HID, C_IN, 1, 1));   P['b1'] = nrm(ks[1], (HID,))
    P['bn1'] = bn(ks[2], HID)
    P['wdw1'] = nrm(ks[3], (HID, 1, 3, 3));    P['bdw1'] = nrm(ks[4], (HID,))
    P['bndw1'] = bn(ks[5], HID)
    P['w2'] = nrm(ks[6], (4 * HID, HID, 1, 1)); P['bn2'] = bn(ks[7], 4 * HID)
    P['wd'] = nrm(ks[8], (4 * C_IN, C_IN, 1, 1)); P['bnd'] = bn(ks[9], 4 * C_IN)
    P['wp'] = nrm(ks[10], (2 * HID, HID, 1, 1)); P['bnp'] = bn(ks[11], 2 * HID)
    P['wdwc'] = nrm(ks[12], (2 * HID, 1, 3, 3)); P['bnc'] = bn(ks[13], 2 * HID)
    P['wm1'] = nrm(ks[14], (C_OUT // 16, C_OUT, 1, 1))
    P['wm2'] = nrm(ks[15], (C_OUT, C_OUT // 16, 1, 1))
    P['wsp'] = nrm(ks[16], (1, 2, 7, 7))
    return P


def _fold_bn(bnp):
    g, b, m, v = bnp
    s = g / jnp.sqrt(v + EPS)
    t = b - m * s
    return s, t


def _fold_1x1(w, bias, bnp):
    s, t = _fold_bn(bnp)
    wm = w[:, :, 0, 0]                         # (Cout, Cin)
    wf = (wm * s[:, None]).T                   # (Cin, Cout)
    bf = (bias * s if bias is not None else 0.0) + t
    return wf.astype(jnp.float32), bf.reshape(1, -1).astype(jnp.float32)


def _fold_dw_masked(w, bias, bnp):
    # Depthwise 3x3 weights with BN scale folded in and the per-tap boundary mask
    # pre-multiplied: wf[k, p, c] = mask[k, p] * (w[c, ky, kx] * bn_scale[c]).
    s, t = _fold_bn(bnp)
    c = w.shape[0]
    wm = w[:, 0].reshape(c, 9)                 # (C, 9), tap k = ky*3 + kx
    dwk = (wm * s[:, None]).T                  # (9, C)
    wf = jnp.asarray(MASK9_NP)[:, :, None] * dwk[:, None, :]          # (9, NHW, C)
    bf = (bias * s if bias is not None else 0.0) + t
    return wf.astype(jnp.float32), bf.reshape(1, -1).astype(jnp.float32)


def _fold_spatial(wsp):
    # Fuse the 7x7 spatial conv (2->1 channels) into one block-diagonal matrix over
    # the folded batch: columns [0:NHW) act on the max map, [NHW:2*NHW) on the avg map.
    wnp = np.asarray(wsp)                      # (1, 2, 7, 7)
    mats = np.zeros((2, HW, HW), np.float32)
    for c in range(2):
        coeffs = wnp[0, c].reshape(49)
        mats[c] = np.einsum('k,kpq->pq', coeffs, S7_NP)
    msp = np.zeros((NHW, 2 * NHW), np.float32)
    for img in range(N):
        r = slice(img * HW, (img + 1) * HW)
        msp[r, img * HW:(img + 1) * HW] = mats[0]                     # max branch
        msp[r, NHW + img * HW:NHW + (img + 1) * HW] = mats[1]         # avg branch
    return jnp.asarray(msp, jnp.bfloat16)


# --------------------------------- wrapper -----------------------------------
def ghost_block_forward(x_nchw, P):
    # TODO(synk): if this block is embedded in a larger NHWC model, drop these two
    # transposes and feed / return (N*H*W, C) directly.
    x2d = jnp.transpose(x_nchw, (0, 2, 3, 1)).reshape(NHW, C_IN)

    w1f, b1f = _fold_1x1(P['w1'], P['b1'], P['bn1'])
    wf1, bdw1f = _fold_dw_masked(P['wdw1'], P['bdw1'], P['bndw1'])
    w2f, b2f = _fold_1x1(P['w2'], None, P['bn2'])
    wpf, bpf = _fold_1x1(P['wp'], None, P['bnp'])
    wfc, bcf = _fold_dw_masked(P['wdwc'], None, P['bnc'])
    wdf, bdf = _fold_1x1(P['wd'], None, P['bnd'])

    # Fuse 1x1 convs that share the same input into single matmuls (bf16 operands).
    w0 = jnp.concatenate([wdf, w1f], axis=1).astype(jnp.bfloat16)     # (C_IN, 256 + HID)
    b0 = jnp.concatenate([bdf, b1f], axis=1)                          # (1, 288) f32
    w23 = jnp.concatenate([w2f, wpf], axis=1).astype(jnp.bfloat16)    # (HID, 192)
    b23 = jnp.concatenate([b2f, bpf], axis=1)                         # (1, 192) f32

    wm1m = P['wm1'][:, :, 0, 0].T                                     # (256, 16)  f32
    wm2m = P['wm2'][:, :, 0, 0].T                                     # (16, 256)  f32
    msp = _fold_spatial(P['wsp'])                                     # (NHW, 2*NHW) bf16

    args = (x2d, w0, b0, wf1, bdw1f, w23, b23, wfc, bcf, wm1m, wm2m, msp)

    cost = pl.CostEstimate(flops=7_000_000, transcendentals=700,
                           bytes_accessed=760_000)

    # Single program (no grid): whole arrays live in VMEM (< 2 MiB total), the batch
    # is folded onto the sublane axis, and the only store is a full 256-lane slab.
    out2d = pl.pallas_call(
        ghost_kernel,
        out_shape=jax.ShapeDtypeStruct((NHW, C_OUT), jnp.float32),
        cost_estimate=cost,
    )(*args)

    return jnp.transpose(out2d.reshape(N, H, W, C_OUT), (0, 3, 1, 2))


# ---------------------------- pure-JAX reference -----------------------------
def _conv(x, w, stride=1, pad=0, groups=1, b=None):
    y = lax.conv_general_dilated(
        x, w, window_strides=(stride, stride), padding=[(pad, pad), (pad, pad)],
        dimension_numbers=('NCHW', 'OIHW', 'NCHW'),
        feature_group_count=groups, precision=lax.Precision.HIGHEST)
    if b is not None:
        y = y + b.reshape(1, -1, 1, 1)
    return y


def _bn(x, bnp):
    g, b, m, v = bnp
    s = g / jnp.sqrt(v + EPS)
    return x * s.reshape(1, -1, 1, 1) + (b - m * s).reshape(1, -1, 1, 1)


def reference_forward(x, P):
    relu6 = lambda t: jnp.clip(t, 0.0, 6.0)
    relu = lambda t: jnp.maximum(t, 0.0)
    x1 = relu6(_bn(_conv(x, P['w1'], b=P['b1']), P['bn1']))
    x2 = relu6(_bn(_conv(x1, P['wdw1'], pad=1, groups=HID, b=P['bdw1']), P['bndw1']))
    x3 = relu6(_bn(_conv(x2, P['w2']), P['bn2']))
    x4 = relu(_bn(_conv(x2, P['wp']), P['bnp']))
    x5 = relu(_bn(_conv(x4, P['wdwc'], pad=1, groups=2 * HID), P['bnc']))
    out = jnp.concatenate([x3, x4, x5], axis=1)
    residual = _bn(_conv(x, P['wd']), P['bnd'])
    out = relu(residual + out)
    # CBAM2
    mx = jnp.max(out, axis=(2, 3), keepdims=True)
    av = jnp.mean(out, axis=(2, 3), keepdims=True)
    mlp = lambda t: _conv(relu(_conv(t, P['wm1'])), P['wm2'])
    ch = jax.nn.sigmoid(mlp(mx) + mlp(av))
    xc = ch * out
    mmap = jnp.max(xc, axis=1, keepdims=True)
    amap = jnp.mean(xc, axis=1, keepdims=True)
    sp = jax.nn.sigmoid(_conv(jnp.concatenate([mmap, amap], axis=1), P['wsp'], pad=3))
    attn = sp * xc
    return relu(attn + out)


# ----------------------------------- main ------------------------------------
if __name__ == "__main__":
    key = jax.random.PRNGKey(0)
    kx, kp = jax.random.split(key)
    x = jax.random.normal(kx, (N, C_IN, H, W), jnp.float32)
    P = init_params(kp)

    out = jax.block_until_ready(ghost_block_forward(x, P))
    ref = jax.block_until_ready(reference_forward(x, P))

    # Tolerance accounts for bf16 MXU operands (f32 accumulation, f32 reference).
    np.testing.assert_allclose(np.asarray(out), np.asarray(ref), rtol=3e-2, atol=3e-2)

    print("KERNEL_OK")
</pallas_src>

<mosaic_0001>
module attributes {stable_mosaic.version = 11 : i64} {
  func.func @ghost_kernel(%arg0: memref<128x64xf32, #tpu.memory_space<vmem>>, %arg1: memref<64x288xbf16, #tpu.memory_space<vmem>>, %arg2: memref<1x288xf32, #tpu.memory_space<vmem>>, %arg3: memref<9x128x32xf32, #tpu.memory_space<vmem>>, %arg4: memref<1x32xf32, #tpu.memory_space<vmem>>, %arg5: memref<32x192xbf16, #tpu.memory_space<vmem>>, %arg6: memref<1x192xf32, #tpu.memory_space<vmem>>, %arg7: memref<9x128x64xf32, #tpu.memory_space<vmem>>, %arg8: memref<1x64xf32, #tpu.memory_space<vmem>>, %arg9: memref<256x16xf32, #tpu.memory_space<vmem>>, %arg10: memref<16x256xf32, #tpu.memory_space<vmem>>, %arg11: memref<128x256xbf16, #tpu.memory_space<vmem>>, %arg12: memref<128x256xf32, #tpu.memory_space<vmem>>) attributes {dimension_semantics = [], scalar_prefetch = 0 : i64, scratch_operands = 0 : i64, tpu.core_type = #tpu.core_type<tc>} {
    %c0 = arith.constant 0 : index
    %c0_0 = arith.constant 0 : index
    %0 = vector.load %arg0[%c0, %c0_0] : memref<128x64xf32, #tpu.memory_space<vmem>>, vector<128x64xf32>
    %1 = arith.truncf %0 : vector<128x64xf32> to vector<128x64xbf16>
    %c0_1 = arith.constant 0 : index
    %c0_2 = arith.constant 0 : index
    %2 = vector.load %arg1[%c0_1, %c0_2] : memref<64x288xbf16, #tpu.memory_space<vmem>>, vector<64x288xbf16>
    %cst = arith.constant dense<0.000000e+00> : vector<128x288xf32>
    %3 = tpu.matmul %1, %2, %cst {dimension_numbers = #tpu.dot_dimension_numbers<[1], [0], [0], [1], [0, 0, 1, 1], [], []>} : vector<128x64xbf16>, vector<64x288xbf16>, vector<128x288xf32> -> vector<128x288xf32>
    %c0_3 = arith.constant 0 : index
    %c0_4 = arith.constant 0 : index
    %4 = vector.load %arg2[%c0_3, %c0_4] : memref<1x288xf32, #tpu.memory_space<vmem>>, vector<1x288xf32>
    %5 = vector.broadcast %4 : vector<1x288xf32> to vector<128x288xf32>
    %6 = arith.addf %3, %5 : vector<128x288xf32>
    %7 = vector.extract_strided_slice %6 {offsets = [0, 0], sizes = [128, 256], strides = [1, 1]} : vector<128x288xf32> to vector<128x256xf32>
    %8 = vector.extract_strided_slice %6 {offsets = [0, 256], sizes = [128, 32], strides = [1, 1]} : vector<128x288xf32> to vector<128x32xf32>
    %cst_5 = arith.constant 0.000000e+00 : f32
    %cst_6 = arith.constant 6.000000e+00 : f32
    %9 = vector.broadcast %cst_5 : f32 to vector<128x32xf32>
    %10 = arith.maximumf %9, %8 : vector<128x32xf32>
    %11 = vector.broadcast %cst_6 : f32 to vector<128x32xf32>
    %12 = arith.minimumf %11, %10 : vector<128x32xf32>
    %c9_i32 = arith.constant 9 : i32
    %13 = tpu.dynamic_rotate %12 by %c9_i32 dim 0 : vector<128x32xf32>, i32 -> vector<128x32xf32>
    %c0_7 = arith.constant 0 : index
    %c0_8 = arith.constant 0 : index
    %c0_9 = arith.constant 0 : index
    %14 = vector.load %arg3[%c0_7, %c0_8, %c0_9] : memref<9x128x32xf32, #tpu.memory_space<vmem>>, vector<1x128x32xf32>
    %15 = vector.shape_cast %14 : vector<1x128x32xf32> to vector<128x32xf32>
    %16 = arith.mulf %13, %15 : vector<128x32xf32>
    %c8_i32 = arith.constant 8 : i32
    %17 = tpu.dynamic_rotate %12 by %c8_i32 dim 0 : vector<128x32xf32>, i32 -> vector<128x32xf32>
    %c1 = arith.constant 1 : index
    %c0_10 = arith.constant 0 : index
    %c0_11 = arith.constant 0 : index
    %18 = vector.load %arg3[%c1, %c0_10, %c0_11] : memref<9x128x32xf32, #tpu.memory_space<vmem>>, vector<1x128x32xf32>
    %19 = vector.shape_cast %18 : vector<1x128x32xf32> to vector<128x32xf32>
    %20 = arith.mulf %17, %19 : vector<128x32xf32>
    %21 = arith.addf %16, %20 : vector<128x32xf32>
    %c7_i32 = arith.constant 7 : i32
    %22 = tpu.dynamic_rotate %12 by %c7_i32 dim 0 : vector<128x32xf32>, i32 -> vector<128x32xf32>
    %c2 = arith.constant 2 : index
    %c0_12 = arith.constant 0 : index
    %c0_13 = arith.constant 0 : index
    %23 = vector.load %arg3[%c2, %c0_12, %c0_13] : memref<9x128x32xf32, #tpu.memory_space<vmem>>, vector<1x128x32xf32>
    %24 = vector.shape_cast %23 : vector<1x128x32xf32> to vector<128x32xf32>
    %25 = arith.mulf %22, %24 : vector<128x32xf32>
    %c1_i32 = arith.constant 1 : i32
    %26 = tpu.dynamic_rotate %12 by %c1_i32 dim 0 : vector<128x32xf32>, i32 -> vector<128x32xf32>
    %c3 = arith.constant 3 : index
    %c0_14 = arith.constant 0 : index
    %c0_15 = arith.constant 0 : index
    %27 = vector.load %arg3[%c3, %c0_14, %c0_15] : memref<9x128x32xf32, #tpu.memory_space<vmem>>, vector<1x128x32xf32>
    %28 = vector.shape_cast %27 : vector<1x128x32xf32> to vector<128x32xf32>
    %29 = arith.mulf %26, %28 : vector<128x32xf32>
    %30 = arith.addf %25, %29 : vector<128x32xf32>
    %c127_i32 = arith.constant 127 : i32
    %31 = tpu.dynamic_rotate %12 by %c127_i32 dim 0 : vector<128x32xf32>, i32 -> vector<128x32xf32>
    %c5 = arith.constant 5 : index
    %c0_16 = arith.constant 0 : index
    %c0_17 = arith.constant 0 : index
    %32 = vector.load %arg3[%c5, %c0_16, %c0_17] : memref<9x128x32xf32, #tpu.memory_space<vmem>>, vector<1x128x32xf32>
    %33 = vector.shape_cast %32 : vector<1x128x32xf32> to vector<128x32xf32>
    %34 = arith.mulf %31, %33 : vector<128x32xf32>
    %c121_i32 = arith.constant 121 : i32
    %35 = tpu.dynamic_rotate %12 by %c121_i32 dim 0 : vector<128x32xf32>, i32 -> vector<128x32xf32>
    %c6 = arith.constant 6 : index
    %c0_18 = arith.constant 0 : index
    %c0_19 = arith.constant 0 : index
    %36 = vector.load %arg3[%c6, %c0_18, %c0_19] : memref<9x128x32xf32, #tpu.memory_space<vmem>>, vector<1x128x32xf32>
    %37 = vector.shape_cast %36 : vector<1x128x32xf32> to vector<128x32xf32>
    %38 = arith.mulf %35, %37 : vector<128x32xf32>
    %39 = arith.addf %34, %38 : vector<128x32xf32>
    %c120_i32 = arith.constant 120 : i32
    %40 = tpu.dynamic_rotate %12 by %c120_i32 dim 0 : vector<128x32xf32>, i32 -> vector<128x32xf32>
    %c7 = arith.constant 7 : index
    %c0_20 = arith.constant 0 : index
    %c0_21 = arith.constant 0 : index
    %41 = vector.load %arg3[%c7, %c0_20, %c0_21] : memref<9x128x32xf32, #tpu.memory_space<vmem>>, vector<1x128x32xf32>
    %42 = vector.shape_cast %41 : vector<1x128x32xf32> to vector<128x32xf32>
    %43 = arith.mulf %40, %42 : vector<128x32xf32>
    %c119_i32 = arith.constant 119 : i32
    %44 = tpu.dynamic_rotate %12 by %c119_i32 dim 0 : vector<128x32xf32>, i32 -> vector<128x32xf32>
    %c8 = arith.constant 8 : index
    %c0_22 = arith.constant 0 : index
    %c0_23 = arith.constant 0 : index
    %45 = vector.load %arg3[%c8, %c0_22, %c0_23] : memref<9x128x32xf32, #tpu.memory_space<vmem>>, vector<1x128x32xf32>
    %46 = vector.shape_cast %45 : vector<1x128x32xf32> to vector<128x32xf32>
    %47 = arith.mulf %44, %46 : vector<128x32xf32>
    %48 = arith.addf %43, %47 : vector<128x32xf32>
    %49 = arith.addf %21, %30 : vector<128x32xf32>
    %50 = arith.addf %39, %48 : vector<128x32xf32>
    %51 = arith.addf %49, %50 : vector<128x32xf32>
    %c4 = arith.constant 4 : index
    %c0_24 = arith.constant 0 : index
    %c0_25 = arith.constant 0 : index
    %52 = vector.load %arg3[%c4, %c0_24, %c0_25] : memref<9x128x32xf32, #tpu.memory_space<vmem>>, vector<1x128x32xf32>
    %53 = vector.shape_cast %52 : vector<1x128x32xf32> to vector<128x32xf32>
    %54 = arith.mulf %12, %53 : vector<128x32xf32>
    %55 = arith.addf %51, %54 : vector<128x32xf32>
    %c0_26 = arith.constant 0 : index
    %c0_27 = arith.constant 0 : index
    %56 = vector.load %arg4[%c0_26, %c0_27] : memref<1x32xf32, #tpu.memory_space<vmem>>, vector<1x32xf32>
    %57 = vector.broadcast %56 : vector<1x32xf32> to vector<128x32xf32>
    %58 = arith.addf %55, %57 : vector<128x32xf32>
    %cst_28 = arith.constant 0.000000e+00 : f32
    %cst_29 = arith.constant 6.000000e+00 : f32
    %59 = vector.broadcast %cst_28 : f32 to vector<128x32xf32>
    %60 = arith.maximumf %59, %58 : vector<128x32xf32>
    %61 = vector.broadcast %cst_29 : f32 to vector<128x32xf32>
    %62 = arith.minimumf %61, %60 : vector<128x32xf32>
    %63 = arith.truncf %62 : vector<128x32xf32> to vector<128x32xbf16>
    %c0_30 = arith.constant 0 : index
    %c0_31 = arith.constant 0 : index
    %64 = vector.load %arg5[%c0_30, %c0_31] : memref<32x192xbf16, #tpu.memory_space<vmem>>, vector<32x192xbf16>
    %cst_32 = arith.constant dense<0.000000e+00> : vector<128x192xf32>
    %65 = tpu.matmul %63, %64, %cst_32 {dimension_numbers = #tpu.dot_dimension_numbers<[1], [0], [0], [1], [0, 0, 1, 1], [], []>} : vector<128x32xbf16>, vector<32x192xbf16>, vector<128x192xf32> -> vector<128x192xf32>
    %c0_33 = arith.constant 0 : index
    %c0_34 = arith.constant 0 : index
    %66 = vector.load %arg6[%c0_33, %c0_34] : memref<1x192xf32, #tpu.memory_space<vmem>>, vector<1x192xf32>
    %67 = vector.broadcast %66 : vector<1x192xf32> to vector<128x192xf32>
    %68 = arith.addf %65, %67 : vector<128x192xf32>
    %69 = vector.extract_strided_slice %68 {offsets = [0, 0], sizes = [128, 128], strides = [1, 1]} : vector<128x192xf32> to vector<128x128xf32>
    %cst_35 = arith.constant 0.000000e+00 : f32
    %cst_36 = arith.constant 6.000000e+00 : f32
    %70 = vector.broadcast %cst_35 : f32 to vector<128x128xf32>
    %71 = arith.maximumf %70, %69 : vector<128x128xf32>
    %72 = vector.broadcast %cst_36 : f32 to vector<128x128xf32>
    %73 = arith.minimumf %72, %71 : vector<128x128xf32>
    %74 = vector.extract_strided_slice %68 {offsets = [0, 128], sizes = [128, 64], strides = [1, 1]} : vector<128x192xf32> to vector<128x64xf32>
    %cst_37 = arith.constant 0.000000e+00 : f32
    %75 = vector.broadcast %cst_37 : f32 to vector<128x64xf32>
    %76 = arith.maximumf %74, %75 : vector<128x64xf32>
    %c9_i32_38 = arith.constant 9 : i32
    %77 = tpu.dynamic_rotate %76 by %c9_i32_38 dim 0 : vector<128x64xf32>, i32 -> vector<128x64xf32>
    %c0_39 = arith.constant 0 : index
    %c0_40 = arith.constant 0 : index
    %c0_41 = arith.constant 0 : index
    %78 = vector.load %arg7[%c0_39, %c0_40, %c0_41] : memref<9x128x64xf32, #tpu.memory_space<vmem>>, vector<1x128x64xf32>
    %79 = vector.shape_cast %78 : vector<1x128x64xf32> to vector<128x64xf32>
    %80 = arith.mulf %77, %79 : vector<128x64xf32>
    %c8_i32_42 = arith.constant 8 : i32
    %81 = tpu.dynamic_rotate %76 by %c8_i32_42 dim 0 : vector<128x64xf32>, i32 -> vector<128x64xf32>
    %c1_43 = arith.constant 1 : index
    %c0_44 = arith.constant 0 : index
    %c0_45 = arith.constant 0 : index
    %82 = vector.load %arg7[%c1_43, %c0_44, %c0_45] : memref<9x128x64xf32, #tpu.memory_space<vmem>>, vector<1x128x64xf32>
    %83 = vector.shape_cast %82 : vector<1x128x64xf32> to vector<128x64xf32>
    %84 = arith.mulf %81, %83 : vector<128x64xf32>
    %85 = arith.addf %80, %84 : vector<128x64xf32>
    %c7_i32_46 = arith.constant 7 : i32
    %86 = tpu.dynamic_rotate %76 by %c7_i32_46 dim 0 : vector<128x64xf32>, i32 -> vector<128x64xf32>
    %c2_47 = arith.constant 2 : index
    %c0_48 = arith.constant 0 : index
    %c0_49 = arith.constant 0 : index
    %87 = vector.load %arg7[%c2_47, %c0_48, %c0_49] : memref<9x128x64xf32, #tpu.memory_space<vmem>>, vector<1x128x64xf32>
    %88 = vector.shape_cast %87 : vector<1x128x64xf32> to vector<128x64xf32>
    %89 = arith.mulf %86, %88 : vector<128x64xf32>
    %c1_i32_50 = arith.constant 1 : i32
    %90 = tpu.dynamic_rotate %76 by %c1_i32_50 dim 0 : vector<128x64xf32>, i32 -> vector<128x64xf32>
    %c3_51 = arith.constant 3 : index
    %c0_52 = arith.constant 0 : index
    %c0_53 = arith.constant 0 : index
    %91 = vector.load %arg7[%c3_51, %c0_52, %c0_53] : memref<9x128x64xf32, #tpu.memory_space<vmem>>, vector<1x128x64xf32>
    %92 = vector.shape_cast %91 : vector<1x128x64xf32> to vector<128x64xf32>
    %93 = arith.mulf %90, %92 : vector<128x64xf32>
    %94 = arith.addf %89, %93 : vector<128x64xf32>
    %c127_i32_54 = arith.constant 127 : i32
    %95 = tpu.dynamic_rotate %76 by %c127_i32_54 dim 0 : vector<128x64xf32>, i32 -> vector<128x64xf32>
    %c5_55 = arith.constant 5 : index
    %c0_56 = arith.constant 0 : index
    %c0_57 = arith.constant 0 : index
    %96 = vector.load %arg7[%c5_55, %c0_56, %c0_57] : memref<9x128x64xf32, #tpu.memory_space<vmem>>, vector<1x128x64xf32>
    %97 = vector.shape_cast %96 : vector<1x128x64xf32> to vector<128x64xf32>
    %98 = arith.mulf %95, %97 : vector<128x64xf32>
    %c121_i32_58 = arith.constant 121 : i32
    %99 = tpu.dynamic_rotate %76 by %c121_i32_58 dim 0 : vector<128x64xf32>, i32 -> vector<128x64xf32>
    %c6_59 = arith.constant 6 : index
    %c0_60 = arith.constant 0 : index
    %c0_61 = arith.constant 0 : index
    %100 = vector.load %arg7[%c6_59, %c0_60, %c0_61] : memref<9x128x64xf32, #tpu.memory_space<vmem>>, vector<1x128x64xf32>
    %101 = vector.shape_cast %100 : vector<1x128x64xf32> to vector<128x64xf32>
    %102 = arith.mulf %99, %101 : vector<128x64xf32>
    %103 = arith.addf %98, %102 : vector<128x64xf32>
    %c120_i32_62 = arith.constant 120 : i32
    %104 = tpu.dynamic_rotate %76 by %c120_i32_62 dim 0 : vector<128x64xf32>, i32 -> vector<128x64xf32>
    %c7_63 = arith.constant 7 : index
    %c0_64 = arith.constant 0 : index
    %c0_65 = arith.constant 0 : index
    %105 = vector.load %arg7[%c7_63, %c0_64, %c0_65] : memref<9x128x64xf32, #tpu.memory_space<vmem>>, vector<1x128x64xf32>
    %106 = vector.shape_cast %105 : vector<1x128x64xf32> to vector<128x64xf32>
    %107 = arith.mulf %104, %106 : vector<128x64xf32>
    %c119_i32_66 = arith.constant 119 : i32
    %108 = tpu.dynamic_rotate %76 by %c119_i32_66 dim 0 : vector<128x64xf32>, i32 -> vector<128x64xf32>
    %c8_67 = arith.constant 8 : index
    %c0_68 = arith.constant 0 : index
    %c0_69 = arith.constant 0 : index
    %109 = vector.load %arg7[%c8_67, %c0_68, %c0_69] : memref<9x128x64xf32, #tpu.memory_space<vmem>>, vector<1x128x64xf32>
    %110 = vector.shape_cast %109 : vector<1x128x64xf32> to vector<128x64xf32>
    %111 = arith.mulf %108, %110 : vector<128x64xf32>
    %112 = arith.addf %107, %111 : vector<128x64xf32>
    %113 = arith.addf %85, %94 : vector<128x64xf32>
    %114 = arith.addf %103, %112 : vector<128x64xf32>
    %115 = arith.addf %113, %114 : vector<128x64xf32>
    %c4_70 = arith.constant 4 : index
    %c0_71 = arith.constant 0 : index
    %c0_72 = arith.constant 0 : index
    %116 = vector.load %arg7[%c4_70, %c0_71, %c0_72] : memref<9x128x64xf32, #tpu.memory_space<vmem>>, vector<1x128x64xf32>
    %117 = vector.shape_cast %116 : vector<1x128x64xf32> to vector<128x64xf32>
    %118 = arith.mulf %76, %117 : vector<128x64xf32>
    %119 = arith.addf %115, %118 : vector<128x64xf32>
    %c0_73 = arith.constant 0 : index
    %c0_74 = arith.constant 0 : index
    %120 = vector.load %arg8[%c0_73, %c0_74] : memref<1x64xf32, #tpu.memory_space<vmem>>, vector<1x64xf32>
    %121 = vector.broadcast %120 : vector<1x64xf32> to vector<128x64xf32>
    %122 = arith.addf %119, %121 : vector<128x64xf32>
    %cst_75 = arith.constant 0.000000e+00 : f32
    %123 = vector.broadcast %cst_75 : f32 to vector<128x64xf32>
    %124 = arith.maximumf %122, %123 : vector<128x64xf32>
    %125 = tpu.concatenate %73, %76, %124 in 1 : vector<128x128xf32>, vector<128x64xf32>, vector<128x64xf32> -> vector<128x256xf32>
    %126 = arith.addf %7, %125 : vector<128x256xf32>
    %cst_76 = arith.constant 0.000000e+00 : f32
    %127 = vector.broadcast %cst_76 : f32 to vector<128x256xf32>
    %128 = arith.maximumf %126, %127 : vector<128x256xf32>
    %129 = vector.extract_strided_slice %128 {offsets = [0, 0], sizes = [64, 256], strides = [1, 1]} : vector<128x256xf32> to vector<64x256xf32>
    %cst_77 = arith.constant dense<0xFF800000> : vector<256xf32>
    %130 = vector.multi_reduction <maximumf>, %129, %cst_77 [0] : vector<64x256xf32> to vector<256xf32>
    %131 = vector.shape_cast %130 : vector<256xf32> to vector<1x256xf32>
    %132 = vector.extract_strided_slice %128 {offsets = [64, 0], sizes = [64, 256], strides = [1, 1]} : vector<128x256xf32> to vector<64x256xf32>
    %cst_78 = arith.constant dense<0xFF800000> : vector<256xf32>
    %133 = vector.multi_reduction <maximumf>, %132, %cst_78 [0] : vector<64x256xf32> to vector<256xf32>
    %134 = vector.shape_cast %133 : vector<256xf32> to vector<1x256xf32>
    %135 = vector.extract_strided_slice %128 {offsets = [0, 0], sizes = [64, 256], strides = [1, 1]} : vector<128x256xf32> to vector<64x256xf32>
    %cst_79 = arith.constant dense<0.000000e+00> : vector<256xf32>
    %136 = vector.multi_reduction <add>, %135, %cst_79 [0] : vector<64x256xf32> to vector<256xf32>
    %137 = vector.shape_cast %136 : vector<256xf32> to vector<1x256xf32>
    %cst_80 = arith.constant 6.400000e+01 : f32
    %138 = vector.broadcast %cst_80 : f32 to vector<1x256xf32>
    %139 = arith.divf %137, %138 : vector<1x256xf32>
    %140 = vector.extract_strided_slice %128 {offsets = [64, 0], sizes = [64, 256], strides = [1, 1]} : vector<128x256xf32> to vector<64x256xf32>
    %cst_81 = arith.constant dense<0.000000e+00> : vector<256xf32>
    %141 = vector.multi_reduction <add>, %140, %cst_81 [0] : vector<64x256xf32> to vector<256xf32>
    %142 = vector.shape_cast %141 : vector<256xf32> to vector<1x256xf32>
    %cst_82 = arith.constant 6.400000e+01 : f32
    %143 = vector.broadcast %cst_82 : f32 to vector<1x256xf32>
    %144 = arith.divf %142, %143 : vector<1x256xf32>
    %145 = tpu.concatenate %131, %134, %139, %144 in 0 : vector<1x256xf32>, vector<1x256xf32>, vector<1x256xf32>, vector<1x256xf32> -> vector<4x256xf32>
    %c0_83 = arith.constant 0 : index
    %c0_84 = arith.constant 0 : index
    %146 = vector.load %arg9[%c0_83, %c0_84] : memref<256x16xf32, #tpu.memory_space<vmem>>, vector<256x16xf32>
    %cst_85 = arith.constant dense<0.000000e+00> : vector<4x16xf32>
    %147 = tpu.matmul %145, %146, %cst_85 {dimension_numbers = #tpu.dot_dimension_numbers<[1], [0], [0], [1], [0, 0, 1, 1], [], []>} : vector<4x256xf32>, vector<256x16xf32>, vector<4x16xf32> -> vector<4x16xf32>
    %cst_86 = arith.constant 0.000000e+00 : f32
    %148 = vector.broadcast %cst_86 : f32 to vector<4x16xf32>
    %149 = arith.maximumf %147, %148 : vector<4x16xf32>
    %c0_87 = arith.constant 0 : index
    %c0_88 = arith.constant 0 : index
    %150 = vector.load %arg10[%c0_87, %c0_88] : memref<16x256xf32, #tpu.memory_space<vmem>>, vector<16x256xf32>
    %cst_89 = arith.constant dense<0.000000e+00> : vector<4x256xf32>
    %151 = tpu.matmul %149, %150, %cst_89 {dimension_numbers = #tpu.dot_dimension_numbers<[1], [0], [0], [1], [0, 0, 1, 1], [], []>} : vector<4x16xf32>, vector<16x256xf32>, vector<4x256xf32> -> vector<4x256xf32>
    %152 = vector.extract_strided_slice %151 {offsets = [0, 0], sizes = [1, 256], strides = [1, 1]} : vector<4x256xf32> to vector<1x256xf32>
    %153 = vector.extract_strided_slice %151 {offsets = [2, 0], sizes = [1, 256], strides = [1, 1]} : vector<4x256xf32> to vector<1x256xf32>
    %154 = arith.addf %152, %153 : vector<1x256xf32>
    %155 = arith.negf %154 : vector<1x256xf32>
    %156 = math.exp %155 : vector<1x256xf32>
    %cst_90 = arith.constant 1.000000e+00 : f32
    %157 = vector.broadcast %cst_90 : f32 to vector<1x256xf32>
    %158 = arith.addf %157, %156 : vector<1x256xf32>
    %159 = arith.divf %157, %158 : vector<1x256xf32>
    %160 = vector.extract_strided_slice %151 {offsets = [1, 0], sizes = [1, 256], strides = [1, 1]} : vector<4x256xf32> to vector<1x256xf32>
    %161 = vector.extract_strided_slice %151 {offsets = [3, 0], sizes = [1, 256], strides = [1, 1]} : vector<4x256xf32> to vector<1x256xf32>
    %162 = arith.addf %160, %161 : vector<1x256xf32>
    %163 = arith.negf %162 : vector<1x256xf32>
    %164 = math.exp %163 : vector<1x256xf32>
    %cst_91 = arith.constant 1.000000e+00 : f32
    %165 = vector.broadcast %cst_91 : f32 to vector<1x256xf32>
    %166 = arith.addf %165, %164 : vector<1x256xf32>
    %167 = arith.divf %165, %166 : vector<1x256xf32>
    %168 = vector.extract_strided_slice %128 {offsets = [0, 0], sizes = [64, 256], strides = [1, 1]} : vector<128x256xf32> to vector<64x256xf32>
    %169 = vector.broadcast %159 : vector<1x256xf32> to vector<64x256xf32>
    %170 = arith.mulf %169, %168 : vector<64x256xf32>
    %171 = vector.extract_strided_slice %128 {offsets = [64, 0], sizes = [64, 256], strides = [1, 1]} : vector<128x256xf32> to vector<64x256xf32>
    %172 = vector.broadcast %167 : vector<1x256xf32> to vector<64x256xf32>
    %173 = arith.mulf %172, %171 : vector<64x256xf32>
    %174 = tpu.concatenate %170, %173 in 0 : vector<64x256xf32>, vector<64x256xf32> -> vector<128x256xf32>
    %cst_92 = arith.constant dense<0xFF800000> : vector<128xf32>
    %175 = vector.multi_reduction <maximumf>, %174, %cst_92 [1] : vector<128x256xf32> to vector<128xf32>
    %176 = vector.shape_cast %175 : vector<128xf32> to vector<128x1xf32>
    %cst_93 = arith.constant dense<0.000000e+00> : vector<128xf32>
    %177 = vector.multi_reduction <add>, %174, %cst_93 [1] : vector<128x256xf32> to vector<128xf32>
    %178 = vector.shape_cast %177 : vector<128xf32> to vector<128x1xf32>
    %cst_94 = arith.constant 2.560000e+02 : f32
    %179 = vector.broadcast %cst_94 : f32 to vector<128x1xf32>
    %180 = arith.divf %178, %179 : vector<128x1xf32>
    %181 = tpu.concatenate %176, %180 in 0 : vector<128x1xf32>, vector<128x1xf32> -> vector<256x1xf32>
    %182 = arith.truncf %181 : vector<256x1xf32> to vector<256x1xbf16>
    %c0_95 = arith.constant 0 : index
    %c0_96 = arith.constant 0 : index
    %183 = vector.load %arg11[%c0_95, %c0_96] : memref<128x256xbf16, #tpu.memory_space<vmem>>, vector<128x256xbf16>
    %cst_97 = arith.constant dense<0.000000e+00> : vector<128x1xf32>
    %184 = tpu.matmul %183, %182, %cst_97 {dimension_numbers = #tpu.dot_dimension_numbers<[1], [0], [0], [1], [0, 0, 1, 1], [], []>} : vector<128x256xbf16>, vector<256x1xbf16>, vector<128x1xf32> -> vector<128x1xf32>
    %185 = arith.negf %184 : vector<128x1xf32>
    %186 = math.exp %185 : vector<128x1xf32>
    %cst_98 = arith.constant 1.000000e+00 : f32
    %187 = vector.broadcast %cst_98 : f32 to vector<128x1xf32>
    %188 = arith.addf %187, %186 : vector<128x1xf32>
    %189 = arith.divf %187, %188 : vector<128x1xf32>
    %190 = vector.broadcast %189 : vector<128x1xf32> to vector<128x256xf32>
    %191 = arith.mulf %190, %174 : vector<128x256xf32>
    %192 = arith.addf %191, %128 : vector<128x256xf32>
    %cst_99 = arith.constant 0.000000e+00 : f32
    %193 = vector.broadcast %cst_99 : f32 to vector<128x256xf32>
    %194 = arith.maximumf %192, %193 : vector<128x256xf32>
    %c0_100 = arith.constant 0 : index
    %c0_101 = arith.constant 0 : index
    %195 = vector.load %arg12[%c0_100, %c0_101] : memref<128x256xf32, #tpu.memory_space<vmem>>, vector<128x256xf32>
    tpu.vector_store %arg12[%c0_100, %c0_101], %194 {strides = array<i32>} : memref<128x256xf32, #tpu.memory_space<vmem>>, vector<128x256xf32>,
    return
  }
}

</mosaic_0001>

<bundles_post_ra>
// kernel: tpu_custom_call.1
= control target key start
LH: loop header
LB: loop body
LE: loop exit
PB: predicated region body
PF: predicated region fallthrough
CT: control target
= control target key end

     0   :  { %v6418_v2 = vmov 0   ;;  %vm164_vm0 = vcmask 523264   ;;  %s6405_s0 = inlined_call_operand.vmem [shape: f32[128,64], index: 0, kind: input, shape index: {}]   ;;  %s6406_s1 = inlined_call_operand.vmem [shape: bf16[64,288], index: 1, kind: input, shape index: {}]   ;;  %s6407_s2 = inlined_call_operand.vmem [shape: f32[1,288], index: 2, kind: input, shape index: {}]   ;;  %s6408_s3 = inlined_call_operand.vmem [shape: f32[9,128,32], index: 3, kind: input, shape index: {}]   ;;  %s6409_s4 = inlined_call_operand.vmem [shape: f32[1,32], index: 4, kind: input, shape index: {}]   ;;  %s6410_s5 = inlined_call_operand.vmem [shape: bf16[32,192], index: 5, kind: input, shape index: {}]   ;;  %s6411_s6 = inlined_call_operand.vmem [shape: f32[1,192], index: 6, kind: input, shape index: {}]   ;;  %s6412_s7 = inlined_call_operand.vmem [shape: f32[9,128,64], index: 7, kind: input, shape index: {}]   ;;  %s6413_s8 = inlined_call_operand.vmem [shape: f32[1,64], index: 8, kind: input, shape index: {}]   ;;  %s6414_s9 = inlined_call_operand.vmem [shape: f32[256,16], index: 9, kind: input, shape index: {}]   ;;  %s6415_s10 = inlined_call_operand.vmem [shape: f32[16,256], index: 10, kind: input, shape index: {}]   ;;  %s6416_s11 = inlined_call_operand.vmem [shape: bf16[128,256], index: 11, kind: input, shape index: {}]   ;;  %s6417_s12 = inlined_call_operand.hbm [shape: f32[128,256], index: 12, kind: output, shape index: {}]  }
   0x1   :  { %v3365_v0 = vld [vmem:[%s6406_s1 + $0x4c] ss:$12 sps:$4 sm:$0xff]   ;;  %v3367_v1 = vld [vmem:[%s6406_s1 + $0x48] ss:$12 sps:$4 sm:$0xff]   ;;  %221 = vmatprep.mubr.bf16.mxu0 %v6418_v2  ;;  %1079 = vmatprep.mubr.bf16.mxu1 %v6418_v2  ;;  %v3370_v4 = vld [vmem:[%s6406_s1 + $0x30] ss:$12 sps:$4 sm:$0xff]  }
   0x2   :  { %197 = vmatprep.subr.bf16.mxu0 %v3365_v0  ;;  %v3368_v3 = vld [vmem:[%s6406_s1 + $0x34] ss:$12 sps:$4 sm:$0xff]   ;;  %3363 = vset.pattern.permute.xlu1 %v6418_v2  ;;  %v3371_v5 = vld [vmem:[%s6406_s1 + $0x1c] ss:$12 sps:$4 sm:$0xff]   ;;  %v3373_v6 = vld [vmem:[%s6406_s1 + $0x18] ss:$12 sps:$4 sm:$0xff]  }
   0x3   :  { %198 = vmatpush1.bf16.msra.mxu0 %v3367_v1  ;;  %3364 = vset.pattern.permute.xlu0 %v6418_v2  ;;  %v3374_v7 = vld [vmem:[%s6406_s1 + $0x4] ss:$12 sps:$4 sm:$0xff]   ;;  %v3376_v8 = vld [vmem:[%s6406_s1] ss:$12 sps:$4 sm:$0xff]   ;;  %v46_v15 = vld [vmem:[%s6405_s0 + $0x18] sm:$0xff] }
   0x4   :  { %199 = vmatprep.subr.bf16.mxu0 %v3368_v3  ;;  %v43_v9 = vld [vmem:[%s6405_s0] sm:$0xff]  ;;  %v44_v10 = vld [vmem:[%s6405_s0 + $0x8] sm:$0xff]  ;;  %v3377_v11 = vld [vmem:[%s6406_s1 + $0x50] ss:$12 sps:$4 sm:$0xff]  }
   0x5   :  { %v59_v12 = vpack.c.bf16 %v44_v10, %v43_v9  ;;  %v3378_v13 = vld [vmem:[%s6406_s1 + $0x38] ss:$12 sps:$4 sm:$0xff]   ;;  %v45_v14 = vld [vmem:[%s6405_s0 + $0x10] sm:$0xff]  ;;  %v3379_v16 = vld [vmem:[%s6406_s1 + $0x20] ss:$12 sps:$4 sm:$0xff]  }
   0x7   :  { %200 = vmatpush1.bf16.msra.mxu0 %v3370_v4 }
   0x8   :  { %201 = vmatprep.subr.bf16.mxu0 %v3371_v5 }
   0xb   :  { %202 = vmatpush1.bf16.msra.mxu0 %v3373_v6 }
   0xc   :  { %203 = vmatprep.subr.bf16.mxu0 %v3374_v7 }
   0xf   :  { %204 = vmatpush1.bf16.msra.mxu0 %v3376_v8 }
  0x10   :  { %3333 = vmatprep.subr.bf16.mxu0 %v3377_v11 }
  0x12   :  { %2901 = vmatmul.mubr.msk.bf16.vlgmr.msra.gmra.mxu0 %vm164_vm0, %v59_v12 }
  0x13   :  { %3334 = vmatpush3.bf16.msra.mxu0 %v3377_v11  ;;  %231 = vmatprep.mubr.bf16.mxu0 %v6418_v2 }
  0x14   :  { %3335 = vmatprep.subr.bf16.mxu0 %v3378_v13 }
  0x15   :  { %17 = vsyncpa [#allocation3], 0  ;;  %v60_v17 = vpack.c.bf16 %v46_v15, %v45_v14  ;;  %v3380_v18 = vld [vmem:[%s6406_s1 + $0x8] ss:$12 sps:$4 sm:$0xff]   ;;  %v47_v19 = vld [vmem:[%s6405_s0 + $0x20] sm:$0xff]  ;;  %v85_v4 = vlaneseq  ;;  %vm1022_vm3 = vcmask 261120  }
  0x16   :  { %v48_v20 = vld [vmem:[%s6405_s0 + $0x28] sm:$0xff]  ;;  %v49_v22 = vld [vmem:[%s6405_s0 + $0x30] sm:$0xff]  ;;  %v50_v23 = vld [vmem:[%s6405_s0 + $0x38] sm:$0xff]  ;;  %s3509_s17 = smov 64   ;;  %vm1988_vm4 = vcmask 1040384   ;;  %vm1991_vm5 = vcmask 1041408  }
  0x17   :  { %3336 = vmatpush3.bf16.msra.mxu0 %v3378_v13  ;;  %v61_v21 = vpack.c.bf16 %v48_v20, %v47_v19  ;;  %v62_v24 = vpack.c.bf16 %v50_v23, %v49_v22  ;;  %v51_v25 = vld [vmem:[%s6405_s0 + $0x40] sm:$0xff]  ;;  %v52_v26 = vld [vmem:[%s6405_s0 + $0x48] sm:$0xff]  ;;  %v53_v28 = vld [vmem:[%s6405_s0 + $0x50] sm:$0xff]  ;;  %v3758_v7 = vshrl.u32 %v85_v4, 7  ;;  %vm1994_vm6 = vcmask 1042432  }
  0x18   :  { %3337 = vmatprep.subr.bf16.mxu0 %v3379_v16  ;;  %v63_v27 = vpack.c.bf16 %v52_v26, %v51_v25  ;;  %v54_v29 = vld [vmem:[%s6405_s0 + $0x58] sm:$0xff]  ;;  %v55_v31 = vld [vmem:[%s6405_s0 + $0x60] sm:$0xff]  ;;  %v56_v32 = vld [vmem:[%s6405_s0 + $0x68] sm:$0xff]  ;;  %vm2104_vm7 = vcmask 130048  }
  0x19   :  { %v64_v30 = vpack.c.bf16 %v54_v29, %v53_v28  ;;  %v65_v33 = vpack.c.bf16 %v56_v32, %v55_v31  ;;  %v57_v34 = vld [vmem:[%s6405_s0 + $0x70] sm:$0xff]  ;;  %v58_v35 = vld [vmem:[%s6405_s0 + $0x78] sm:$0xff]  ;;  %v3384_v39 = vld [vmem:[%s6410_s5 + $0x4] ss:$8 sps:$4 sm:$0xff]   ;;  %6515 = vst [vmem:[#allocation33_spill] sm:$0xff] %v3758_v7  ;;  %v95_v9 = vsub.s32 2, %v3758_v7 }
  0x1a   :  { %2902 = vmatmul.mubr.msk.bf16.gmra.mxu0 %vm164_vm0, %v60_v17  ;;  %v66_v36 = vpack.c.bf16 %v58_v35, %v57_v34  ;;  %v3381_v37 = vld [vmem:[%s6410_s5 + $0x14] ss:$8 sps:$4 sm:$0xff]   ;;  %v3383_v38 = vld [vmem:[%s6410_s5 + $0x10] ss:$8 sps:$4 sm:$0xff]   ;;  %v3386_v40 = vld [vmem:[%s6410_s5] ss:$8 sps:$4 sm:$0xff]  }
  0x1b   :  { %241 = vmatprep.mubr.bf16.mxu0 %v6418_v2  ;;  %3338 = vmatpush3.bf16.msra.mxu0 %v3379_v16  ;;  %v83_v11 = vld [vmem:[%s6407_s2] sm:$0x7]  ;;  %v2920_v25 = vld [vmem:[%s6408_s3 + $0x98] sm:$0xff]  ;;  %v2998_v29 = vld [vmem:[%s6408_s3 + $0x388] sm:$0xff]  ;;  %vm449_vm1 = vcmp.lt.s32.totalorder %v3758_v7, 1  ;;  %vm563_vm2 = vcmp.lt.s32.totalorder %v3758_v7, 7 }
  0x1c   :  { %3339 = vmatprep.subr.bf16.mxu0 %v3380_v18  ;;  %1059 = vmatprep.subr.bf16.mxu1 %v3381_v37  ;;  %v3770_v13 = vrot.slane %v83_v11, %v95_v9  ;;  %v2918_v34 = vld [vmem:[%s6408_s3 + $0x88] sm:$0xff]  ;;  %v3012_v37 = vld [vmem:[%s6408_s3 + $0x3f8] sm:$0xff] }
  0x1d   :  { %1060 = vmatpush1.bf16.msra.mxu1 %v3383_v38  ;;  %v3029_v38 = vld [vmem:[%s6408_s3 + $0x200] sm:$0xff] }
  0x1e   :  { %1061 = vmatprep.subr.bf16.mxu1 %v3384_v39 }
  0x1f   :  { %3340 = vmatpush3.bf16.msra.mxu0 %v3380_v18 }
  0x21   :  { %1062 = vmatpush1.bf16.msra.mxu1 %v3386_v40 }
  0x22   :  { %2903 = vmatmul.mubr.msk.bf16.gmra.mxu0 %vm164_vm0, %v61_v21 }
  0x23   :  { %251 = vmatprep.mubr.bf16.mxu0 %v6418_v2 }
  0x2a   :  { %2904 = vmatmul.mubr.msk.bf16.gmra.mxu0 %vm164_vm0, %v62_v24 }
  0x2b   :  { %261 = vmatprep.mubr.bf16.mxu0 %v6418_v2 }
  0x32   :  { %2905 = vmatmul.mubr.msk.bf16.gmra.mxu0 %vm164_vm0, %v63_v27 }
  0x33   :  { %271 = vmatprep.mubr.bf16.mxu0 %v6418_v2 }
  0x3a   :  { %2906 = vmatmul.mubr.msk.bf16.gmra.mxu0 %vm164_vm0, %v64_v30 }
  0x3b   :  { %281 = vmatprep.mubr.bf16.mxu0 %v6418_v2 }
  0x42   :  { %2907 = vmatmul.mubr.msk.bf16.gmra.mxu0 %vm164_vm0, %v65_v33 }
  0x43   :  { %291 = vmatprep.mubr.bf16.mxu0 %v6418_v2 }
  0x4a   :  { %2908 = vmatmul.mubr.msk.bf16.gmra.mxu0 %vm164_vm0, %v66_v36 }
  0x4b   :  { %3341 = vmatprep.mubr.msk.bf16.mxu0 %vm164_vm0, %v59_v12 }
  0x52   :  { %3342 = vmatmul.mubr.msk.bf16.vlgmr.msra.gmra.mxu0 %vm164_vm0, %v60_v17 }
  0x53   :  { %3345 = vmatprep.mubr.msk.bf16.mxu0 %vm164_vm0, %v61_v21 }
  0x5a   :  { %3346 = vmatmul.mubr.msk.bf16.gmra.mxu0 %vm164_vm0, %v62_v24 }
  0x5b   :  { %3349 = vmatprep.mubr.msk.bf16.mxu0 %vm164_vm0, %v63_v27 }
  0x62   :  { %3350 = vmatmul.mubr.msk.bf16.gmra.mxu0 %vm164_vm0, %v64_v30  ;;  %v3031_v30 = vld [vmem:[%s6408_s3 + $0x210] sm:$0xff] }
  0x63   :  { %3353 = vmatprep.mubr.msk.bf16.mxu0 %vm164_vm0, %v65_v33 }
  0x6a   :  { %3354 = vmatmul.mubr.msk.bf16.gmra.mxu0 %vm164_vm0, %v66_v36 }
  0xd2   :  { %v3702_v41 = vpop.f32.mrf.mxu0 }
  0xd3   :  { %6487 = vst [vmem:[#allocation5_spill] sm:$0xff] %v3702_v41 }
  0xd4   :  { %v3704_v42 = vpop.f32.mrf.mxu0 }
  0xd5   :  { %6488 = vst [vmem:[#allocation6_spill] sm:$0xff] %v3704_v42 }
  0xd6   :  { %v3706_v43 = vpop.f32.mrf.mxu0 }
  0xd7   :  { %6489 = vst [vmem:[#allocation7_spill] sm:$0xff] %v3706_v43 }
  0xd8   :  { %v3708_v44 = vpop.f32.mrf.mxu0 }
  0xd9   :  { %6490 = vst [vmem:[#allocation8_spill] sm:$0xff] %v3708_v44 }
  0xda   :  { %v3710_v45 = vpop.f32.mrf.mxu0 }
  0xdb   :  { %6491 = vst [vmem:[#allocation9_spill] sm:$0xff] %v3710_v45 }
  0xdc   :  { %v3712_v46 = vpop.f32.mrf.mxu0 }
  0xdd   :  { %6492 = vst [vmem:[#allocation10_spill] sm:$0xff] %v3712_v46 }
  0xde   :  { %v3714_v47 = vpop.f32.mrf.mxu0 }
  0xdf   :  { %6493 = vst [vmem:[#allocation11_spill] sm:$0xff] %v3714_v47  ;;  %v2928_v47 = vld [vmem:[%s6408_s3 + $0xd8] sm:$0xff] }
  0xe0   :  { %v3716_v48 = vpop.f32.mrf.mxu0 }
  0xe1   :  { %6494 = vst [vmem:[#allocation12_spill] sm:$0xff] %v3716_v48 }
  0xe2   :  { %v3718_v49 = vpop.f32.mrf.mxu0 }
  0xe3   :  { %6495 = vst [vmem:[#allocation13_spill] sm:$0xff] %v3718_v49 }
  0xe4   :  { %v3720_v50 = vpop.f32.mrf.mxu0 }
  0xe5   :  { %6496 = vst [vmem:[#allocation14_spill] sm:$0xff] %v3720_v50  ;;  %v3033_v50 = vld [vmem:[%s6408_s3 + $0x220] sm:$0xff] }
  0xe6   :  { %v3722_v51 = vpop.f32.mrf.mxu0 }
  0xe7   :  { %6497 = vst [vmem:[#allocation15_spill] sm:$0xff] %v3722_v51 }
  0xe8   :  { %v3724_v52 = vpop.f32.mrf.mxu0 }
  0xe9   :  { %6498 = vst [vmem:[#allocation16_spill] sm:$0xff] %v3724_v52 }
  0xea   :  { %v3726_v53 = vpop.f32.mrf.mxu0 }
  0xeb   :  { %6499 = vst [vmem:[#allocation17_spill] sm:$0xff] %v3726_v53 }
  0xec   :  { %v3728_v54 = vpop.f32.mrf.mxu0 }
  0xed   :  { %6500 = vst [vmem:[#allocation18_spill] sm:$0xff] %v3728_v54 }
  0xee   :  { %v3730_v55 = vpop.f32.mrf.mxu0 }
  0xef   :  { %6501 = vst [vmem:[#allocation19_spill] sm:$0xff] %v3730_v55 }
  0xf0   :  { %v3732_v56 = vpop.f32.mrf.mxu0 }
  0xf1   :  { %6502 = vst [vmem:[#allocation20_spill] sm:$0xff] %v3732_v56 }
  0xf2   :  { %v3734_v57 = vpop.f32.mrf.mxu0 }
  0xf3   :  { %6503 = vst [vmem:[#allocation21_spill] sm:$0xff] %v3734_v57 }
  0xf4   :  { %v3736_v58 = vpop.f32.mrf.mxu0 }
  0xf5   :  { %6504 = vst [vmem:[#allocation22_spill] sm:$0xff] %v3736_v58 }
  0xf6   :  { %v3738_v59 = vpop.f32.mrf.mxu0 }
  0xf7   :  { %6505 = vst [vmem:[#allocation23_spill] sm:$0xff] %v3738_v59  ;;  %v3017_v59 = vld [vmem:[%s6408_s3 + $0x420] sm:$0xff] }
  0xf8   :  { %v3740_v60 = vpop.f32.mrf.mxu0 }
  0xf9   :  { %6506 = vst [vmem:[#allocation24_spill] sm:$0xff] %v3740_v60 }
  0xfa   :  { %v3742_v61 = vpop.f32.mrf.mxu0 }
  0xfb   :  { %6507 = vst [vmem:[#allocation25_spill] sm:$0xff] %v3742_v61 }
  0xfc   :  { %v3744_v62 = vpop.f32.mrf.mxu0 }
  0xfd   :  { %6508 = vst [vmem:[#allocation26_spill] sm:$0xff] %v3744_v62 }
  0xfe   :  { %v3746_v63 = vpop.f32.mrf.mxu0 }
  0xff   :  { %6509 = vst [vmem:[#allocation27_spill] sm:$0xff] %v3746_v63 }
 0x100   :  { %v3748_v0 = vpop.f32.mrf.mxu0 }
 0x101   :  { %6510 = vst [vmem:[#allocation28_spill] sm:$0xff] %v3748_v0 }
 0x102   :  { %v3750_v1 = vpop.f32.mrf.mxu0 }
 0x103   :  { %6511 = vst [vmem:[#allocation29_spill] sm:$0xff] %v3750_v1  ;;  %v2923_v1 = vld [vmem:[%s6408_s3 + $0xb0] sm:$0xff] }
 0x104   :  { %v3752_v3 = vpop.f32.mrf.mxu0 }
 0x105   :  { %6512 = vst [vmem:[#allocation30_spill] sm:$0xff] %v3752_v3  ;;  %v3013_v3 = vld [vmem:[%s6408_s3 + $0x400] sm:$0xff] }
 0x106   :  { %v3754_v5 = vpop.f32.mrf.mxu0 }
 0x107   :  { %6513 = vst [vmem:[#allocation31_spill] sm:$0xff] %v3754_v5 }
 0x108   :  { %v3756_v6 = vpop.f32.mrf.mxu0 }
 0x109   :  { %6514 = vst [vmem:[#allocation32_spill] sm:$0xff] %v3756_v6 }
 0x10a   :  { %v3760_v8 = vpop.f32.mrf.mxu0 }
 0x10b   :  { %6516 = vst [vmem:[#allocation34_spill] sm:$0xff] %v3760_v8 }
 0x10c   :  { %v3763_v10 = vpop.f32.mrf.mxu0 }
 0x10d   :  { %6517 = vst [vmem:[#allocation35_spill] sm:$0xff] %v3763_v10 }
 0x10e   :  { %v3768_v12 = vpop.f32.mrf.mxu0 }
 0x10f   :  { %6518 = vst [vmem:[#allocation36_spill] sm:$0xff] %v3768_v12 }
 0x110   :  { %v3772_v14 = vpop.f32.mrf.mxu0 }
 0x111   :  { %6519 = vst [vmem:[#allocation37_spill] sm:$0xff] %v3772_v14 }
 0x112   :  { %v3343_v15 = vpop.f32.mrf.mxu0 }
 0x113   :  { %v345_v16 = vadd.f32 %v3343_v15, %v3770_v13 }
 0x114   :  { %v336_v17 = vpop.f32.mrf.mxu0 }
 0x115   :  { %v401_v18 = vmax.f32 %v345_v16, 0.0  ;;  %v337_v19 = vadd.f32 %v336_v17, %v3770_v13  ;;  %v2921_v16 = vld [vmem:[%s6408_s3 + $0xa0] sm:$0xff] }
 0x116   :  { %v3344_v20 = vpop.f32.mrf.mxu0 }
 0x117   :  { %v399_v21 = vmax.f32 %v337_v19, 0.0  ;;  %v348_v22 = vadd.f32 %v3344_v20, %v3770_v13  ;;  %v3777_v23 = vmin.f32 %v401_v18, 6.0 }
 0x118   :  { %v339_v24 = vpop.f32.mrf.mxu0 }
 0x119   :  { %v402_v26 = vmax.f32 %v348_v22, 0.0  ;;  %v340_v27 = vadd.f32 %v339_v24, %v3770_v13  ;;  %v3789_v31 = vmin.f32 %v399_v21, 6.0  ;;  %v6421_v33 = vrot.slane %v3777_v23, 7  ;;  %v470_v22 = vld [vmem:[%s6408_s3 + $0x20] sm:$0xff]  ;;  %v2924_v24 = vld [vmem:[%s6408_s3 + $0xb8] sm:$0xff] }
 0x11a   :  { %v3347_v28 = vpop.f32.mrf.mxu0  ;;  %v3799_v36 = vmul.f32 %v2920_v25, %v3777_v23  ;;  %v549_v9 = vrot.slane %v3777_v23, 1  ;;  %v3811_v11 = vmul.f32 %v2998_v29, %v3777_v23  ;;  %v3814_v15 = vmul.f32 %v3031_v30, %v3777_v23  ;;  %v3032_v29 = vld [vmem:[%s6408_s3 + $0x218] sm:$0xff] }
 0x11b   :  { %v361_v32 = vadd.f32 %v3347_v28, %v3770_v13  ;;  %v3807_v39 = vmin.f32 %v402_v26, 6.0  ;;  %v400_v40 = vmax.f32 %v340_v27, 0.0  ;;  %v3822_v20 = vmul.f32 %v2918_v34, %v3789_v31  ;;  %v2999_v28 = vld [vmem:[%s6408_s3 + $0x390] sm:$0xff] }
 0x11c   :  { %v352_v35 = vpop.f32.mrf.mxu0  ;;  %v3831_v26 = vmul.f32 %v3012_v37, %v3789_v31  ;;  %v3834_v27 = vmul.f32 %v3029_v38, %v3789_v31  ;;  %v2919_v37 = vld [vmem:[%s6408_s3 + $0x90] sm:$0xff]  ;;  %v2997_v38 = vld [vmem:[%s6408_s3 + $0x380] sm:$0xff]  ;;  %v6523_v54 = vrot.slane %v3777_v23, 7  ;;  %v6524_v52 = vrot.slane %v3789_v31, 1 }
 0x11d   :  { %v405_v4 = vmax.f32 %v361_v32, 0.0  ;;  %v353_v17 = vadd.f32 %v352_v35, %v3770_v13  ;;  %v6420_v21 = vrot.slane %v3807_v39, 7  ;;  %v416_v30 = vmin.f32 %v400_v40, 6.0 }
 0x11e   :  { %v3348_v18 = vpop.f32.mrf.mxu0  ;;  %6520 = vst [vmem:[#allocation38_spill] sm:$0xff] %v3831_v26  ;;  %v519_v35 = vmul.f32 %v2921_v16, %v3807_v39  ;;  %v3030_v16 = vld [vmem:[%s6408_s3 + $0x208] sm:$0xff]  ;;  %v3877_v10 = vmul.f32 %v2999_v28, %v3807_v39  ;;  %v3880_v6 = vmul.f32 %v3032_v29, %v3807_v39  ;;  %v6527_v42 = vrot.slane %v3807_v39, 7 }
 0x11f   :  { %v3848_v34 = vsel %vm449_vm1, %v6421_v33, %v6420_v21  ;;  %v3857_v40 = vmin.f32 %v405_v4, 6.0  ;;  %v403_v2 = vmax.f32 %v353_v17, 0.0  ;;  %v432_v19 = vrot.slane %v416_v30, 7  ;;  %v468_v21 = vld [vmem:[%s6408_s3 + $0x10] sm:$0xff] }
 0x120   :  { %v355_v32 = vpop.f32.mrf.mxu0  ;;  %v486_v25 = vmul.f32 %v470_v22, %v3848_v34  ;;  %v548_v33 = vrot.slane %v416_v30, 1  ;;  %v364_v4 = vadd.f32 %v3348_v18, %v3770_v13  ;;  %v6521_v17 = vrot.slane %v3807_v39, 1 }
 0x121   :  { %v356_v0 = vadd.f32 %v355_v32, %v3770_v13  ;;  %v6522_v18 = vrot.slane %v3789_v31, 7  ;;  %v761_v60 = vmul.f32 %v2997_v38, %v416_v30  ;;  %v3897_v56 = vmul.f32 %v3030_v16, %v416_v30  ;;  %v3035_v38 = vld [vmem:[%s6408_s3 + $0x230] sm:$0xff] }
 0x122   :  { %v3351_v14 = vpop.f32.mrf.mxu0  ;;  %v3874_v22 = vsel %vm563_vm2, %v549_v9, %v6521_v17  ;;  %v517_v17 = vmul.f32 %v2919_v37, %v416_v30  ;;  %v3894_v28 = vsel %vm563_vm2, %v548_v33, %v549_v9  ;;  %v3901_v32 = vmul.f32 %v2924_v24, %v3857_v40 }
 0x123   :  { %v3890_v62 = vsel %vm449_vm1, %v6522_v18, %v432_v19  ;;  %v3002_v18 = vld [vmem:[%s6408_s3 + $0x3a8] sm:$0xff]  ;;  %v3906_v37 = vadd.f32 %v519_v35, %v486_v25  ;;  %v794_v9 = vmul.f32 %v3013_v3, %v3894_v28  ;;  %v406_v30 = vmax.f32 %v364_v4, 0.0 }
 0x124   :  { %v368_v29 = vpop.f32.mrf.mxu0  ;;  %v484_v58 = vmul.f32 %v468_v21, %v3890_v62  ;;  %v3912_v21 = vmin.f32 %v403_v2, 6.0  ;;  %v3918_v24 = vsel %vm449_vm1, %v432_v19, %v6523_v54  ;;  %v3924_v25 = vsel %vm563_vm2, %v6524_v52, %v548_v33  ;;  %v2922_v3 = vld [vmem:[%s6408_s3 + $0xa8] sm:$0xff]  ;;  %v3000_v2 = vld [vmem:[%s6408_s3 + $0x398] sm:$0xff] }
 0x125   :  { %6525 = vst [vmem:[#allocation39_spill] sm:$0xff] %v3924_v25  ;;  %v404_v35 = vmax.f32 %v356_v0, 0.0  ;;  %v377_v23 = vadd.f32 %v3351_v14, %v3770_v13  ;;  %v553_v54 = vrot.slane %v3857_v40, 1  ;;  %v3935_v19 = vmul.f32 %v3002_v18, %v3857_v40  ;;  %v471_v52 = vld [vmem:[%s6408_s3 + $0x28] sm:$0xff] }
 0x126   :  { %v3352_v16 = vpop.f32.mrf.mxu0  ;;  %v435_v4 = vrot.slane %v3912_v21, 7  ;;  %v551_v33 = vrot.slane %v3912_v21, 1  ;;  %v3945_v48 = vadd.f32 %v517_v17, %v484_v58  ;;  %v3948_v14 = vmul.f32 %v3035_v38, %v3857_v40  ;;  %v2925_v58 = vld [vmem:[%s6408_s3 + $0xc0] sm:$0xff]  ;;  %v3003_v38 = vld [vmem:[%s6408_s3 + $0x3b0] sm:$0xff] }
 0x127   :  { %v3950_v18 = vmin.f32 %v406_v30, 6.0  ;;  %v420_v46 = vmin.f32 %v404_v35, 6.0  ;;  %v3952_v44 = vadd.f32 %v794_v9, %v761_v60  ;;  %v520_v8 = vmul.f32 %v2922_v3, %v3912_v21  ;;  %v3036_v30 = vld [vmem:[%s6408_s3 + $0x238] sm:$0xff]  ;;  %v472_v9 = vld [vmem:[%s6408_s3 + $0x30] sm:$0xff] }
 0x128   :  { %v371_v0 = vpop.f32.mrf.mxu0  ;;  %6526 = vst [vmem:[#allocation40_spill] sm:$0xff] %v3948_v14  ;;  %v3958_v12 = vsel %vm449_vm1, %v6527_v42, %v435_v4  ;;  %v3962_v5 = vmul.f32 %v3000_v2, %v3912_v21  ;;  %v3969_v60 = vmul.f32 %v3033_v50, %v3912_v21  ;;  %v474_v42 = vld [vmem:[%s6408_s3 + $0x40] sm:$0xff]  ;;  %v409_v3 = vmax.f32 %v377_v23, 0.0 }
 0x129   :  { %v487_v17 = vmul.f32 %v471_v52, %v3958_v12  ;;  %v6529_v35 = vrot.slane %v3807_v39, 1  ;;  %v436_v52 = vrot.slane %v420_v46, 7  ;;  %v369_v23 = vadd.f32 %v368_v29, %v3770_v13 }
 0x12a   :  { %6528 = vst [vmem:[#allocation41_spill] sm:$0xff] %v3969_v60  ;;  %v3355_v2 = vpop.f32.mrf.mxu0  ;;  %v6530_v63 = vrot.slane %v3950_v18, 7  ;;  %v6531_v39 = vrot.slane %v3857_v40, 7  ;;  %v523_v21 = vmul.f32 %v2925_v58, %v3950_v18  ;;  %v552_v61 = vrot.slane %v420_v46, 1  ;;  %v3001_v58 = vld [vmem:[%s6408_s3 + $0x3a0] sm:$0xff] }
 0x12b   :  { %v3985_v50 = vsel %vm563_vm2, %v6529_v35, %v551_v33  ;;  %v380_v57 = vadd.f32 %v3352_v16, %v3770_v13  ;;  %v4010_v29 = vmul.f32 %v3003_v38, %v3950_v18  ;;  %v4013_v53 = vmul.f32 %v3036_v30, %v3950_v18  ;;  %v3034_v38 = vld [vmem:[%s6408_s3 + $0x228] sm:$0xff] }
 0x12c   :  { %v4001_v35 = vsel %vm449_vm1, %v6531_v39, %v6530_v63  ;;  %v4017_v63 = vsel %vm449_vm1, %v435_v4, %v436_v52  ;;  %v4022_v39 = vadd.f32 %v520_v8, %v487_v17  ;;  %v521_v51 = vmul.f32 %v2923_v1, %v420_v46  ;;  %v384_v30 = vpop.f32.mrf.mxu0 }
 0x12d   :  { %v490_v55 = vmul.f32 %v474_v42, %v4001_v35  ;;  %6532 = vst [vmem:[#allocation42_spill] sm:$0xff] %v4010_v29  ;;  %6533 = vst [vmem:[#allocation43_spill] sm:$0xff] %v4013_v53  ;;  %v488_v16 = vmul.f32 %v472_v9, %v4017_v63  ;;  %v4027_v42 = vsel %vm563_vm2, %v552_v61, %v553_v54  ;;  %v6534_v4 = vrot.slane %v3950_v18, 1 }
 0x12e   :  { %v798_v8 = vmul.f32 %v3017_v59, %v4027_v42  ;;  %v4039_v17 = vmin.f32 %v409_v3, 6.0  ;;  %v407_v1 = vmax.f32 %v369_v23, 0.0  ;;  %v765_v9 = vmul.f32 %v3001_v58, %v420_v46  ;;  %v3004_v58 = vld [vmem:[%s6408_s3 + $0x3b8] sm:$0xff] }
 0x12f   :  { %v4036_v49 = vsel %vm563_vm2, %v553_v54, %v6534_v4  ;;  %v410_v45 = vmax.f32 %v380_v57, 0.0  ;;  %v372_v43 = vadd.f32 %v371_v0, %v3770_v13  ;;  %v393_v41 = vadd.f32 %v3355_v2, %v3770_v13  ;;  %v3006_v57 = vld [vmem:[%s6408_s3 + $0x3c8] sm:$0xff] }
 0x130   :  { %v4046_v26 = vadd.f32 %v523_v21, %v490_v55  ;;  %v6536_v54 = vrot.slane %v3857_v40, 7  ;;  %v4056_v3 = vsel %vm563_vm2, %v551_v33, %v552_v61  ;;  %v4058_v23 = vmul.f32 %v3034_v38, %v420_v46  ;;  %v3039_v40 = vld [vmem:[%s6408_s3 + $0x250] sm:$0xff]  ;;  %v3356_v61 = vpop.f32.mrf.mxu0 }
 0x131   :  { %v4063_v0 = vadd.f32 %v521_v51, %v488_v16  ;;  %v4065_v55 = vadd.f32 %v798_v8, %v765_v9  ;;  %v4070_v2 = vmin.f32 %v407_v1, 6.0  ;;  %v4072_v21 = vmin.f32 %v410_v45, 6.0  ;;  %v2926_v51 = vld [vmem:[%s6408_s3 + $0xc8] sm:$0xff]  ;;  %v3037_v8 = vld [vmem:[%s6408_s3 + $0x240] sm:$0xff] }
 0x132   :  { %6535 = vst [vmem:[#allocation44_spill] sm:$0xff] %v4046_v26  ;;  %v4052_v59 = vsel %vm449_vm1, %v436_v52, %v6536_v54  ;;  %6537 = vst [vmem:[#allocation45_spill] sm:$0xff] %v4058_v23  ;;  %v441_v46 = vrot.slane %v4039_v17, 7  ;;  %v4076_v33 = vmul.f32 %v2928_v47, %v4039_v17  ;;  %v557_v52 = vrot.slane %v4039_v17, 1  ;;  %v475_v47 = vld [vmem:[%s6408_s3 + $0x48] sm:$0xff]  ;;  %v478_v54 = vld [vmem:[%s6408_s3 + $0x60] sm:$0xff] }
 0x133   :  { %6538 = vst [vmem:[#allocation46_spill] sm:$0xff] %v4063_v0  ;;  %v408_v16 = vmax.f32 %v372_v43, 0.0  ;;  %v4086_v45 = vmul.f32 %v3006_v57, %v4039_v17  ;;  %v439_v38 = vrot.slane %v4070_v2, 7  ;;  %v555_v4 = vrot.slane %v4070_v2, 1  ;;  %v2929_v57 = vld [vmem:[%s6408_s3 + $0xe0] sm:$0xff]  ;;  %v2927_v43 = vld [vmem:[%s6408_s3 + $0xd0] sm:$0xff] }
 0x134   :  { %6539 = vst [vmem:[#allocation47_spill] sm:$0xff] %v4076_v33  ;;  %v413_v1 = vmax.f32 %v393_v41, 0.0  ;;  %v4097_v9 = vmul.f32 %v3039_v40, %v4039_v17  ;;  %v385_v33 = vadd.f32 %v384_v30, %v3770_v13  ;;  %v6542_v26 = vrot.slane %v3950_v18, 7 }
 0x135   :  { %6540 = vst [vmem:[#allocation48_spill] sm:$0xff] %v4086_v45  ;;  %v396_v45 = vadd.f32 %v3356_v61, %v3770_v13  ;;  %v524_v17 = vmul.f32 %v2926_v51, %v4070_v2  ;;  %v4116_v40 = vmul.f32 %v3004_v58, %v4070_v2  ;;  %v4121_v53 = vmul.f32 %v3037_v8, %v4070_v2  ;;  %v3040_v51 = vld [vmem:[%s6408_s3 + $0x258] sm:$0xff] }
 0x136   :  { %6541 = vst [vmem:[#allocation49_spill] sm:$0xff] %v4097_v9  ;;  %v4112_v41 = vsel %vm449_vm1, %v6542_v26, %v439_v38  ;;  %v6546_v30 = vrot.slane %v4072_v21, 7  ;;  %v3007_v26 = vld [vmem:[%s6408_s3 + $0x3d0] sm:$0xff]  ;;  %v424_v58 = vmin.f32 %v408_v16, 6.0  ;;  %v4152_v16 = vmin.f32 %v413_v1, 6.0 }
 0x137   :  { %6543 = vst [vmem:[#allocation50_spill] sm:$0xff] %v4112_v41  ;;  %6544 = vst [vmem:[#allocation51_spill] sm:$0xff] %v4116_v40  ;;  %v491_v9 = vmul.f32 %v475_v47, %v4112_v41  ;;  %v6548_v47 = vrot.slane %v3950_v18, 1  ;;  %v3038_v18 = vld [vmem:[%s6408_s3 + $0x248] sm:$0xff]  ;;  %v411_v14 = vmax.f32 %v385_v33, 0.0  ;;  %v414_v40 = vmax.f32 %v396_v45, 0.0 }
 0x138   :  { %6545 = vst [vmem:[#allocation52_spill] sm:$0xff] %v4121_v53  ;;  %v4127_v61 = vsel %vm449_vm1, %v441_v46, %v6546_v30  ;;  %v527_v30 = vmul.f32 %v2929_v57, %v4072_v21  ;;  %v3005_v53 = vld [vmem:[%s6408_s3 + $0x3c0] sm:$0xff]  ;;  %6549 = vst [vmem:[#allocation54_spill] sm:$0xff] %v4152_v16  ;;  %v556_v57 = vrot.slane %v424_v58, 1  ;;  %v6551_v0 = vrot.slane %v4072_v21, 1 }
 0x139   :  { %6547 = vst [vmem:[#allocation53_spill] sm:$0xff] %v4127_v61  ;;  %v4139_v2 = vsel %vm563_vm2, %v6548_v47, %v555_v4  ;;  %v494_v8 = vmul.f32 %v478_v54, %v4127_v61  ;;  %v440_v47 = vrot.slane %v424_v58, 7  ;;  %v476_v54 = vld [vmem:[%s6408_s3 + $0x50] sm:$0xff]  ;;  %v3021_v61 = vld [vmem:[%s6408_s3 + $0x440] sm:$0xff]  ;;  %v4160_v29 = vadd.f32 %v524_v17, %v491_v9  ;;  %v3010_v17 = vld [vmem:[%s6408_s3 + $0x3e8] sm:$0xff] }
 0x13a   :  { %v4166_v1 = vsel %vm563_vm2, %v557_v52, %v6551_v0  ;;  %v4169_v41 = vmul.f32 %v3007_v26, %v4072_v21  ;;  %v4172_v23 = vmul.f32 %v3040_v51, %v4072_v21  ;;  %v525_v45 = vmul.f32 %v2927_v43, %v424_v58  ;;  %v2932_v0 = vld [vmem:[%s6408_s3 + $0xf8] sm:$0xff]  ;;  %v387_v43 = vpop.f32.mrf.mxu0 }
 0x13b   :  { %6550 = vst [vmem:[#allocation55_spill] sm:$0xff] %v4160_v29  ;;  %6552 = vst [vmem:[#allocation56_spill] sm:$0xff] %v4166_v1  ;;  %v4174_v60 = vadd.f32 %v527_v30, %v494_v8  ;;  %v4178_v33 = vsel %vm449_vm1, %v439_v38, %v440_v47  ;;  %v4182_v9 = vsel %vm563_vm2, %v556_v57, %v557_v52  ;;  %v3027_v29 = vld [vmem:[%s6408_s3 + $0x470] sm:$0xff]  ;;  %v6572_v1 = vrot.slane %v4072_v21, 1 }
 0x13c   :  { %6553 = vst [vmem:[#allocation57_spill] sm:$0xff] %v4169_v41  ;;  %6554 = vst [vmem:[#allocation58_spill] sm:$0xff] %v4172_v23  ;;  %v492_v26 = vmul.f32 %v476_v54, %v4178_v33  ;;  %v769_v51 = vmul.f32 %v3005_v53, %v424_v58  ;;  %v802_v8 = vmul.f32 %v3021_v61, %v4182_v9  ;;  %v4201_v23 = vmin.f32 %v414_v40, 6.0  ;;  %v2934_v54 = vld [vmem:[%s6408_s3 + $0x108] sm:$0xff]  ;;  %v3008_v40 = vld [vmem:[%s6408_s3 + $0x3d8] sm:$0xff] }
 0x13d   :  { %6555 = vst [vmem:[#allocation59_spill] sm:$0xff] %v4174_v60  ;;  %v4192_v38 = vmul.f32 %v3038_v18, %v424_v58  ;;  %v4196_v52 = vsel %vm449_vm1, %v440_v47, %v441_v46  ;;  %v4199_v60 = vmin.f32 %v411_v14, 6.0  ;;  %v4208_v53 = vsel %vm563_vm2, %v555_v4, %v556_v57  ;;  %v2930_v14 = vld [vmem:[%s6408_s3 + $0xe8] sm:$0xff]  ;;  %v3041_v4 = vld [vmem:[%s6408_s3 + $0x260] sm:$0xff] }
 0x13e   :  { %6557 = vst [vmem:[#allocation61_spill] sm:$0xff] %v4201_v23  ;;  %v4211_v61 = vmul.f32 %v2932_v0, %v4152_v16  ;;  %v4215_v58 = vmul.f32 %v3010_v17, %v4152_v16  ;;  %v4226_v18 = vadd.f32 %v525_v45, %v492_v26  ;;  %v4228_v47 = vadd.f32 %v802_v8, %v769_v51  ;;  %v479_v0 = vld [vmem:[%s6408_s3 + $0x68] sm:$0xff]  ;;  %v2917_v17 = vld [vmem:[%s6408_s3 + $0x80] sm:$0xff] }
 0x13f   :  { %6556 = vst [vmem:[#allocation60_spill] sm:$0xff] %v4192_v38  ;;  %v443_v57 = vrot.slane %v4199_v60, 7  ;;  %v388_v46 = vadd.f32 %v387_v43, %v3770_v13  ;;  %v559_v30 = vrot.slane %v4199_v60, 1  ;;  %v466_v45 = vld [vmem:[%s6408_s3] sm:$0xff]  ;;  %v562_v26 = vrot.slane %v4201_v23, 1  ;;  %v467_v51 = vld [vmem:[%s6408_s3 + $0x8] sm:$0xff] }
 0x140   :  { %6558 = vst [vmem:[#allocation62_spill] sm:$0xff] %v4211_v61  ;;  %6559 = vst [vmem:[#allocation63_spill] sm:$0xff] %v4215_v58  ;;  %v446_v61 = vrot.slane %v4201_v23, 7  ;;  %v598_v8 = vmul.f32 %v2934_v54, %v3924_v25  ;;  %v6562_v58 = vrot.slane %v4072_v21, 7  ;;  %v528_v43 = vmul.f32 %v2930_v14, %v4199_v60  ;;  %v3011_v38 = vld [vmem:[%s6408_s3 + $0x3f0] sm:$0xff]  ;;  %v2933_v54 = vld [vmem:[%s6408_s3 + $0x100] sm:$0xff] }
 0x141   :  { %6560 = vst [vmem:[#allocation64_spill] sm:$0xff] %v4226_v18  ;;  %6561 = vst [vmem:[#allocation65_spill] sm:$0xff] %v4228_v47  ;;  %v4256_v41 = vmul.f32 %v3008_v40, %v4199_v60  ;;  %v4259_v18 = vmul.f32 %v3041_v4, %v4199_v60  ;;  %v6566_v40 = vrot.slane %v4152_v16, 7  ;;  %v6568_v4 = vrot.slane %v3789_v31, 7  ;;  %v2950_v47 = vld [vmem:[%s6408_s3 + $0x188] sm:$0xff] }
 0x142   :  { %v4252_v13 = vsel %vm449_vm1, %v6562_v58, %v443_v57  ;;  %v2949_v58 = vld [vmem:[%s6408_s3 + $0x180] sm:$0xff] }
 0x143   :  { %6563 = vst [vmem:[#allocation66_spill] sm:$0xff] %v4252_v13  ;;  %6564 = vst [vmem:[#allocation67_spill] sm:$0xff] %v4256_v41  ;;  %v495_v14 = vmul.f32 %v479_v0, %v4252_v13  ;;  %v4275_v60 = vsel %vm449_vm1, %v6566_v40, %v446_v61  ;;  %v515_v41 = vmul.f32 %v2917_v17, %v4201_v23  ;;  %v6570_v13 = vrot.slane %v3789_v31, 1  ;;  %v2965_v17 = vld [vmem:[%s6408_s3 + $0x280] sm:$0xff] }
 0x144   :  { %6565 = vst [vmem:[#allocation68_spill] sm:$0xff] %v4259_v18  ;;  %6567 = vst [vmem:[#allocation69_spill] sm:$0xff] %v4275_v60  ;;  %v4281_v18 = vsel %vm449_vm1, %v446_v61, %v6568_v4  ;;  %v482_v0 = vmul.f32 %v466_v45, %v4275_v60  ;;  %v412_v61 = vmax.f32 %v388_v46, 0.0  ;;  %v4305_v31 = vsel %vm563_vm2, %v6572_v1, %v559_v30  ;;  %v2966_v46 = vld [vmem:[%s6408_s3 + $0x288] sm:$0xff] }
 0x145   :  { %6569 = vst [vmem:[#allocation70_spill] sm:$0xff] %v4281_v18  ;;  %v4292_v40 = vsel %vm563_vm2, %v562_v26, %v6570_v13  ;;  %v483_v4 = vmul.f32 %v467_v51, %v4281_v18  ;;  %6573 = vst [vmem:[#allocation72_spill] sm:$0xff] %v4305_v31  ;;  %v4308_v45 = vmul.f32 %v3011_v38, %v4201_v23  ;;  %v2981_v51 = vld [vmem:[%s6408_s3 + $0x300] sm:$0xff]  ;;  %v6576_v1 = vrot.slane %v4152_v16, 1 }
 0x146   :  { %6571 = vst [vmem:[#allocation71_spill] sm:$0xff] %v4292_v40  ;;  %v597_v13 = vmul.f32 %v2933_v54, %v4292_v40  ;;  %v630_v60 = vmul.f32 %v2949_v58, %v4281_v18  ;;  %v4318_v21 = vadd.f32 %v528_v43, %v495_v14  ;;  %v428_v23 = vmin.f32 %v412_v61, 6.0  ;;  %v2931_v54 = vld [vmem:[%s6408_s3 + $0xf0] sm:$0xff]  ;;  %v3009_v58 = vld [vmem:[%s6408_s3 + $0x3e0] sm:$0xff]  ;;  %v2982_v43 = vld [vmem:[%s6408_s3 + $0x308] sm:$0xff] }
 0x147   :  { %6574 = vst [vmem:[#allocation73_spill] sm:$0xff] %v4308_v45  ;;  %v4324_v38 = vsel %vm563_vm2, %v6576_v1, %v562_v26  ;;  %v631_v18 = vmul.f32 %v2950_v47, %v3890_v62  ;;  %v531_v14 = vadd.f32 %v515_v41, %v482_v0  ;;  %v4337_v45 = vmul.f32 %v3027_v29, %v4292_v40  ;;  %v3042_v26 = vld [vmem:[%s6408_s3 + $0x268] sm:$0xff]  ;;  %v480_v47 = vld [vmem:[%s6408_s3 + $0x70] sm:$0xff] }
 0x148   :  { %6575 = vst [vmem:[#allocation74_spill] sm:$0xff] %v4318_v21  ;;  %6577 = vst [vmem:[#allocation75_spill] sm:$0xff] %v4324_v38  ;;  %v532_v61 = vadd.f32 %v3822_v20, %v483_v4  ;;  %v679_v1 = vmul.f32 %v2965_v17, %v3924_v25  ;;  %v444_v21 = vrot.slane %v428_v23, 7  ;;  %v560_v38 = vrot.slane %v428_v23, 1  ;;  %v3014_v20 = vld [vmem:[%s6408_s3 + $0x408] sm:$0xff]  ;;  %v469_v4 = vld [vmem:[%s6408_s3 + $0x18] sm:$0xff] }
 0x149   :  { %6578 = vst [vmem:[#allocation76_spill] sm:$0xff] %v4337_v45  ;;  %v646_v31 = vadd.f32 %v630_v60, %v597_v13  ;;  %v680_v41 = vmul.f32 %v2966_v46, %v3894_v28  ;;  %v4348_v0 = vmul.f32 %v2931_v54, %v428_v23  ;;  %v4350_v29 = vmul.f32 %v3009_v58, %v428_v23  ;;  %v2935_v54 = vld [vmem:[%s6408_s3 + $0x110] sm:$0xff] }
 0x14a   :  { %v712_v45 = vmul.f32 %v2981_v51, %v3890_v62  ;;  %v713_v40 = vmul.f32 %v2982_v43, %v3918_v24  ;;  %v4362_v60 = vsel %vm449_vm1, %v443_v57, %v444_v21  ;;  %v6579_v17 = vrot.slane %v4152_v16, 1  ;;  %v3025_v62 = vld [vmem:[%s6408_s3 + $0x460] sm:$0xff] }
 0x14b   :  { %v4373_v46 = vmul.f32 %v3042_v26, %v428_v23  ;;  %v647_v51 = vadd.f32 %v631_v18, %v598_v8  ;;  %v6580_v57 = vrot.slane %v4152_v16, 7  ;;  %v4385_v43 = vmul.f32 %v480_v47, %v4362_v60  ;;  %v2936_v18 = vld [vmem:[%s6408_s3 + $0x118] sm:$0xff]  ;;  %v2951_v8 = vld [vmem:[%s6408_s3 + $0x190] sm:$0xff] }
 0x14c   :  { %v4368_v13 = vsel %vm563_vm2, %v560_v38, %v6579_v17  ;;  %v4389_v17 = vsel %vm563_vm2, %v559_v30, %v560_v38  ;;  %v728_v23 = vadd.f32 %v712_v45, %v679_v1  ;;  %v729_v26 = vadd.f32 %v713_v40, %v680_v41  ;;  %v2952_v30 = vld [vmem:[%s6408_s3 + $0x198] sm:$0xff]  ;;  %v2967_v45 = vld [vmem:[%s6408_s3 + $0x290] sm:$0xff] }
 0x14d   :  { %v4382_v58 = vsel %vm449_vm1, %v444_v21, %v6580_v57  ;;  %v795_v21 = vmul.f32 %v3014_v20, %v3874_v22  ;;  %v826_v57 = vadd.f32 %v646_v31, %v531_v14  ;;  %v485_v47 = vmul.f32 %v469_v4, %v3918_v24  ;;  %v2968_v38 = vld [vmem:[%s6408_s3 + $0x298] sm:$0xff]  ;;  %v2983_v41 = vld [vmem:[%s6408_s3 + $0x310] sm:$0xff] }
 0x14e   :  { %v4409_v1 = vmul.f32 %v3025_v62, %v4368_v13  ;;  %v827_v40 = vadd.f32 %v647_v51, %v532_v61  ;;  %v842_v31 = vadd.f32 %v3952_v44, %v728_v23  ;;  %v599_v14 = vmul.f32 %v2935_v54, %v3894_v28  ;;  %v2984_v20 = vld [vmem:[%s6408_s3 + $0x318] sm:$0xff]  ;;  %v3015_v44 = vld [vmem:[%s6408_s3 + $0x410] sm:$0xff] }
 0x14f   :  { %v811_v4 = vadd.f32 %v795_v21, %v3811_v11  ;;  %v534_v7 = vadd.f32 %v3799_v36, %v485_v47  ;;  %v600_v62 = vmul.f32 %v2936_v18, %v3874_v22  ;;  %v632_v61 = vmul.f32 %v2951_v8, %v3918_v24  ;;  %v3016_v28 = vld [vmem:[%s6408_s3 + $0x418] sm:$0xff] }
 0x150   :  { %v858_v51 = vadd.f32 %v842_v31, %v826_v57  ;;  %v633_v54 = vmul.f32 %v2952_v30, %v3848_v34  ;;  %v681_v23 = vmul.f32 %v2967_v45, %v3874_v22  ;;  %v682_v11 = vmul.f32 %v2968_v38, %v3985_v50  ;;  %v2937_v57 = vld [vmem:[%s6408_s3 + $0x120] sm:$0xff]  ;;  %v2938_v22 = vld [vmem:[%s6408_s3 + $0x128] sm:$0xff] }
 0x151   :  { %v843_v36 = vadd.f32 %v811_v4, %v729_v26  ;;  %v648_v21 = vadd.f32 %v632_v61, %v599_v14  ;;  %v714_v18 = vmul.f32 %v2983_v41, %v3848_v34  ;;  %v715_v24 = vmul.f32 %v2984_v20, %v3958_v12  ;;  %v2953_v34 = vld [vmem:[%s6408_s3 + $0x1a0] sm:$0xff]  ;;  %v2954_v31 = vld [vmem:[%s6408_s3 + $0x1a8] sm:$0xff] }
 0x152   :  { %v907_v8 = vadd.f32 %v3834_v27, %v858_v51  ;;  %v649_v47 = vadd.f32 %v633_v54, %v600_v62  ;;  %v796_v16 = vmul.f32 %v3015_v44, %v3985_v50  ;;  %v797_v25 = vmul.f32 %v3016_v28, %v4056_v3  ;;  %v4449_v27 = vld [vmem:[%s6409_s4] ss:$0 sm:$0xff]  ;;  %v2986_v51 = vld [vmem:[%s6408_s3 + $0x328] sm:$0xff] }
 0x153   :  { %v859_v26 = vadd.f32 %v843_v36, %v827_v40  ;;  %v730_v30 = vadd.f32 %v714_v18, %v681_v23  ;;  %v731_v45 = vadd.f32 %v715_v24, %v682_v11  ;;  %v828_v38 = vadd.f32 %v648_v21, %v3945_v48  ;;  %v2969_v4 = vld [vmem:[%s6408_s3 + $0x2a0] sm:$0xff]  ;;  %v2970_v48 = vld [vmem:[%s6408_s3 + $0x2a8] sm:$0xff] }
 0x154   :  { %v930_v14 = vadd.f32 %v4449_v27, %v907_v8  ;;  %v812_v41 = vadd.f32 %v796_v16, %v3877_v10  ;;  %v813_v40 = vadd.f32 %v797_v25, %v3962_v5  ;;  %v829_v20 = vadd.f32 %v649_v47, %v534_v7  ;;  %v2985_v25 = vld [vmem:[%s6408_s3 + $0x320] sm:$0xff] }
 0x155   :  { %v908_v62 = vadd.f32 %v3897_v56, %v859_v26  ;;  %v601_v61 = vmul.f32 %v2937_v57, %v3985_v50  ;;  %v602_v44 = vmul.f32 %v2938_v22, %v4056_v3  ;;  %v634_v28 = vmul.f32 %v2953_v34, %v3958_v12  ;;  %v3018_v56 = vld [vmem:[%s6408_s3 + $0x428] sm:$0xff]  ;;  %v473_v22 = vld [vmem:[%s6408_s3 + $0x38] sm:$0xff] }
 0x156   :  { %v946_v10 = vmax.f32 %v930_v14, 0.0  ;;  %v844_v16 = vadd.f32 %v812_v41, %v730_v30  ;;  %v845_v5 = vadd.f32 %v813_v40, %v731_v45  ;;  %v635_v7 = vmul.f32 %v2954_v31, %v4017_v63  ;;  %v2940_v45 = vld [vmem:[%s6408_s3 + $0x138] sm:$0xff]  ;;  %v2955_v40 = vld [vmem:[%s6408_s3 + $0x1b0] sm:$0xff] }
 0x157   :  { %v931_v50 = vadd.f32 %v4449_v27, %v908_v62  ;;  %v650_v12 = vadd.f32 %v634_v28, %v601_v61  ;;  %v683_v54 = vmul.f32 %v2969_v4, %v4056_v3  ;;  %v684_v23 = vmul.f32 %v2970_v48, %v4027_v42  ;;  %v2939_v3 = vld [vmem:[%s6408_s3 + $0x130] sm:$0xff] }
 0x158   :  { %v962_v11 = vmin.f32 %v946_v10, 6.0  ;;  %v860_v36 = vadd.f32 %v844_v16, %v828_v38  ;;  %v861_v21 = vadd.f32 %v845_v5, %v829_v20  ;;  %v651_v18 = vadd.f32 %v635_v7, %v602_v44  ;;  %v2956_v20 = vld [vmem:[%s6408_s3 + $0x1b8] sm:$0xff]  ;;  %v2987_v5 = vld [vmem:[%s6408_s3 + $0x330] sm:$0xff] }
 0x159   :  { %v947_v24 = vmax.f32 %v931_v50, 0.0  ;;  %v716_v8 = vmul.f32 %v2985_v25, %v4017_v63  ;;  %v717_v47 = vmul.f32 %v2986_v51, %v4052_v59  ;;  %v799_v57 = vmul.f32 %v3018_v56, %v4036_v49  ;;  %v2972_v44 = vld [vmem:[%s6408_s3 + $0x2b8] sm:$0xff] }
 0x15a   :  { %v909_v34 = vadd.f32 %v3814_v15, %v860_v36  ;;  %v910_v26 = vadd.f32 %v3880_v6, %v861_v21  ;;  %v830_v30 = vadd.f32 %v650_v12, %v3906_v37  ;;  %v831_v63 = vadd.f32 %v651_v18, %v4022_v39  ;;  %v2988_v56 = vld [vmem:[%s6408_s3 + $0x338] sm:$0xff]  ;;  %v6583_v21 = vld [vmem:[#allocation45_spill] sm:$0xff] }
 0x15b   :  { %v963_v38 = vmin.f32 %v947_v24, 6.0  ;;  %v732_v31 = vadd.f32 %v716_v8, %v683_v54  ;;  %v733_v14 = vadd.f32 %v717_v47, %v684_v23  ;;  %v815_v41 = vadd.f32 %v799_v57, %v3935_v19  ;;  %v2971_v19 = vld [vmem:[%s6408_s3 + $0x2b0] sm:$0xff]  ;;  %v6584_v57 = vld [vmem:[#allocation50_spill] sm:$0xff] }
 0x15c   :  { %v932_v15 = vadd.f32 %v4449_v27, %v909_v34  ;;  %v933_v6 = vadd.f32 %v4449_v27, %v910_v26  ;;  %v489_v37 = vmul.f32 %v473_v22, %v4052_v59  ;;  %v603_v39 = vmul.f32 %v2939_v3, %v4027_v42  ;;  %v2941_v26 = vld [vmem:[%s6408_s3 + $0x140] sm:$0xff] }
 0x15d   :  { %v978_v4 = vpack.c.bf16 %v963_v38, %v962_v11  ;;  %v846_v48 = vadd.f32 %v4065_v55, %v732_v31  ;;  %v847_v62 = vadd.f32 %v815_v41, %v733_v14  ;;  %v604_v61 = vmul.f32 %v2940_v45, %v4036_v49  ;;  %v6585_v38 = vld [vmem:[#allocation46_spill] sm:$0xff]  ;;  %v2957_v14 = vld [vmem:[%s6408_s3 + $0x1c0] sm:$0xff] }
 0x15e   :  { %v948_v28 = vmax.f32 %v932_v15, 0.0  ;;  %v949_v42 = vmax.f32 %v933_v6, 0.0  ;;  %v538_v10 = vadd.f32 %v3901_v32, %v489_v37  ;;  %v636_v16 = vmul.f32 %v2955_v40, %v4052_v59  ;;  %v3019_v32 = vld [vmem:[%s6408_s3 + $0x430] sm:$0xff]  ;;  %v3020_v59 = vld [vmem:[%s6408_s3 + $0x438] sm:$0xff]  ;;  %v2958_v41 = vld [vmem:[%s6408_s3 + $0x1c8] sm:$0xff] }
 0x15f   :  { %3050 = vmatmul.mubr.msk.bf16.vlgmr.msra.gmra.mxu1 %vm1022_vm3, %v978_v4  ;;  %v862_v55 = vadd.f32 %v846_v48, %v830_v30  ;;  %v863_v7 = vadd.f32 %v847_v62, %v831_v63  ;;  %v637_v25 = vmul.f32 %v2956_v20, %v4001_v35  ;;  %v685_v51 = vmul.f32 %v2971_v19, %v4036_v49  ;;  %v6582_v49 = vld [vmem:[#allocation41_spill] sm:$0xff]  ;;  %v2942_v30 = vld [vmem:[%s6408_s3 + $0x148] sm:$0xff]  ;;  %v6587_v37 = vld [vmem:[#allocation51_spill] sm:$0xff] }
 0x160   :  { %v6581_v50 = vmov 0   ;;  %v964_v12 = vmin.f32 %v948_v28, 6.0  ;;  %v965_v54 = vmin.f32 %v949_v42, 6.0  ;;  %v652_v23 = vadd.f32 %v636_v16, %v603_v39  ;;  %v6586_v15 = vld [vmem:[#allocation42_spill] sm:$0xff]  ;;  %v2973_v19 = vld [vmem:[%s6408_s3 + $0x2c0] sm:$0xff] }
 0x161   :  { %1089 = vmatprep.mubr.bf16.mxu1 %v6581_v50  ;;  %v686_v11 = vmul.f32 %v2972_v44, %v4139_v2  ;;  %v911_v36 = vadd.f32 %v6582_v49, %v862_v55  ;;  %v912_v18 = vadd.f32 %v6583_v21, %v863_v7  ;;  %v653_v24 = vadd.f32 %v637_v25, %v604_v61  ;;  %v2974_v4 = vld [vmem:[%s6408_s3 + $0x2c8] sm:$0xff]  ;;  %v6588_v21 = vld [vmem:[#allocation56_spill] sm:$0xff] }
 0x162   :  { %v718_v8 = vmul.f32 %v2987_v5, %v4001_v35  ;;  %v979_v47 = vpack.c.bf16 %v965_v54, %v964_v12  ;;  %v719_v22 = vmul.f32 %v2988_v56, %v6584_v57  ;;  %v800_v3 = vmul.f32 %v3019_v32, %v4139_v2  ;;  %v2989_v5 = vld [vmem:[%s6408_s3 + $0x340] sm:$0xff]  ;;  %v2990_v55 = vld [vmem:[%s6408_s3 + $0x348] sm:$0xff] }
 0x163   :  { %v801_v34 = vmul.f32 %v3020_v59, %v4208_v53  ;;  %v934_v63 = vadd.f32 %v4449_v27, %v911_v36  ;;  %v935_v45 = vadd.f32 %v4449_v27, %v912_v18  ;;  %v832_v31 = vadd.f32 %v652_v23, %v6585_v38  ;;  %v477_v23 = vld [vmem:[%s6408_s3 + $0x58] sm:$0xff] }
 0x164   :  { %v734_v35 = vadd.f32 %v718_v8, %v685_v51  ;;  %v735_v40 = vadd.f32 %v719_v22, %v686_v11  ;;  %v816_v6 = vadd.f32 %v800_v3, %v6586_v15  ;;  %v833_v20 = vadd.f32 %v653_v24, %v538_v10  ;;  %v2944_v24 = vld [vmem:[%s6408_s3 + $0x158] sm:$0xff] }
 0x165   :  { %v817_v39 = vadd.f32 %v801_v34, %v6587_v37  ;;  %v950_v48 = vmax.f32 %v934_v63, 0.0  ;;  %v951_v62 = vmax.f32 %v935_v45, 0.0  ;;  %v605_v61 = vmul.f32 %v2941_v26, %v4139_v2  ;;  %v3022_v2 = vld [vmem:[%s6408_s3 + $0x448] sm:$0xff]  ;;  %v6589_v8 = vld [vmem:[#allocation40_spill] sm:$0xff]  ;;  %v6592_v26 = vld [vmem:[#allocation55_spill] sm:$0xff] }
 0x166   :  { %v606_v44 = vmul.f32 %v2942_v30, %v4208_v53  ;;  %v848_v28 = vadd.f32 %v816_v6, %v734_v35  ;;  %v638_v16 = vmul.f32 %v2957_v14, %v6584_v57  ;;  %v639_v10 = vmul.f32 %v2958_v41, %v4178_v33  ;;  %v6590_v57 = vld [vmem:[#allocation43_spill] sm:$0xff]  ;;  %v6591_v3 = vld [vmem:[#allocation44_spill] sm:$0xff] }
 0x167   :  { %v849_v42 = vadd.f32 %v817_v39, %v735_v40  ;;  %3051 = vmatmul.mubr.msk.bf16.gmra.mxu1 %vm1022_vm3, %v979_v47  ;;  %v966_v7 = vmin.f32 %v950_v48, 6.0  ;;  %v967_v25 = vmin.f32 %v951_v62, 6.0  ;;  %v687_v51 = vmul.f32 %v2973_v19, %v4208_v53  ;;  %v2943_v53 = vld [vmem:[%s6408_s3 + $0x150] sm:$0xff]  ;;  %v6593_v35 = vld [vmem:[#allocation48_spill] sm:$0xff] }
 0x168   :  { %v688_v56 = vmul.f32 %v2974_v4, %v4182_v9  ;;  %1099 = vmatprep.mubr.bf16.mxu1 %v6581_v50  ;;  %v864_v32 = vadd.f32 %v848_v28, %v832_v31  ;;  %v654_v12 = vadd.f32 %v638_v16, %v605_v61  ;;  %v655_v54 = vadd.f32 %v639_v10, %v606_v44  ;;  %v2959_v30 = vld [vmem:[%s6408_s3 + $0x1d0] sm:$0xff]  ;;  %v2960_v14 = vld [vmem:[%s6408_s3 + $0x1d8] sm:$0xff] }
 0x169   :  { %v865_v59 = vadd.f32 %v849_v42, %v833_v20  ;;  %v980_v11 = vpack.c.bf16 %v967_v25, %v966_v7  ;;  %v720_v49 = vmul.f32 %v2989_v5, %v4178_v33  ;;  %v721_v36 = vmul.f32 %v2990_v55, %v4196_v52  ;;  %v2975_v41 = vld [vmem:[%s6408_s3 + $0x2d0] sm:$0xff]  ;;  %v2976_v39 = vld [vmem:[%s6408_s3 + $0x2d8] sm:$0xff]  ;;  %v6594_v20 = vld [vmem:[#allocation65_spill] sm:$0xff] }
 0x16a   :  { %v803_v18 = vmul.f32 %v3022_v2, %v6588_v21  ;;  %v913_v47 = vadd.f32 %v6589_v8, %v864_v32  ;;  %v834_v34 = vadd.f32 %v654_v12, %v6591_v3  ;;  %v835_v33 = vadd.f32 %v655_v54, %v6592_v26  ;;  %v6595_v48 = vld [vmem:[#allocation47_spill] sm:$0xff]  ;;  %v2992_v5 = vld [vmem:[%s6408_s3 + $0x358] sm:$0xff]  ;;  %v2946_v8 = vld [vmem:[%s6408_s3 + $0x168] sm:$0xff] }
 0x16b   :  { %v914_v22 = vadd.f32 %v6590_v57, %v865_v59  ;;  %v736_v63 = vadd.f32 %v720_v49, %v687_v51  ;;  %v737_v45 = vadd.f32 %v721_v36, %v688_v56  ;;  %v493_v31 = vmul.f32 %v477_v23, %v4196_v52  ;;  %v2991_v44 = vld [vmem:[%s6408_s3 + $0x350] sm:$0xff]  ;;  %v6597_v25 = vld [vmem:[#allocation72_spill] sm:$0xff]  ;;  %v2961_v26 = vld [vmem:[%s6408_s3 + $0x1e0] sm:$0xff] }
 0x16c   :  { %v819_v38 = vadd.f32 %v803_v18, %v6593_v35  ;;  %v936_v40 = vadd.f32 %v4449_v27, %v913_v47  ;;  %v607_v6 = vmul.f32 %v2943_v53, %v4182_v9  ;;  %v608_v37 = vmul.f32 %v2944_v24, %v6588_v21  ;;  %v6596_v9 = vld [vmem:[#allocation53_spill] sm:$0xff]  ;;  %v3023_v55 = vld [vmem:[%s6408_s3 + $0x450] sm:$0xff]  ;;  %v3024_v56 = vld [vmem:[%s6408_s3 + $0x458] sm:$0xff] }
 0x16d   :  { %v937_v15 = vadd.f32 %v4449_v27, %v914_v22  ;;  %v850_v19 = vadd.f32 %v6594_v20, %v736_v63  ;;  %v542_v62 = vadd.f32 %v6595_v48, %v493_v31  ;;  %v640_v61 = vmul.f32 %v2959_v30, %v4196_v52  ;;  %v6598_v23 = vld [vmem:[#allocation52_spill] sm:$0xff]  ;;  %v2945_v24 = vld [vmem:[%s6408_s3 + $0x160] sm:$0xff] }
 0x16e   :  { %v851_v4 = vadd.f32 %v819_v38, %v737_v45  ;;  %v952_v28 = vmax.f32 %v936_v40, 0.0  ;;  %v641_v16 = vmul.f32 %v2960_v14, %v6596_v9  ;;  %v689_v10 = vmul.f32 %v2975_v41, %v6588_v21  ;;  %v6599_v36 = vld [vmem:[#allocation60_spill] sm:$0xff]  ;;  %v6600_v21 = vld [vmem:[#allocation66_spill] sm:$0xff]  ;;  %v6602_v45 = vld [vmem:[#allocation57_spill] sm:$0xff] }
 0x16f   :  { %v953_v42 = vmax.f32 %v937_v15, 0.0  ;;  %3052 = vmatmul.mubr.msk.bf16.gmra.mxu1 %vm1022_vm3, %v980_v11  ;;  %v866_v52 = vadd.f32 %v850_v19, %v834_v34  ;;  %v656_v7 = vadd.f32 %v640_v61, %v607_v6  ;;  %v690_v51 = vmul.f32 %v2976_v39, %v6597_v25  ;;  %v6601_v3 = vld [vmem:[#allocation64_spill] sm:$0xff]  ;;  %v2962_v38 = vld [vmem:[%s6408_s3 + $0x1e8] sm:$0xff]  ;;  %v2977_v31 = vld [vmem:[%s6408_s3 + $0x2e0] sm:$0xff] }
 0x170   :  { %v867_v2 = vadd.f32 %v851_v4, %v835_v33  ;;  %1109 = vmatprep.mubr.bf16.mxu1 %v6581_v50  ;;  %v968_v32 = vmin.f32 %v952_v28, 6.0  ;;  %v657_v12 = vadd.f32 %v641_v16, %v608_v37  ;;  %v722_v54 = vmul.f32 %v2991_v44, %v6596_v9  ;;  %v2978_v14 = vld [vmem:[%s6408_s3 + $0x2e8] sm:$0xff]  ;;  %v6603_v41 = vld [vmem:[#allocation67_spill] sm:$0xff]  ;;  %v2993_v48 = vld [vmem:[%s6408_s3 + $0x360] sm:$0xff] }
 0x171   :  { %v969_v59 = vmin.f32 %v953_v42, 6.0  ;;  %v915_v49 = vadd.f32 %v6598_v23, %v866_v52  ;;  %v723_v18 = vmul.f32 %v2992_v5, %v6600_v21  ;;  %v804_v53 = vmul.f32 %v3023_v55, %v6597_v25  ;;  %v2994_v61 = vld [vmem:[%s6408_s3 + $0x368] sm:$0xff] }
 0x172   :  { %v916_v11 = vadd.f32 %v6599_v36, %v867_v2  ;;  %v738_v57 = vadd.f32 %v722_v54, %v689_v10  ;;  %v805_v22 = vmul.f32 %v3024_v56, %v4389_v17  ;;  %v836_v34 = vadd.f32 %v656_v7, %v6601_v3  ;;  %v3026_v9 = vld [vmem:[%s6408_s3 + $0x468] sm:$0xff]  ;;  %v6605_v56 = vld [vmem:[#allocation75_spill] sm:$0xff] }
 0x173   :  { %v981_v47 = vpack.c.bf16 %v969_v59, %v968_v32  ;;  %v938_v33 = vadd.f32 %v4449_v27, %v915_v49  ;;  %v739_v63 = vadd.f32 %v723_v18, %v690_v51  ;;  %v820_v35 = vadd.f32 %v804_v53, %v6602_v45  ;;  %v6606_v59 = vld [vmem:[#allocation58_spill] sm:$0xff]  ;;  %v6608_v53 = vld [vmem:[#allocation63_spill] sm:$0xff] }
 0x174   :  { %v939_v30 = vadd.f32 %v4449_v27, %v916_v11  ;;  %v821_v40 = vadd.f32 %v805_v22, %v6603_v41  ;;  %v837_v15 = vadd.f32 %v657_v12, %v542_v62  ;;  %v609_v6 = vmul.f32 %v2945_v24, %v6597_v25  ;;  %v481_v25 = vld [vmem:[%s6408_s3 + $0x78] sm:$0xff]  ;;  %v6607_v49 = vld [vmem:[#allocation74_spill] sm:$0xff]  ;;  %v6609_v3 = vld [vmem:[#allocation59_spill] sm:$0xff] }
 0x175   :  { %v610_v37 = vmul.f32 %v2946_v8, %v4389_v17  ;;  %v954_v39 = vmax.f32 %v938_v33, 0.0  ;;  %v852_v19 = vadd.f32 %v820_v35, %v738_v57  ;;  %v642_v4 = vmul.f32 %v2961_v26, %v6600_v21  ;;  %v2948_v11 = vld [vmem:[%s6408_s3 + $0x178] sm:$0xff]  ;;  %v2979_v57 = vld [vmem:[%s6408_s3 + $0x2f0] sm:$0xff] }
 0x176   :  { %v955_v20 = vmax.f32 %v939_v30, 0.0  ;;  %v853_v44 = vadd.f32 %v821_v40, %v739_v63  ;;  %v643_v62 = vmul.f32 %v2962_v38, %v4362_v60  ;;  %v691_v28 = vmul.f32 %v2977_v31, %v4389_v17  ;;  %v2964_v21 = vld [vmem:[%s6408_s3 + $0x1f8] sm:$0xff]  ;;  %v2995_v31 = vld [vmem:[%s6408_s3 + $0x370] sm:$0xff] }
 0x177   :  { %v692_v42 = vmul.f32 %v2978_v14, %v4368_v13  ;;  %v545_v16 = vadd.f32 %v4348_v0, %v4385_v43  ;;  %v822_v10 = vadd.f32 %v4409_v1, %v4350_v29  ;;  %3053 = vmatmul.mubr.msk.bf16.gmra.mxu1 %vm1022_vm3, %v981_v47  ;;  %v868_v5 = vadd.f32 %v852_v19, %v836_v34  ;;  %v2947_v0 = vld [vmem:[%s6408_s3 + $0x170] sm:$0xff]  ;;  %v6604_v1 = vld [vmem:[#allocation49_spill] sm:$0xff]  ;;  %v2980_v30 = vld [vmem:[%s6408_s3 + $0x2f8] sm:$0xff] }
 0x178   :  { %v658_v55 = vadd.f32 %v642_v4, %v609_v6  ;;  %1119 = vmatprep.mubr.bf16.mxu1 %v6581_v50  ;;  %v869_v52 = vadd.f32 %v853_v44, %v837_v15  ;;  %v659_v17 = vadd.f32 %v643_v62, %v610_v37  ;;  %v724_v2 = vmul.f32 %v2993_v48, %v4362_v60  ;;  %v2963_v60 = vld [vmem:[%s6408_s3 + $0x1f0] sm:$0xff]  ;;  %v2996_v14 = vld [vmem:[%s6408_s3 + $0x378] sm:$0xff] }
 0x179   :  { %v725_v7 = vmul.f32 %v2994_v61, %v4382_v58  ;;  %v970_v29 = vmin.f32 %v954_v39, 6.0  ;;  %v971_v43 = vmin.f32 %v955_v20, 6.0  ;;  %v917_v51 = vadd.f32 %v6604_v1, %v868_v5  ;;  %v3028_v6 = vld [vmem:[%s6408_s3 + $0x478] sm:$0xff]  ;;  %v6611_v20 = vld [vmem:[#allocation62_spill] sm:$0xff]  ;;  %v6612_v4 = vld [vmem:[#allocation71_spill] sm:$0xff] }
 0x17a   :  { %v807_v32 = vmul.f32 %v3026_v9, %v6605_v56  ;;  %v918_v12 = vadd.f32 %v6606_v59, %v869_v52  ;;  %v740_v54 = vadd.f32 %v724_v2, %v691_v28  ;;  %v839_v36 = vadd.f32 %v659_v17, %v6607_v49  ;;  %v6613_v61 = vld [vmem:[#allocation73_spill] sm:$0xff]  ;;  %v6614_v44 = vld [vmem:[#allocation76_spill] sm:$0xff]  ;;  %v6617_v2 = vld [vmem:[#allocation39_spill] sm:$0xff] }
 0x17b   :  { %v741_v23 = vadd.f32 %v725_v7, %v692_v42  ;;  %v940_v18 = vadd.f32 %v4449_v27, %v917_v51  ;;  %v497_v8 = vmul.f32 %v481_v25, %v4382_v58  ;;  %v611_v47 = vmul.f32 %v2947_v0, %v4368_v13  ;;  %v6610_v13 = vld [vmem:[#allocation69_spill] sm:$0xff]  ;;  %v6615_v28 = vld [vmem:[#allocation68_spill] sm:$0xff]  ;;  %v3043_v1 = vld [vmem:[%s6408_s3 + $0x270] sm:$0xff] }
 0x17c   :  { %v823_v24 = vadd.f32 %v807_v32, %v6608_v53  ;;  %v941_v22 = vadd.f32 %v4449_v27, %v918_v12  ;;  %v838_v34 = vadd.f32 %v658_v55, %v6609_v3  ;;  %v854_v26 = vadd.f32 %v822_v10, %v740_v54  ;;  %v6616_v10 = vld [vmem:[#allocation70_spill] sm:$0xff] }
 0x17d   :  { %v644_v33 = vmul.f32 %v2963_v60, %v4382_v58  ;;  %v982_v63 = vpack.c.bf16 %v971_v43, %v970_v29  ;;  %v612_v35 = vmul.f32 %v2948_v11, %v6605_v56  ;;  %v645_v38 = vmul.f32 %v2964_v21, %v6610_v13  ;;  %v6618_v32 = vld [vmem:[#allocation38_spill] sm:$0xff] }
 0x17e   :  { %v855_v45 = vadd.f32 %v823_v24, %v741_v23  ;;  %v957_v41 = vmax.f32 %v941_v22, 0.0  ;;  %v870_v58 = vadd.f32 %v854_v26, %v838_v34  ;;  %v693_v15 = vmul.f32 %v2979_v57, %v6605_v56 }
 0x17f   :  { %v660_v40 = vadd.f32 %v644_v33, %v611_v47  ;;  %3054 = vmatmul.mubr.msk.bf16.gmra.mxu1 %vm1022_vm3, %v982_v63  ;;  %v956_v37 = vmax.f32 %v940_v18, 0.0  ;;  %v546_v19 = vadd.f32 %v6611_v20, %v497_v8  ;;  %v694_v48 = vmul.f32 %v2980_v30, %v6612_v4  ;;  %v6620_v18 = vld [vmem:[#allocation61_spill] sm:$0xff] }
 0x180   :  { %v871_v39 = vadd.f32 %v855_v45, %v839_v36  ;;  %v824_v62 = vadd.f32 %v6614_v44, %v6613_v61  ;;  %1129 = vmatprep.mubr.bf16.mxu1 %v6581_v50  ;;  %v919_v42 = vadd.f32 %v6615_v28, %v870_v58  ;;  %v726_v9 = vmul.f32 %v2995_v31, %v6610_v13  ;;  %v990_v13 = vld [vmem:[%s6411_s6] sm:$0x3]  ;;  %v6626_v28 = vld [vmem:[#allocation7_spill] sm:$0xff] }
 0x181   :  { %v727_v5 = vmul.f32 %v2996_v14, %v6616_v10  ;;  %v973_v55 = vmin.f32 %v957_v41, 6.0  ;;  %v661_v17 = vadd.f32 %v645_v38, %v612_v35  ;;  %v809_v7 = vmul.f32 %v3028_v6, %v6617_v2  ;;  %v6621_v38 = vld [vmem:[#allocation33_spill] sm:$0xff] }
 0x182   :  { %v920_v52 = vadd.f32 %v4373_v46, %v871_v39  ;;  %v942_v25 = vadd.f32 %v4449_v27, %v919_v42  ;;  %v742_v0 = vadd.f32 %v726_v9, %v693_v15  ;;  %v840_v43 = vadd.f32 %v660_v40, %v545_v16  ;;  %v3044_v46 = vld [vmem:[%s6408_s3 + $0x278] sm:$0xff]  ;;  %v6619_v16 = vld [vmem:[#allocation54_spill] sm:$0xff]  ;;  %v3483_v41 = vld [vmem:[%s6407_s2] sm:$0x7] }
 0x183   :  { %v743_v29 = vadd.f32 %v727_v5, %v694_v48  ;;  %v972_v51 = vmin.f32 %v956_v37, 6.0  ;;  %v825_v60 = vadd.f32 %v809_v7, %v6618_v32  ;;  %v841_v59 = vadd.f32 %v661_v17, %v546_v19  ;;  %v6623_v37 = vld [vmem:[#allocation5_spill] sm:$0xff] }
 0x184   :  { %v943_v56 = vadd.f32 %v4449_v27, %v920_v52  ;;  %v856_v12 = vadd.f32 %v824_v62, %v742_v0  ;;  %v958_v23 = vmax.f32 %v942_v25, 0.0  ;;  %v905_v11 = vmul.f32 %v3043_v1, %v6619_v16  ;;  %v6627_v0 = vld [vmem:[#allocation9_spill] sm:$0xff] }
 0x185   :  { %v983_v54 = vpack.c.bf16 %v973_v55, %v972_v51  ;;  %v857_v36 = vadd.f32 %v825_v60, %v743_v29  ;;  %v906_v53 = vmul.f32 %v3044_v46, %v6620_v18  ;;  %v4764_v31 = vsub.s32 0, %v6621_v38 }
 0x186   :  { %v959_v49 = vmax.f32 %v943_v56, 0.0  ;;  %v872_v21 = vadd.f32 %v856_v12, %v840_v43  ;;  %v974_v47 = vmin.f32 %v958_v23, 6.0  ;;  %v4780_v48 = vsub.s32 1, %v6621_v38  ;;  %v6629_v23 = vld [vmem:[#allocation11_spill] sm:$0xff] }
 0x187   :  { %3055 = vmatmul.mubr.msk.bf16.gmra.mxu1 %vm1022_vm3, %v983_v54  ;;  %v873_v24 = vadd.f32 %v857_v36, %v841_v59  ;;  %6622 = vst [vmem:[#allocation41_spill] sm:$0xff] %v4764_v31 }
 0x188   :  { %1139 = vmatprep.mubr.bf16.mxu1 %v6581_v50  ;;  %v921_v8 = vadd.f32 %v905_v11, %v872_v21  ;;  %v975_v57 = vmin.f32 %v959_v49, 6.0  ;;  %6624 = vst [vmem:[#allocation45_spill] sm:$0xff] %v4780_v48  ;;  %v4787_v9 = vrot.slane %v990_v13, %v4780_v48 }
 0x189   :  { %v922_v22 = vadd.f32 %v906_v53, %v873_v24 }
 0x18a   :  { %v944_v3 = vadd.f32 %v4449_v27, %v921_v8  ;;  %v984_v33 = vpack.c.bf16 %v975_v57, %v974_v47  ;;  %v6632_v57 = vld [vmem:[#allocation13_spill] sm:$0xff] }
 0x18b   :  { %v945_v34 = vadd.f32 %v4449_v27, %v922_v22  ;;  %v4767_v27 = vrot.slane %v990_v13, %v4764_v31 }
 0x18c   :  { %v960_v26 = vmax.f32 %v944_v3, 0.0 }
 0x18d   :  { %v961_v30 = vmax.f32 %v945_v34, 0.0 }
 0x18e   :  { %v976_v63 = vmin.f32 %v960_v26, 6.0 }
 0x18f   :  { %3056 = vmatmul.mubr.msk.bf16.gmra.mxu1 %vm1022_vm3, %v984_v33  ;;  %v977_v45 = vmin.f32 %v961_v30, 6.0 }
 0x190   :  { %1149 = vmatprep.mubr.bf16.mxu1 %v6581_v50  ;;  %v4773_v50 = vrot.slane %v3483_v41, %v4764_v31 }
 0x191   :  { %v985_v35 = vpack.c.bf16 %v977_v45, %v976_v63 }
 0x192   :  { %v224_v39 = vadd.f32 %v6623_v37, %v4773_v50  ;;  %v228_v42 = vadd.f32 %v6626_v28, %v4773_v50  ;;  %v234_v29 = vadd.f32 %v6627_v0, %v4773_v50  ;;  %v238_v49 = vadd.f32 %v6629_v23, %v4773_v50  ;;  %v3076_v37 = vld [vmem:[%s6412_s7 + $0x110] sm:$0xff]  ;;  %v6636_v23 = vld [vmem:[#allocation17_spill] sm:$0xff] }
 0x193   :  { %v244_v22 = vadd.f32 %v6632_v57, %v4773_v50 }
 0x197   :  { %3057 = vmatmul.mubr.msk.bf16.gmra.mxu1 %vm1022_vm3, %v985_v35 }
 0x21f   :  { %v1081_v14 = vpop.f32.mrf.mxu1 }
 0x220   :  { %v1082_v58 = vadd.f32 %v1081_v14, %v4767_v27 }
 0x221   :  { %v1083_v40 = vpop.f32.mrf.mxu1 }
 0x222   :  { %v1160_v15 = vmax.f32 %v1082_v58, 0.0  ;;  %v1084_v51 = vadd.f32 %v1083_v40, %v4787_v9 }
 0x223   :  { %v1085_v6 = vpop.f32.mrf.mxu1 }
 0x224   :  { %v1176_v20 = vmin.f32 %v1160_v15, 6.0  ;;  %v1086_v19 = vadd.f32 %v1085_v6, %v4767_v27  ;;  %v4810_v21 = vmax.f32 %v1084_v51, 0.0 }
 0x225   :  { %v1087_v4 = vpop.f32.mrf.mxu1 }
 0x226   :  { %v4782_v61 = vadd.f32 %v1176_v20, %v224_v39  ;;  %v1161_v44 = vmax.f32 %v1086_v19, 0.0  ;;  %v1088_v7 = vadd.f32 %v1087_v4, %v4787_v9  ;;  %v6440_v41 = vrot.slane %v4810_v21, 7  ;;  %v3092_v39 = vld [vmem:[%s6412_s7 + $0x190] sm:$0xff] }
 0x227   :  { %v1091_v62 = vpop.f32.mrf.mxu1  ;;  %v6634_v20 = vld [vmem:[#allocation15_spill] sm:$0xff] }
 0x228   :  { %6625 = vst [vmem:[#allocation50_spill] sm:$0xff] %v4782_v61  ;;  %v1177_v10 = vmin.f32 %v1161_v44, 6.0  ;;  %v1092_v5 = vadd.f32 %v1091_v62, %v4767_v27  ;;  %v4803_v12 = vmax.f32 %v1088_v7, 0.0  ;;  %v248_v19 = vadd.f32 %v6634_v20, %v4773_v50  ;;  %v3124_v7 = vld [vmem:[%s6412_s7 + $0x310] sm:$0xff] }
 0x229   :  { %v1093_v55 = vpop.f32.mrf.mxu1 }
 0x22a   :  { %v4790_v52 = vadd.f32 %v1177_v10, %v228_v42  ;;  %v1162_v17 = vmax.f32 %v1092_v5, 0.0  ;;  %v1094_v2 = vadd.f32 %v1093_v55, %v4787_v9  ;;  %v1209_v26 = vrot.slane %v4803_v12, 7  ;;  %v1242_v55 = vld [vmem:[%s6412_s7 + $0x10] sm:$0xff] }
 0x22b   :  { %v1095_v25 = vpop.f32.mrf.mxu1  ;;  %v6443_v33 = vrot.slane %v4803_v12, 1 }
 0x22c   :  { %v1178_v43 = vmin.f32 %v1162_v17, 6.0  ;;  %v1096_v1 = vadd.f32 %v1095_v25, %v4767_v27  ;;  %v4800_v60 = vmax.f32 %v1094_v2, 0.0  ;;  %v4852_v62 = vsel %vm449_vm1, %v6440_v41, %v1209_v26  ;;  %v3108_v2 = vld [vmem:[%s6412_s7 + $0x290] sm:$0xff]  ;;  %v6651_v41 = vld [vmem:[#allocation36_spill] sm:$0xff] }
 0x22d   :  { %v1097_v56 = vpop.f32.mrf.mxu1 }
 0x22e   :  { %v4798_v32 = vadd.f32 %v1178_v43, %v234_v29  ;;  %v1163_v59 = vmax.f32 %v1096_v1, 0.0  ;;  %v1098_v46 = vadd.f32 %v1097_v56, %v4787_v9  ;;  %v1210_v8 = vrot.slane %v4800_v60, 7  ;;  %v3156_v1 = vld [vmem:[%s6412_s7 + $0x410] sm:$0xff] }
 0x22f   :  { %v1101_v54 = vpop.f32.mrf.mxu1  ;;  %v1323_v47 = vrot.slane %v4800_v60, 1 }
 0x230   :  { %6628 = vst [vmem:[#allocation46_spill] sm:$0xff] %v4798_v32  ;;  %v1179_v36 = vmin.f32 %v1163_v59, 6.0  ;;  %v4807_v16 = vmax.f32 %v1098_v46, 0.0  ;;  %v1102_v11 = vadd.f32 %v1101_v54, %v4767_v27  ;;  %v4831_v15 = vsel %vm449_vm1, %v1209_v26, %v1210_v8  ;;  %v3060_v46 = vld [vmem:[%s6412_s7 + $0x90] sm:$0xff] }
 0x231   :  { %v1103_v18 = vpop.f32.mrf.mxu1  ;;  %v4837_v6 = vsel %vm563_vm2, %v6443_v33, %v1323_v47  ;;  %v1405_v43 = vmul.f32 %v3092_v39, %v4831_v15  ;;  %v3140_v54 = vld [vmem:[%s6412_s7 + $0x390] sm:$0xff] }
 0x232   :  { %6630 = vst [vmem:[#allocation42_spill] sm:$0xff] %v4807_v16  ;;  %v4812_v53 = vadd.f32 %v1179_v36, %v238_v49  ;;  %v1164_v24 = vmax.f32 %v1102_v11, 0.0  ;;  %v1104_v3 = vadd.f32 %v1103_v18, %v4787_v9  ;;  %v1211_v45 = vrot.slane %v4807_v16, 7 }
 0x233   :  { %v1105_v34 = vpop.f32.mrf.mxu1  ;;  %v1324_v35 = vrot.slane %v4807_v16, 1  ;;  %v1372_v29 = vmul.f32 %v3076_v37, %v4837_v6  ;;  %v254_v49 = vadd.f32 %v6636_v23, %v4773_v50  ;;  %v1258_v11 = vmul.f32 %v1242_v55, %v4852_v62  ;;  %v3093_v37 = vld [vmem:[%s6412_s7 + $0x198] sm:$0xff] }
 0x234   :  { %6631 = vst [vmem:[#allocation51_spill] sm:$0xff] %v4812_v53  ;;  %v1180_v30 = vmin.f32 %v1164_v24, 6.0  ;;  %v1106_v63 = vadd.f32 %v1105_v34, %v4767_v27  ;;  %v4824_v13 = vmax.f32 %v1104_v3, 0.0  ;;  %v4858_v5 = vsel %vm449_vm1, %v1210_v8, %v1211_v45 }
 0x235   :  { %v1107_v14 = vpop.f32.mrf.mxu1  ;;  %v4865_v17 = vsel %vm563_vm2, %v1323_v47, %v1324_v35  ;;  %v1487_v24 = vmul.f32 %v3124_v7, %v4858_v5  ;;  %v1291_v34 = vmul.f32 %v3060_v46, %v4803_v12  ;;  %v1421_v26 = vadd.f32 %v1405_v43, %v1372_v29  ;;  %v1243_v29 = vld [vmem:[%s6412_s7 + $0x18] sm:$0xff] }
 0x236   :  { %v4827_v58 = vadd.f32 %v1180_v30, %v244_v22  ;;  %v1165_v40 = vmax.f32 %v1106_v63, 0.0  ;;  %v1108_v4 = vadd.f32 %v1107_v14, %v4787_v9  ;;  %v1325_v28 = vrot.slane %v4824_v13, 1  ;;  %v3109_v43 = vld [vmem:[%s6412_s7 + $0x298] sm:$0xff] }
 0x237   :  { %v1111_v44 = vpop.f32.mrf.mxu1  ;;  %v1454_v18 = vmul.f32 %v3108_v2, %v4865_v17  ;;  %v1212_v8 = vrot.slane %v4824_v13, 7  ;;  %v1536_v30 = vmul.f32 %v3140_v54, %v4807_v16  ;;  %v1307_v20 = vadd.f32 %v1291_v34, %v1258_v11 }
 0x238   :  { %6633 = vst [vmem:[#allocation56_spill] sm:$0xff] %v4827_v58  ;;  %v1181_v42 = vmin.f32 %v1165_v40, 6.0  ;;  %v1112_v10 = vadd.f32 %v1111_v44, %v4767_v27  ;;  %v4877_v0 = vsel %vm563_vm2, %v1324_v35, %v1325_v28  ;;  %v4886_v56 = vmax.f32 %v1108_v4, 0.0  ;;  %v3077_v40 = vld [vmem:[%s6412_s7 + $0x118] sm:$0xff]  ;;  %v3172_v44 = vld [vmem:[%s6412_s7 + $0x210] sm:$0xff] }
 0x239   :  { %v4873_v25 = vpop.f32.mrf.mxu1  ;;  %v1569_v22 = vmul.f32 %v3156_v1, %v4877_v0  ;;  %v4925_v7 = vsel %vm449_vm1, %v1211_v45, %v1212_v8  ;;  %v3125_v1 = vld [vmem:[%s6412_s7 + $0x318] sm:$0xff]  ;;  %v1601_v46 = vadd.f32 %v1421_v26, %v1307_v20  ;;  %v1373_v23 = vmul.f32 %v3077_v40, %v4865_v17  ;;  %v6640_v40 = vld [vmem:[#allocation21_spill] sm:$0xff]  ;;  %v1250_v58 = vld [vmem:[%s6412_s7 + $0x50] sm:$0xff] }
 0x23a   :  { %v4884_v51 = vadd.f32 %v1181_v42, %v248_v19  ;;  %v1166_v59 = vmax.f32 %v1112_v10, 0.0  ;;  %v1326_v63 = vrot.slane %v4886_v56, 1  ;;  %v1503_v19 = vadd.f32 %v1487_v24, %v1454_v18  ;;  %v6638_v42 = vld [vmem:[#allocation19_spill] sm:$0xff]  ;;  %v3061_v45 = vld [vmem:[%s6412_s7 + $0x98] sm:$0xff]  ;;  %v4967_v20 = vld [vmem:[%s6413_s8] ss:$0 sm:$0xff] }
 0x23b   :  { %v1115_v36 = vpop.f32.mrf.mxu1  ;;  %v1585_v4 = vadd.f32 %v1569_v22, %v1536_v30  ;;  %v258_v10 = vadd.f32 %v6638_v42, %v4773_v50  ;;  %v1666_v18 = vmul.f32 %v3172_v44, %v4800_v60  ;;  %v1259_v26 = vmul.f32 %v1243_v29, %v4831_v15 }
 0x23c   :  { %6635 = vst [vmem:[#allocation40_spill] sm:$0xff] %v4884_v51  ;;  %v1182_v47 = vmin.f32 %v1166_v59, 6.0  ;;  %v1116_v57 = vadd.f32 %v1115_v36, %v4767_v27  ;;  %v4950_v24 = vsel %vm563_vm2, %v1325_v28, %v1326_v63  ;;  %v1455_v30 = vmul.f32 %v3109_v43, %v4877_v0 }
 0x23d   :  { %v4902_v3 = vpop.f32.mrf.mxu1  ;;  %v1617_v54 = vadd.f32 %v1585_v4, %v1503_v19  ;;  %v264_v28 = vadd.f32 %v6640_v40, %v4773_v50  ;;  %v1292_v19 = vmul.f32 %v3061_v45, %v4800_v60 }
 0x23e   :  { %v4907_v35 = vadd.f32 %v1182_v47, %v254_v49  ;;  %v1167_v14 = vmax.f32 %v1116_v57, 0.0  ;;  %v1406_v49 = vmul.f32 %v3093_v37, %v4858_v5  ;;  %v3141_v47 = vld [vmem:[%s6412_s7 + $0x398] sm:$0xff] }
 0x23f   :  { %v1121_v39 = vpop.f32.mrf.mxu1  ;;  %v3157_v57 = vld [vmem:[%s6412_s7 + $0x418] sm:$0xff]  ;;  %v1633_v34 = vadd.f32 %v1617_v54, %v1601_v46  ;;  %v1308_v54 = vadd.f32 %v1292_v19, %v1259_v26  ;;  %v6644_v19 = vld [vmem:[#allocation25_spill] sm:$0xff] }
 0x240   :  { %6637 = vst [vmem:[#allocation43_spill] sm:$0xff] %v4907_v35  ;;  %v1183_v55 = vmin.f32 %v1167_v14, 6.0  ;;  %v1122_v2 = vadd.f32 %v1121_v39, %v4767_v27  ;;  %v1488_v14 = vmul.f32 %v3125_v1, %v4925_v7  ;;  %v1422_v42 = vadd.f32 %v1406_v49, %v1373_v23  ;;  %v3173_v49 = vld [vmem:[%s6412_s7 + $0x218] sm:$0xff] }
 0x241   :  { %v4936_v59 = vpop.f32.mrf.mxu1  ;;  %v1682_v44 = vadd.f32 %v1666_v18, %v1633_v34 }
 0x242   :  { %v4943_v36 = vadd.f32 %v1183_v55, %v258_v10  ;;  %v1168_v11 = vmax.f32 %v1122_v2, 0.0  ;;  %v1537_v10 = vmul.f32 %v3141_v47, %v4824_v13  ;;  %v1570_v55 = vmul.f32 %v3157_v57, %v4950_v24 }
 0x243   :  { %v1125_v22 = vpop.f32.mrf.mxu1  ;;  %v1114_v2 = vadd.f32 %v4873_v25, %v4787_v9  ;;  %v1705_v46 = vadd.f32 %v4967_v20, %v1682_v44  ;;  %v1602_v34 = vadd.f32 %v1422_v42, %v1308_v54  ;;  %v274_v44 = vadd.f32 %v6644_v19, %v4773_v50 }
 0x244   :  { %6639 = vst [vmem:[#allocation44_spill] sm:$0xff] %v4943_v36  ;;  %v1184_v37 = vmin.f32 %v1168_v11, 6.0  ;;  %v1126_v39 = vadd.f32 %v1125_v22, %v4767_v27  ;;  %v1504_v11 = vadd.f32 %v1488_v14, %v1455_v30  ;;  %v1586_v45 = vadd.f32 %v1570_v55, %v1537_v10  ;;  %v6642_v22 = vld [vmem:[#allocation23_spill] sm:$0xff] }
 0x245   :  { %v4970_v4 = vpop.f32.mrf.mxu1  ;;  %v268_v18 = vadd.f32 %v6642_v22, %v4773_v50  ;;  %v1721_v25 = vmax.f32 %v1705_v46, 0.0  ;;  %v6442_v10 = vrot.slane %v4886_v56, 7  ;;  %v3078_v46 = vld [vmem:[%s6412_s7 + $0x120] sm:$0xff] }
 0x246   :  { %v4976_v29 = vadd.f32 %v1184_v37, %v264_v28  ;;  %v1169_v43 = vmax.f32 %v1126_v39, 0.0  ;;  %v1618_v40 = vadd.f32 %v1586_v45, %v1504_v11  ;;  %v4987_v28 = vmax.f32 %v1114_v2, 0.0 }
 0x247   :  { %v1131_v1 = vpop.f32.mrf.mxu1  ;;  %1755 = vrot.lane.b32.xlu0 %v1721_v25, %s3509_s17  ;;  %v1667_v39 = vmul.f32 %v3173_v49, %v4807_v16  ;;  %v1374_v19 = vmul.f32 %v3078_v46, %v4877_v0  ;;  %v3142_v46 = vld [vmem:[%s6412_s7 + $0x3a0] sm:$0xff] }
 0x248   :  { %6641 = vst [vmem:[#allocation55_spill] sm:$0xff] %v4976_v29  ;;  %v1185_v23 = vmin.f32 %v1169_v43, 6.0  ;;  %v1132_v47 = vadd.f32 %v1131_v1, %v4767_v27  ;;  %v1634_v37 = vadd.f32 %v1618_v40, %v1602_v34  ;;  %v6441_v1 = vrot.slane %v4987_v28, 1  ;;  %v1244_v40 = vld [vmem:[%s6412_s7 + $0x20] sm:$0xff] }
 0x249   :  { %v4985_v57 = vpop.f32.mrf.mxu1 }
 0x24a   :  { %v4989_v26 = vadd.f32 %v1185_v23, %v268_v18  ;;  %v1170_v30 = vmax.f32 %v1132_v47, 0.0  ;;  %v1683_v2 = vadd.f32 %v1667_v39, %v1634_v37  ;;  %v3094_v18 = vld [vmem:[%s6412_s7 + $0x1a0] sm:$0xff]  ;;  %v6646_v23 = vld [vmem:[#allocation27_spill] sm:$0xff]  ;;  %v5024_v39 = vsel %vm449_vm1, %v1212_v8, %v6442_v10 }
 0x24b   :  { %v1135_v14 = vpop.f32.mrf.mxu1  ;;  %v278_v49 = vadd.f32 %v6646_v23, %v4773_v50  ;;  %v6647_v47 = vld [vmem:[#allocation29_spill] sm:$0xff]  ;;  %v5041_v0 = vsel %vm563_vm2, %v1326_v63, %v6441_v1  ;;  %v1407_v8 = vmul.f32 %v3094_v18, %v4925_v7  ;;  %v6649_v23 = vld [vmem:[#allocation34_spill] sm:$0xff]  ;;  %v1260_v63 = vmul.f32 %v1244_v40, %v4858_v5 }
 0x24c   :  { %6643 = vst [vmem:[#allocation48_spill] sm:$0xff] %v4989_v26  ;;  %v1186_v55 = vmin.f32 %v1170_v30, 6.0  ;;  %v1136_v42 = vadd.f32 %v1135_v14, %v4767_v27  ;;  %v1706_v45 = vadd.f32 %v4967_v20, %v1683_v2  ;;  %v284_v25 = vadd.f32 %v6647_v47, %v4773_v50  ;;  %v3110_v30 = vld [vmem:[%s6412_s7 + $0x2a0] sm:$0xff] }
 0x24d   :  { %v1137_v43 = vpop.f32.mrf.mxu1  ;;  %v294_v47 = vadd.f32 %v6649_v23, %v4773_v50  ;;  %v5059_v1 = vadd.f32 %v6651_v41, %v4773_v50  ;;  %v1118_v10 = vadd.f32 %v4902_v3, %v4787_v9  ;;  %v1128_v41 = vadd.f32 %v4970_v4, %v4787_v9  ;;  %v3174_v23 = vld [vmem:[%s6412_s7 + $0x220] sm:$0xff] }
 0x24e   :  { %v5001_v54 = vadd.f32 %v1186_v55, %v274_v44  ;;  %v1171_v11 = vmax.f32 %v1136_v42, 0.0  ;;  %v1722_v37 = vmax.f32 %v1706_v45, 0.0  ;;  %v3126_v44 = vld [vmem:[%s6412_s7 + $0x320] sm:$0xff]  ;;  %v6648_v42 = vld [vmem:[#allocation31_spill] sm:$0xff]  ;;  %v1134_v4 = vadd.f32 %v4985_v57, %v4787_v9 }
 0x24f   :  { %v1141_v22 = vpop.f32.mrf.mxu1  ;;  %v288_v2 = vadd.f32 %v6648_v42, %v4773_v50  ;;  %v3062_v45 = vld [vmem:[%s6412_s7 + $0xa0] sm:$0xff]  ;;  %v1456_v42 = vmul.f32 %v3110_v30, %v4950_v24  ;;  %v1489_v31 = vmul.f32 %v3126_v44, %v5024_v39  ;;  %v1124_v50 = vadd.f32 %v4936_v59, %v4787_v9 }
 0x250   :  { %6645 = vst [vmem:[#allocation65_spill] sm:$0xff] %v5001_v54  ;;  %v1142_v34 = vadd.f32 %v1141_v22, %v4767_v27  ;;  %v1187_v14 = vmin.f32 %v1171_v11, 6.0  ;;  %v3158_v22 = vld [vmem:[%s6412_s7 + $0x420] sm:$0xff]  ;;  %1757 = vrot.lane.b32.xlu0 %v1722_v37, %s3509_s17  ;;  %v1538_v37 = vmul.f32 %v3142_v46, %v4886_v56 }
 0x251   :  { %v1143_v55 = vpop.f32.mrf.mxu1  ;;  %v1571_v5 = vmul.f32 %v3158_v22, %v5041_v0  ;;  %v3170_v30 = vld [vmem:[%s6412_s7 + $0x200] sm:$0xff]  ;;  %v5078_v22 = vmax.f32 %v1118_v10, 0.0 }
 0x252   :  { %v1172_v11 = vmax.f32 %v1142_v34, 0.0  ;;  %v5052_v34 = vadd.f32 %v1187_v14, %v278_v49  ;;  %v1293_v49 = vmul.f32 %v3062_v45, %v4807_v16  ;;  %v1423_v14 = vadd.f32 %v1407_v8, %v1374_v19  ;;  %v3138_v10 = vld [vmem:[%s6412_s7 + $0x380] sm:$0xff] }
 0x253   :  { %v1145_v18 = vpop.f32.mrf.mxu1  ;;  %v6447_v19 = vrot.slane %v4810_v21, 1  ;;  %v1505_v45 = vadd.f32 %v1489_v31, %v1456_v42  ;;  %v1587_v8 = vadd.f32 %v1571_v5, %v1538_v37  ;;  %v5098_v37 = vmax.f32 %v1128_v41, 0.0 }
 0x254   :  { %6650 = vst [vmem:[#allocation47_spill] sm:$0xff] %v5052_v34  ;;  %v1188_v33 = vmin.f32 %v1172_v11, 6.0  ;;  %v1146_v44 = vadd.f32 %v1145_v18, %v4767_v27  ;;  %v1309_v11 = vadd.f32 %v1293_v49, %v1260_v63  ;;  %v3059_v18 = vld [vmem:[%s6412_s7 + $0x88] sm:$0xff]  ;;  %v5096_v49 = vmax.f32 %v1124_v50, 0.0 }
 0x255   :  { %v1147_v40 = vpop.f32.mrf.mxu1  ;;  %v1619_v63 = vadd.f32 %v1587_v8, %v1505_v45  ;;  %v1144_v5 = vadd.f32 %v1143_v55, %v4787_v9  ;;  %v5110_v50 = vmul.f32 %v3059_v18, %v4810_v21  ;;  %v5112_v41 = vmax.f32 %v1134_v4, 0.0 }
 0x256   :  { %v5074_v3 = vadd.f32 %v1188_v33, %v284_v25  ;;  %v1173_v59 = vmax.f32 %v1146_v44, 0.0  ;;  %v5085_v33 = vmul.f32 %v3170_v30, %v4810_v21  ;;  %v1138_v25 = vadd.f32 %v1137_v43, %v4787_v9 }
 0x257   :  { %v1151_v46 = vpop.f32.mrf.mxu1  ;;  %v1603_v31 = vadd.f32 %v1423_v14, %v1309_v11  ;;  %v1668_v43 = vmul.f32 %v3174_v23, %v4824_v13  ;;  %v1148_v14 = vadd.f32 %v1147_v40, %v4787_v9  ;;  %v1217_v4 = vrot.slane %v5098_v37, 7 }
 0x258   :  { %6652 = vst [vmem:[#allocation53_spill] sm:$0xff] %v5074_v3  ;;  %v1152_v16 = vadd.f32 %v1151_v46, %v4767_v27  ;;  %v1189_v57 = vmin.f32 %v1173_v59, 6.0  ;;  %v5107_v46 = vmul.f32 %v3138_v10, %v4803_v12  ;;  %v5114_v55 = vmax.f32 %v1138_v25, 0.0  ;;  %v1249_v3 = vld [vmem:[%s6412_s7 + $0x48] sm:$0xff] }
 0x259   :  { %v1153_v42 = vpop.f32.mrf.mxu1  ;;  %v1635_v30 = vadd.f32 %v1619_v63, %v1603_v31  ;;  %v5116_v31 = vmax.f32 %v1144_v5, 0.0  ;;  %v5121_v10 = vmax.f32 %v1148_v14, 0.0  ;;  %v6448_v5 = vrot.slane %v4987_v28, 7  ;;  %v3146_v14 = vld [vmem:[%s6412_s7 + $0x3c0] sm:$0xff] }
 0x25a   :  { %v1174_v44 = vmax.f32 %v1152_v16, 0.0  ;;  %v5103_v45 = vadd.f32 %v1189_v57, %v288_v2  ;;  %6654 = vst [vmem:[#allocation52_spill] sm:$0xff] %v5114_v55  ;;  %v1215_v2 = vrot.slane %v5078_v22, 7  ;;  %v1154_v25 = vadd.f32 %v1153_v42, %v4787_v9 }
 0x25b   :  { %v1155_v11 = vpop.f32.mrf.mxu1  ;;  %v1684_v59 = vadd.f32 %v1668_v43, %v1635_v30  ;;  %v6656_v30 = vrot.slane %v4803_v12, 1  ;;  %v1542_v34 = vmul.f32 %v3146_v14, %v5098_v37  ;;  %v6664_v61 = vrot.slane %v5114_v55, 1 }
 0x25c   :  { %6653 = vst [vmem:[#allocation72_spill] sm:$0xff] %v5103_v45  ;;  %v1156_v8 = vadd.f32 %v1155_v11, %v4767_v27  ;;  %v1190_v23 = vmin.f32 %v1174_v44, 6.0  ;;  %v1216_v27 = vrot.slane %v5096_v49, 7 }
 0x25d   :  { %v1157_v40 = vpop.f32.mrf.mxu1  ;;  %v1707_v63 = vadd.f32 %v4967_v20, %v1684_v59  ;;  %v5134_v43 = vsel %vm563_vm2, %v6447_v19, %v6656_v30  ;;  %v3130_v30 = vld [vmem:[%s6412_s7 + $0x340] sm:$0xff]  ;;  %v5173_v19 = vmax.f32 %v1154_v25, 0.0  ;;  %v1331_v25 = vrot.slane %v5112_v41, 1 }
 0x25e   :  { %v1175_v16 = vmax.f32 %v1156_v8, 0.0  ;;  %v5123_v18 = vadd.f32 %v1190_v23, %v294_v47  ;;  %v1158_v11 = vadd.f32 %v1157_v40, %v4787_v9  ;;  %v5145_v59 = vsel %vm449_vm1, %v1215_v2, %v1216_v27  ;;  %v3098_v9 = vld [vmem:[%s6412_s7 + $0x1c0] sm:$0xff] }
 0x25f   :  { %v1723_v44 = vmax.f32 %v1707_v63, 0.0  ;;  %v5151_v23 = vsel %vm449_vm1, %v6448_v5, %v1215_v2  ;;  %v5165_v2 = vsel %vm449_vm1, %v1216_v27, %v1217_v4  ;;  %v1329_v5 = vrot.slane %v5096_v49, 1  ;;  %v3082_v27 = vld [vmem:[%s6412_s7 + $0x140] sm:$0xff] }
 0x260   :  { %6655 = vst [vmem:[#allocation60_spill] sm:$0xff] %v5123_v18  ;;  %v1191_v57 = vmin.f32 %v1175_v16, 6.0  ;;  %v1248_v16 = vld [vmem:[%s6412_s7 + $0x40] sm:$0xff]  ;;  %v1330_v63 = vrot.slane %v5098_v37, 1  ;;  %v5184_v40 = vmax.f32 %v1158_v11, 0.0  ;;  %v1411_v42 = vmul.f32 %v3098_v9, %v5145_v59 }
 0x261   :  { %1759 = vrot.lane.b32.xlu0 %v1723_v44, %s3509_s17  ;;  %v1264_v47 = vmul.f32 %v1248_v16, %v5151_v23  ;;  %v3162_v44 = vld [vmem:[%s6412_s7 + $0x440] sm:$0xff]  ;;  %v6658_v16 = vrot.slane %v5078_v22, 1  ;;  %v1493_v9 = vmul.f32 %v3130_v30, %v5165_v2  ;;  %v1265_v35 = vmul.f32 %v1249_v3, %v5145_v59 }
 0x262   :  { %v5141_v8 = vadd.f32 %v1191_v57, %v5059_v1  ;;  %v3066_v57 = vld [vmem:[%s6412_s7 + $0xc0] sm:$0xff]  ;;  %v5198_v11 = vsel %vm563_vm2, %v1329_v5, %v1330_v63  ;;  %v1342_v18 = vsel %vm563_vm2, %v1330_v63, %v1331_v25  ;;  %v3099_v63 = vld [vmem:[%s6412_s7 + $0x1c8] sm:$0xff]  ;;  %v6659_v30 = vrot.slane %v5112_v41, 7 }
 0x263   :  { %v3114_v1 = vld [vmem:[%s6412_s7 + $0x2c0] sm:$0xff]  ;;  %v1297_v45 = vmul.f32 %v3066_v57, %v5078_v22  ;;  %v1575_v26 = vmul.f32 %v3162_v44, %v1342_v18  ;;  %v3083_v57 = vld [vmem:[%s6412_s7 + $0x148] sm:$0xff]  ;;  %v6660_v3 = vrot.slane %v5114_v55, 1 }
 0x264   :  { %6657 = vst [vmem:[#allocation66_spill] sm:$0xff] %v5141_v8  ;;  %v5204_v8 = vsel %vm563_vm2, %v6658_v16, %v1329_v5  ;;  %v1460_v29 = vmul.f32 %v3114_v1, %v5198_v11  ;;  %v3067_v5 = vld [vmem:[%s6412_s7 + $0xc8] sm:$0xff]  ;;  %v1229_v51 = vsel %vm449_vm1, %v1217_v4, %v6659_v30 }
 0x265   :  { %v1378_v54 = vmul.f32 %v3082_v27, %v5204_v8  ;;  %v1313_v27 = vadd.f32 %v1297_v45, %v1264_v47  ;;  %v3115_v16 = vld [vmem:[%s6412_s7 + $0x2c8] sm:$0xff]  ;;  %v1591_v44 = vadd.f32 %v1575_v26, %v1542_v34  ;;  %v1298_v48 = vmul.f32 %v3067_v5, %v5096_v49  ;;  %v3178_v34 = vld [vmem:[%s6412_s7 + $0x240] sm:$0xff] }
 0x266   :  { %v1509_v14 = vadd.f32 %v1493_v9, %v1460_v29  ;;  %v3131_v45 = vld [vmem:[%s6412_s7 + $0x348] sm:$0xff]  ;;  %v5254_v4 = vsel %vm563_vm2, %v1331_v25, %v6660_v3  ;;  %v1379_v47 = vmul.f32 %v3083_v57, %v5198_v11  ;;  %v1461_v1 = vmul.f32 %v3115_v16, %v1342_v18 }
 0x267   :  { %v1427_v36 = vadd.f32 %v1411_v42, %v1378_v54  ;;  %v3147_v54 = vld [vmem:[%s6412_s7 + $0x3c8] sm:$0xff]  ;;  %v1412_v42 = vmul.f32 %v3099_v63, %v5165_v2  ;;  %v1314_v26 = vadd.f32 %v1298_v48, %v1265_v35  ;;  %v1494_v32 = vmul.f32 %v3131_v45, %v1229_v51  ;;  %v3068_v63 = vld [vmem:[%s6412_s7 + $0xd0] sm:$0xff] }
 0x268   :  { %v3163_v29 = vld [vmem:[%s6412_s7 + $0x448] sm:$0xff]  ;;  %v1623_v30 = vadd.f32 %v1591_v44, %v1509_v14  ;;  %v1543_v25 = vmul.f32 %v3147_v54, %v5112_v41  ;;  %v1672_v35 = vmul.f32 %v3178_v34, %v5096_v49  ;;  %v6662_v14 = vrot.slane %v5112_v41, 7  ;;  %v3100_v45 = vld [vmem:[%s6412_s7 + $0x1d0] sm:$0xff] }
 0x269   :  { %v3179_v9 = vld [vmem:[%s6412_s7 + $0x248] sm:$0xff]  ;;  %v1607_v5 = vadd.f32 %v1427_v36, %v1313_v27  ;;  %v1428_v53 = vadd.f32 %v1412_v42, %v1379_v47  ;;  %v1576_v57 = vmul.f32 %v3163_v29, %v5254_v4  ;;  %v3084_v36 = vld [vmem:[%s6412_s7 + $0x150] sm:$0xff]  ;;  %v6661_v27 = vrot.slane %v5114_v55, 7 }
 0x26a   :  { %v1673_v16 = vmul.f32 %v3179_v9, %v5098_v37  ;;  %v3116_v54 = vld [vmem:[%s6412_s7 + $0x2d0] sm:$0xff]  ;;  %v1510_v34 = vadd.f32 %v1494_v32, %v1461_v1  ;;  %v1266_v42 = vmul.f32 %v1250_v58, %v5165_v2  ;;  %v1413_v1 = vmul.f32 %v3100_v45, %v1229_v51 }
 0x26b   :  { %v1639_v48 = vadd.f32 %v1623_v30, %v1607_v5  ;;  %v5280_v44 = vsel %vm449_vm1, %v6662_v14, %v6661_v27  ;;  %v3132_v29 = vld [vmem:[%s6412_s7 + $0x350] sm:$0xff]  ;;  %v1592_v3 = vadd.f32 %v1576_v57, %v1543_v25  ;;  %v1608_v47 = vadd.f32 %v1428_v53, %v1314_v26  ;;  %v1251_v57 = vld [vmem:[%s6412_s7 + $0x58] sm:$0xff] }
 0x26c   :  { %v3148_v9 = vld [vmem:[%s6412_s7 + $0x3d0] sm:$0xff]  ;;  %v1299_v27 = vmul.f32 %v3068_v63, %v5098_v37  ;;  %v6663_v14 = vrot.slane %v5116_v31, 1  ;;  %v1380_v53 = vmul.f32 %v3084_v36, %v1342_v18  ;;  %v1462_v26 = vmul.f32 %v3116_v54, %v5254_v4  ;;  %v3069_v36 = vld [vmem:[%s6412_s7 + $0xd8] sm:$0xff] }
 0x26d   :  { %v3164_v5 = vld [vmem:[%s6412_s7 + $0x450] sm:$0xff]  ;;  %v1688_v30 = vadd.f32 %v1672_v35, %v1639_v48  ;;  %v1624_v2 = vadd.f32 %v1592_v3, %v1510_v34  ;;  %v1495_v25 = vmul.f32 %v3132_v29, %v5280_v44  ;;  %v3085_v34 = vld [vmem:[%s6412_s7 + $0x158] sm:$0xff] }
 0x26e   :  { %v5305_v32 = vsel %vm563_vm2, %v6664_v61, %v6663_v14  ;;  %v3180_v58 = vld [vmem:[%s6412_s7 + $0x250] sm:$0xff]  ;;  %v1315_v48 = vadd.f32 %v1299_v27, %v1266_v42  ;;  %v1544_v61 = vmul.f32 %v3148_v9, %v5114_v55  ;;  %v1429_v45 = vadd.f32 %v1413_v1, %v1380_v53  ;;  %v3101_v3 = vld [vmem:[%s6412_s7 + $0x1d8] sm:$0xff] }
 0x26f   :  { %v1711_v63 = vadd.f32 %v4967_v20, %v1688_v30  ;;  %v1577_v18 = vmul.f32 %v3164_v5, %v5305_v32  ;;  %v1640_v35 = vadd.f32 %v1624_v2, %v1608_v47  ;;  %v1511_v54 = vadd.f32 %v1495_v25, %v1462_v26  ;;  %v3117_v42 = vld [vmem:[%s6412_s7 + $0x2d8] sm:$0xff] }
 0x270   :  { %v1674_v29 = vmul.f32 %v3180_v58, %v5112_v41  ;;  %v6665_v47 = vrot.slane %v5116_v31, 7  ;;  %v6666_v30 = vrot.slane %v5114_v55, 7  ;;  %v1267_v14 = vmul.f32 %v1251_v57, %v1229_v51  ;;  %v3133_v53 = vld [vmem:[%s6412_s7 + $0x358] sm:$0xff] }
 0x271   :  { %v1727_v9 = vmax.f32 %v1711_v63, 0.0  ;;  %v1593_v5 = vadd.f32 %v1577_v18, %v1544_v61  ;;  %v3149_v58 = vld [vmem:[%s6412_s7 + $0x3d8] sm:$0xff]  ;;  %v1689_v2 = vadd.f32 %v1673_v16, %v1640_v35  ;;  %v1609_v1 = vadd.f32 %v1429_v45, %v1315_v48  ;;  %v1252_v35 = vld [vmem:[%s6412_s7 + $0x60] sm:$0xff] }
 0x272   :  { %v5337_v27 = vsel %vm449_vm1, %v6666_v30, %v6665_v47  ;;  %v1300_v26 = vmul.f32 %v3069_v36, %v5112_v41  ;;  %v6667_v25 = vrot.slane %v5121_v10, 1  ;;  %v6668_v63 = vrot.slane %v5116_v31, 1  ;;  %v3165_v51 = vld [vmem:[%s6412_s7 + $0x458] sm:$0xff] }
 0x273   :  { %v3181_v57 = vld [vmem:[%s6412_s7 + $0x258] sm:$0xff]  ;;  %1767 = vrot.lane.b32.xlu1 %v1727_v9, %s3509_s17  ;;  %v1625_v16 = vadd.f32 %v1593_v5, %v1511_v54  ;;  %v1381_v48 = vmul.f32 %v3085_v34, %v5254_v4  ;;  %v1414_v18 = vmul.f32 %v3101_v3, %v5280_v44  ;;  %v1463_v36 = vmul.f32 %v3117_v42, %v5305_v32  ;;  %v3070_v54 = vld [vmem:[%s6412_s7 + $0xe0] sm:$0xff] }
 0x274   :  { %v5352_v61 = vsel %vm563_vm2, %v6668_v63, %v6667_v25  ;;  %v1712_v45 = vadd.f32 %v4967_v20, %v1689_v2  ;;  %v1316_v47 = vadd.f32 %v1300_v26, %v1267_v14  ;;  %v1496_v30 = vmul.f32 %v3133_v53, %v5337_v27  ;;  %v3086_v9 = vld [vmem:[%s6412_s7 + $0x160] sm:$0xff] }
 0x275   :  { %v1545_v25 = vmul.f32 %v3149_v58, %v5116_v31  ;;  %v1641_v4 = vadd.f32 %v1625_v16, %v1609_v1  ;;  %v1430_v34 = vadd.f32 %v1414_v18, %v1381_v48  ;;  %v1578_v3 = vmul.f32 %v3165_v51, %v5352_v61  ;;  %v3102_v5 = vld [vmem:[%s6412_s7 + $0x1e0] sm:$0xff] }
 0x276   :  { %v1675_v42 = vmul.f32 %v3181_v57, %v5114_v55  ;;  %v3118_v14 = vld [vmem:[%s6412_s7 + $0x2e0] sm:$0xff]  ;;  %v1728_v53 = vmax.f32 %v1712_v45, 0.0  ;;  %v1512_v58 = vadd.f32 %v1496_v30, %v1463_v36  ;;  %v6669_v2 = vrot.slane %v5121_v10, 7 }
 0x277   :  { %v6670_v1 = vrot.slane %v5116_v31, 7  ;;  %v1268_v63 = vmul.f32 %v1252_v35, %v5280_v44  ;;  %v3134_v51 = vld [vmem:[%s6412_s7 + $0x360] sm:$0xff]  ;;  %v1690_v57 = vadd.f32 %v1674_v29, %v1641_v4  ;;  %v1594_v16 = vadd.f32 %v1578_v3, %v1545_v25 }
 0x278   :  { %v1610_v48 = vadd.f32 %v1430_v34, %v1316_v47  ;;  %v1301_v18 = vmul.f32 %v3070_v54, %v5114_v55  ;;  %v3150_v36 = vld [vmem:[%s6412_s7 + $0x3e0] sm:$0xff]  ;;  %1769 = vrot.lane.b32.xlu1 %v1728_v53, %s3509_s17  ;;  %v6671_v29 = vrot.slane %v5173_v19, 1  ;;  %v6672_v35 = vrot.slane %v5121_v10, 1 }
 0x279   :  { %v5390_v26 = vsel %vm449_vm1, %v6670_v1, %v6669_v2  ;;  %v3166_v45 = vld [vmem:[%s6412_s7 + $0x460] sm:$0xff]  ;;  %v1382_v30 = vmul.f32 %v3086_v9, %v5305_v32  ;;  %v1415_v25 = vmul.f32 %v3102_v5, %v5337_v27  ;;  %v1464_v54 = vmul.f32 %v3118_v14, %v5352_v61  ;;  %v1247_v2 = vld [vmem:[%s6412_s7 + $0x38] sm:$0xff] }
 0x27a   :  { %v3182_v44 = vld [vmem:[%s6412_s7 + $0x260] sm:$0xff]  ;;  %v5413_v47 = vsel %vm563_vm2, %v6672_v35, %v6671_v29  ;;  %v1713_v4 = vadd.f32 %v4967_v20, %v1690_v57  ;;  %v1626_v34 = vadd.f32 %v1594_v16, %v1512_v58  ;;  %v1317_v3 = vadd.f32 %v1301_v18, %v1268_v63  ;;  %v3065_v1 = vld [vmem:[%s6412_s7 + $0xb8] sm:$0xff] }
 0x27b   :  { %v1497_v53 = vmul.f32 %v3134_v51, %v5390_v26  ;;  %v1431_v29 = vadd.f32 %v1415_v25, %v1382_v30  ;;  %v1546_v32 = vmul.f32 %v3150_v36, %v5121_v10  ;;  %v1579_v9 = vmul.f32 %v3166_v45, %v5413_v47  ;;  %v3097_v14 = vld [vmem:[%s6412_s7 + $0x1b8] sm:$0xff] }
 0x27c   :  { %v1676_v5 = vmul.f32 %v3182_v44, %v5116_v31  ;;  %v3113_v58 = vld [vmem:[%s6412_s7 + $0x2b8] sm:$0xff]  ;;  %v1729_v63 = vmax.f32 %v1713_v4, 0.0  ;;  %v1642_v51 = vadd.f32 %v1626_v34, %v1610_v48  ;;  %v6673_v16 = vrot.slane %v4987_v28, 7 }
 0x27d   :  { %v1513_v57 = vadd.f32 %v1497_v53, %v1464_v54  ;;  %v6674_v18 = vrot.slane %v4886_v56, 7  ;;  %v3081_v45 = vld [vmem:[%s6412_s7 + $0x138] sm:$0xff]  ;;  %v1595_v35 = vadd.f32 %v1579_v9, %v1546_v32  ;;  %v1611_v30 = vadd.f32 %v1431_v29, %v1317_v3 }
 0x27e   :  { %v3129_v44 = vld [vmem:[%s6412_s7 + $0x338] sm:$0xff]  ;;  %v1296_v25 = vmul.f32 %v3065_v1, %v4987_v28  ;;  %1771 = vrot.lane.b32.xlu1 %v1729_v63, %s3509_s17  ;;  %v1691_v53 = vadd.f32 %v1675_v42, %v1642_v51  ;;  %v6675_v3 = vrot.slane %v5078_v22, 1  ;;  %v1410_v29 = vmul.f32 %v3097_v14, %v5151_v23  ;;  %v1240_v42 = vld [vmem:[%s6412_s7] sm:$0xff] }
 0x27f   :  { %v5441_v36 = vsel %vm449_vm1, %v6674_v18, %v6673_v16  ;;  %v3145_v54 = vld [vmem:[%s6412_s7 + $0x3b8] sm:$0xff]  ;;  %v1459_v32 = vmul.f32 %v3113_v58, %v5204_v8  ;;  %v1627_v9 = vadd.f32 %v1595_v35, %v1513_v57  ;;  %v1492_v55 = vmul.f32 %v3129_v44, %v5145_v59  ;;  %v3058_v58 = vld [vmem:[%s6412_s7 + $0x80] sm:$0xff] }
 0x280   :  { %v1263_v48 = vmul.f32 %v1247_v2, %v5441_v36  ;;  %v3161_v4 = vld [vmem:[%s6412_s7 + $0x438] sm:$0xff]  ;;  %v6676_v2 = vrot.slane %v4987_v28, 1  ;;  %v1714_v63 = vadd.f32 %v4967_v20, %v1691_v53  ;;  %v1541_v51 = vmul.f32 %v3145_v54, %v5096_v49 }
 0x281   :  { %v3177_v34 = vld [vmem:[%s6412_s7 + $0x238] sm:$0xff]  ;;  %v1643_v57 = vadd.f32 %v1627_v9, %v1611_v30  ;;  %v1508_v35 = vadd.f32 %v1492_v55, %v1459_v32  ;;  %v6677_v59 = vrot.slane %v5184_v40, 7  ;;  %v6678_v44 = vrot.slane %v5173_v19, 7  ;;  %v3106_v55 = vld [vmem:[%s6412_s7 + $0x280] sm:$0xff] }
 0x282   :  { %v5467_v1 = vsel %vm563_vm2, %v6676_v2, %v6675_v3  ;;  %v1312_v16 = vadd.f32 %v1296_v25, %v1263_v48  ;;  %v1574_v3 = vmul.f32 %v3161_v4, %v5198_v11  ;;  %v1671_v14 = vmul.f32 %v3177_v34, %v5078_v22  ;;  %v3074_v11 = vld [vmem:[%s6412_s7 + $0x100] sm:$0xff] }
 0x283   :  { %v1377_v18 = vmul.f32 %v3081_v45, %v5467_v1  ;;  %v5489_v48 = vsel %vm449_vm1, %v6678_v44, %v6677_v59  ;;  %v3090_v25 = vld [vmem:[%s6412_s7 + $0x180] sm:$0xff]  ;;  %v1730_v30 = vmax.f32 %v1714_v63, 0.0  ;;  %v6679_v4 = vrot.slane %v4810_v21, 7 }
 0x284   :  { %v1590_v54 = vadd.f32 %v1574_v3, %v1541_v51  ;;  %v6680_v34 = vmov %v6677_v59  ;;  %v1256_v2 = vmul.f32 %v1240_v42, %v5489_v48  ;;  %v3154_v32 = vld [vmem:[%s6412_s7 + $0x400] sm:$0xff]  ;;  %v1692_v9 = vadd.f32 %v1676_v5, %v1643_v57  ;;  %v1253_v42 = vld [vmem:[%s6412_s7 + $0x68] sm:$0xff] }
 0x285   :  { %v1426_v45 = vadd.f32 %v1410_v29, %v1377_v18  ;;  %v5506_v53 = vsel %vm449_vm1, %v6680_v34, %v6679_v4  ;;  %v3122_v29 = vld [vmem:[%s6412_s7 + $0x300] sm:$0xff]  ;;  %v1289_v63 = vmul.f32 %v3058_v58, %v5184_v40  ;;  %v6681_v51 = vrot.slane %v4810_v21, 1  ;;  %1773 = vrot.lane.b32.xlu1 %v1730_v30, %s3509_s17  ;;  %v3071_v57 = vld [vmem:[%s6412_s7 + $0xe8] sm:$0xff] }
 0x286   :  { %v6682_v3 = vrot.slane %v5184_v40, 1  ;;  %v1622_v44 = vadd.f32 %v1590_v54, %v1508_v35  ;;  %v1452_v58 = vmul.f32 %v3106_v55, %v5134_v43  ;;  %v1485_v34 = vmul.f32 %v3122_v29, %v4852_v62  ;;  %v3087_v35 = vld [vmem:[%s6412_s7 + $0x168] sm:$0xff] }
 0x287   :  { %v1606_v18 = vadd.f32 %v1426_v45, %v1312_v16  ;;  %v1403_v16 = vmul.f32 %v3090_v25, %v5506_v53  ;;  %v1715_v45 = vadd.f32 %v4967_v20, %v1692_v9  ;;  %v1305_v4 = vadd.f32 %v1289_v63, %v1256_v2  ;;  %v3103_v29 = vld [vmem:[%s6412_s7 + $0x1e8] sm:$0xff] }
 0x288   :  { %v5522_v59 = vsel %vm563_vm2, %v6682_v3, %v6681_v51  ;;  %v1567_v51 = vmul.f32 %v3154_v32, %v4837_v6  ;;  %v6683_v25 = vrot.slane %v5173_v19, 7  ;;  %v6684_v55 = vrot.slane %v5121_v10, 7  ;;  %v3119_v32 = vld [vmem:[%s6412_s7 + $0x2e8] sm:$0xff] }
 0x289   :  { %v1370_v5 = vmul.f32 %v3074_v11, %v5522_v59  ;;  %v1638_v11 = vadd.f32 %v1622_v44, %v1606_v18  ;;  %v1269_v2 = vmul.f32 %v1253_v42, %v5337_v27  ;;  %v1731_v9 = vmax.f32 %v1715_v45, 0.0  ;;  %v3135_v44 = vld [vmem:[%s6412_s7 + $0x368] sm:$0xff] }
 0x28a   :  { %v5546_v54 = vsel %vm449_vm1, %v6684_v55, %v6683_v25  ;;  %v1501_v18 = vadd.f32 %v1485_v34, %v1452_v58  ;;  %v1583_v63 = vadd.f32 %v1567_v51, %v5107_v46  ;;  %v1302_v3 = vmul.f32 %v3071_v57, %v5116_v31  ;;  %v3151_v27 = vld [vmem:[%s6412_s7 + $0x3e8] sm:$0xff] }
 0x28b   :  { %v1419_v30 = vadd.f32 %v1403_v16, %v1370_v5  ;;  %v3167_v42 = vld [vmem:[%s6412_s7 + $0x468] sm:$0xff]  ;;  %v1687_v5 = vadd.f32 %v1671_v14, %v1638_v11  ;;  %v6685_v58 = vrot.slane %v5184_v40, 1  ;;  %v6686_v46 = vrot.slane %v5173_v19, 1  ;;  %1775 = vrot.lane.b32.xlu1 %v1731_v9, %s3509_s17 }
 0x28c   :  { %v1383_v45 = vmul.f32 %v3087_v35, %v5352_v61  ;;  %v3183_v34 = vld [vmem:[%s6412_s7 + $0x268] sm:$0xff]  ;;  %v1615_v14 = vadd.f32 %v1583_v63, %v1501_v18  ;;  %v1416_v11 = vmul.f32 %v3103_v29, %v5390_v26  ;;  %v1465_v38 = vmul.f32 %v3119_v32, %v5413_v47 }
 0x28d   :  { %v1599_v16 = vadd.f32 %v1419_v30, %v1305_v4  ;;  %v5572_v57 = vsel %vm563_vm2, %v6686_v46, %v6685_v58  ;;  %v1241_v51 = vld [vmem:[%s6412_s7 + $0x8] sm:$0xff]  ;;  %v1318_v4 = vadd.f32 %v1302_v3, %v1269_v2  ;;  %v1710_v35 = vadd.f32 %v4967_v20, %v1687_v5  ;;  %v1255_v46 = vld [vmem:[%s6412_s7 + $0x78] sm:$0xff] }
 0x28e   :  { %v3075_v61 = vld [vmem:[%s6412_s7 + $0x108] sm:$0xff]  ;;  %v1498_v30 = vmul.f32 %v3135_v44, %v5546_v54  ;;  %v1547_v25 = vmul.f32 %v3151_v27, %v5173_v19  ;;  %v1580_v55 = vmul.f32 %v3167_v42, %v5572_v57  ;;  %v1432_v29 = vadd.f32 %v1416_v11, %v1383_v45  ;;  %v3073_v11 = vld [vmem:[%s6412_s7 + $0xf8] sm:$0xff] }
 0x28f   :  { %v3091_v2 = vld [vmem:[%s6412_s7 + $0x188] sm:$0xff]  ;;  %v1631_v9 = vadd.f32 %v1615_v14, %v1599_v16  ;;  %v1677_v32 = vmul.f32 %v3183_v34, %v5121_v10  ;;  %v1257_v18 = vmul.f32 %v1241_v51, %v5506_v53  ;;  %v1726_v27 = vmax.f32 %v1710_v35, 0.0 }
 0x290   :  { %v3107_v63 = vld [vmem:[%s6412_s7 + $0x288] sm:$0xff]  ;;  %v1514_v42 = vadd.f32 %v1498_v30, %v1465_v38  ;;  %v1596_v5 = vadd.f32 %v1580_v55, %v1547_v25  ;;  %v1371_v16 = vmul.f32 %v3075_v61, %v5134_v43  ;;  %v1612_v34 = vadd.f32 %v1432_v29, %v1318_v4  ;;  %v3089_v38 = vld [vmem:[%s6412_s7 + $0x178] sm:$0xff] }
 0x291   :  { %v3123_v3 = vld [vmem:[%s6412_s7 + $0x308] sm:$0xff]  ;;  %v1680_v45 = vadd.f32 %v5085_v33, %v1631_v9  ;;  %v1306_v51 = vadd.f32 %v5110_v50, %v1257_v18  ;;  %v1404_v14 = vmul.f32 %v3091_v2, %v4852_v62  ;;  %1765 = vrot.lane.b32.xlu1 %v1726_v27, %s3509_s17  ;;  %v1453_v35 = vmul.f32 %v3107_v63, %v4837_v6  ;;  %v3105_v62 = vld [vmem:[%s6412_s7 + $0x1f8] sm:$0xff] }
 0x292   :  { %v3139_v44 = vld [vmem:[%s6412_s7 + $0x388] sm:$0xff]  ;;  %v1628_v61 = vadd.f32 %v1596_v5, %v1514_v42  ;;  %v1486_v33 = vmul.f32 %v3123_v3, %v4831_v15  ;;  %v1271_v55 = vmul.f32 %v1255_v46, %v5546_v54  ;;  %v3121_v2 = vld [vmem:[%s6412_s7 + $0x2f8] sm:$0xff]  ;;  %v1304_v18 = vmul.f32 %v3073_v11, %v5173_v19 }
 0x293   :  { %v3155_v58 = vld [vmem:[%s6412_s7 + $0x408] sm:$0xff]  ;;  %v1535_v4 = vmul.f32 %v3139_v44, %v4800_v60  ;;  %v1703_v50 = vadd.f32 %v4967_v20, %v1680_v45  ;;  %v1420_v30 = vadd.f32 %v1404_v14, %v1371_v16  ;;  %v3137_v15 = vld [vmem:[%s6412_s7 + $0x378] sm:$0xff]  ;;  %v1418_v5 = vmul.f32 %v3105_v62, %v5489_v48 }
 0x294   :  { %v1568_v25 = vmul.f32 %v3155_v58, %v4865_v17  ;;  %v3153_v6 = vld [vmem:[%s6412_s7 + $0x3f8] sm:$0xff]  ;;  %v1644_v9 = vadd.f32 %v1628_v61, %v1612_v34  ;;  %v1502_v29 = vadd.f32 %v1486_v33, %v1453_v35  ;;  %v1385_v17 = vmul.f32 %v3089_v38, %v5572_v57  ;;  %v3171_v42 = vld [vmem:[%s6412_s7 + $0x208] sm:$0xff] }
 0x295   :  { %v3169_v63 = vld [vmem:[%s6412_s7 + $0x478] sm:$0xff]  ;;  %v1719_v3 = vmax.f32 %v1703_v50, 0.0  ;;  %v1600_v27 = vadd.f32 %v1420_v30, %v1306_v51  ;;  %v1245_v16 = vld [vmem:[%s6412_s7 + $0x28] sm:$0xff]  ;;  %v1467_v46 = vmul.f32 %v3121_v2, %v5522_v59  ;;  %v1500_v45 = vmul.f32 %v3137_v15, %v5506_v53 }
 0x296   :  { %v1584_v44 = vadd.f32 %v1568_v25, %v1535_v4  ;;  %v1693_v58 = vadd.f32 %v1677_v32, %v1644_v9  ;;  %v1549_v34 = vmul.f32 %v3153_v6, %v4810_v21  ;;  %v3079_v51 = vld [vmem:[%s6412_s7 + $0x128] sm:$0xff]  ;;  %v1320_v11 = vadd.f32 %v1304_v18, %v1271_v55  ;;  %v3185_v32 = vld [vmem:[%s6412_s7 + $0x278] sm:$0xff]  ;;  %v1246_v9 = vld [vmem:[%s6412_s7 + $0x30] sm:$0xff] }
 0x297   :  { %1751 = vrot.lane.b32.xlu0 %v1719_v3, %s3509_s17  ;;  %v1434_v38 = vadd.f32 %v1418_v5, %v1385_v17  ;;  %v1582_v61 = vmul.f32 %v3169_v63, %v5134_v43  ;;  %v3095_v53 = vld [vmem:[%s6412_s7 + $0x1a8] sm:$0xff]  ;;  %v1665_v4 = vmul.f32 %v3171_v42, %v4803_v12  ;;  %v1516_v62 = vadd.f32 %v1500_v45, %v1467_v46  ;;  %v3064_v42 = vld [vmem:[%s6412_s7 + $0xb0] sm:$0xff] }
 0x298   :  { %v1616_v14 = vadd.f32 %v1584_v44, %v1502_v29  ;;  %v3111_v35 = vld [vmem:[%s6412_s7 + $0x2a8] sm:$0xff]  ;;  %v1716_v33 = vadd.f32 %v4967_v20, %v1693_v58  ;;  %v1261_v50 = vmul.f32 %v1245_v16, %v4925_v7  ;;  %v1375_v15 = vmul.f32 %v3079_v51, %v4950_v24  ;;  %v3080_v5 = vld [vmem:[%s6412_s7 + $0x130] sm:$0xff] }
 0x299   :  { %v3063_v43 = vld [vmem:[%s6412_s7 + $0xa8] sm:$0xff]  ;;  %v1598_v55 = vadd.f32 %v1582_v61, %v1549_v34  ;;  %v1614_v2 = vadd.f32 %v1434_v38, %v1320_v11  ;;  %v1679_v18 = vmul.f32 %v3185_v32, %v5184_v40  ;;  %v1408_v17 = vmul.f32 %v3095_v53, %v5024_v39  ;;  %v3096_v16 = vld [vmem:[%s6412_s7 + $0x1b0] sm:$0xff] }
 0x29a   :  { %v3127_v30 = vld [vmem:[%s6412_s7 + $0x328] sm:$0xff]  ;;  %v1632_v25 = vadd.f32 %v1616_v14, %v1600_v27  ;;  %v1732_v29 = vmax.f32 %v1716_v33, 0.0  ;;  %v1457_v63 = vmul.f32 %v3111_v35, %v5041_v0  ;;  %v1294_v44 = vmul.f32 %v3063_v43, %v4824_v13  ;;  %v3112_v51 = vld [vmem:[%s6412_s7 + $0x2b0] sm:$0xff] }
 0x29b   :  { %v3143_v6 = vld [vmem:[%s6412_s7 + $0x3a8] sm:$0xff]  ;;  %v1630_v3 = vadd.f32 %v1598_v55, %v1516_v62  ;;  %v1490_v27 = vmul.f32 %v3127_v30, %v5441_v36  ;;  %v1424_v58 = vadd.f32 %v1408_v17, %v1375_v15  ;;  %v1262_v34 = vmul.f32 %v1246_v9, %v5024_v39  ;;  %v3128_v32 = vld [vmem:[%s6412_s7 + $0x330] sm:$0xff] }
 0x29c   :  { %v3159_v7 = vld [vmem:[%s6412_s7 + $0x428] sm:$0xff]  ;;  %v1681_v24 = vadd.f32 %v1665_v4, %v1632_v25  ;;  %1777 = vrot.lane.b32.xlu1 %v1732_v29, %s3509_s17  ;;  %v1539_v46 = vmul.f32 %v3143_v6, %v4987_v28  ;;  %v1310_v38 = vadd.f32 %v1294_v44, %v1261_v50  ;;  %v1295_v39 = vmul.f32 %v3064_v42, %v4886_v56  ;;  %v3144_v62 = vld [vmem:[%s6412_s7 + $0x3b0] sm:$0xff] }
 0x29d   :  { %v1572_v45 = vmul.f32 %v3159_v7, %v5467_v1  ;;  %v1646_v11 = vadd.f32 %v1630_v3, %v1614_v2  ;;  %v1506_v61 = vadd.f32 %v1490_v27, %v1457_v63  ;;  %v3175_v35 = vld [vmem:[%s6412_s7 + $0x228] sm:$0xff]  ;;  %v1376_v33 = vmul.f32 %v3080_v5, %v5041_v0  ;;  %v3160_v50 = vld [vmem:[%s6412_s7 + $0x430] sm:$0xff] }
 0x29e   :  { %v1704_v14 = vadd.f32 %v4967_v20, %v1681_v24  ;;  %v1409_v4 = vmul.f32 %v3096_v16, %v5441_v36  ;;  %v1604_v25 = vadd.f32 %v1424_v58, %v1310_v38  ;;  %v1458_v55 = vmul.f32 %v3112_v51, %v5467_v1  ;;  %v1254_v2 = vld [vmem:[%s6412_s7 + $0x70] sm:$0xff] }
 0x29f   :  { %v1588_v53 = vadd.f32 %v1572_v45, %v1539_v46  ;;  %v1695_v30 = vadd.f32 %v1679_v18, %v1646_v11  ;;  %v1311_v15 = vadd.f32 %v1295_v39, %v1262_v34  ;;  %v1491_v6 = vmul.f32 %v3128_v32, %v5151_v23  ;;  %v3088_v7 = vld [vmem:[%s6412_s7 + $0x170] sm:$0xff]  ;;  %v2028_v11 = vld [vmem:[%s6414_s9 + $0xf8] sm:$0xff] }
 0x2a0   :  { %v1720_v43 = vmax.f32 %v1704_v14, 0.0  ;;  %v1425_v36 = vadd.f32 %v1409_v4, %v1376_v33  ;;  %v3104_v9 = vld [vmem:[%s6412_s7 + $0x1f0] sm:$0xff]  ;;  %v1669_v29 = vmul.f32 %v3175_v35, %v4886_v56  ;;  %v1540_v18 = vmul.f32 %v3144_v62, %v5078_v22  ;;  %3234 = vmatprep.subr.mxu0 %v2028_v11 }
 0x2a1   :  { %v1620_v0 = vadd.f32 %v1588_v53, %v1506_v61  ;;  %v1718_v1 = vadd.f32 %v4967_v20, %v1695_v30  ;;  %v1573_v17 = vmul.f32 %v3160_v50, %v5204_v8  ;;  %v3072_v23 = vld [vmem:[%s6412_s7 + $0xf0] sm:$0xff]  ;;  %v1507_v20 = vadd.f32 %v1491_v6, %v1458_v55  ;;  %v2010_v6 = vld [vmem:[%s6414_s9 + $0x68] sm:$0xff] }
 0x2a2   :  { %1753 = vrot.lane.b32.xlu0 %v1720_v43, %s3509_s17  ;;  %v3120_v63 = vld [vmem:[%s6412_s7 + $0x2f0] sm:$0xff]  ;;  %v1605_v44 = vadd.f32 %v1425_v36, %v1311_v15  ;;  %v1270_v27 = vmul.f32 %v1254_v2, %v5390_v26  ;;  %v1384_v58 = vmul.f32 %v3088_v7, %v5413_v47  ;;  %v1417_v46 = vmul.f32 %v3104_v9, %v5546_v54  ;;  %v2012_v47 = vld [vmem:[%s6414_s9 + $0x78] sm:$0xff]  ;;  %v2026_v36 = vld [vmem:[%s6414_s9 + $0xe8] sm:$0xff] }
 0x2a3   :  { %v3136_v24 = vld [vmem:[%s6412_s7 + $0x370] sm:$0xff]  ;;  %v1636_v3 = vadd.f32 %v1620_v0, %v1604_v25  ;;  %v1734_v5 = vmax.f32 %v1718_v1, 0.0  ;;  %v1589_v16 = vadd.f32 %v1573_v17, %v1540_v18  ;;  %v1303_v26 = vmul.f32 %v3072_v23, %v5121_v10  ;;  %3235 = vmatpush3.msra.mxu0 %v2012_v47  ;;  %v2025_v7 = vld [vmem:[%s6414_s9 + $0xe0] sm:$0xff]  ;;  %v2024_v17 = vld [vmem:[%s6414_s9 + $0xd8] sm:$0xff] }
 0x2a4   :  { %v3152_v8 = vld [vmem:[%s6412_s7 + $0x3f0] sm:$0xff]  ;;  %v1466_v51 = vmul.f32 %v3120_v63, %v5572_v57  ;;  %v1499_v14 = vmul.f32 %v3136_v24, %v5489_v48  ;;  %v1433_v38 = vadd.f32 %v1417_v46, %v1384_v58  ;;  %v3484_v57 = vld [vmem:[%s6413_s8] ss:$0 sm:$0xff]  ;;  %v2008_v23 = vld [vmem:[%s6414_s9 + $0x58] sm:$0xff] }
 0x2a5   :  { %v3168_v42 = vld [vmem:[%s6412_s7 + $0x470] sm:$0xff]  ;;  %v1685_v45 = vadd.f32 %v1669_v29, %v1636_v3  ;;  %1781 = vrot.lane.b32.xlu1 %v1734_v5, %s3509_s17  ;;  %v1621_v54 = vadd.f32 %v1589_v16, %v1507_v20  ;;  %v1548_v61 = vmul.f32 %v3152_v8, %v5184_v40  ;;  %v1319_v4 = vadd.f32 %v1303_v26, %v1270_v27  ;;  %v2009_v18 = vld [vmem:[%s6414_s9 + $0x60] sm:$0xff]  ;;  %v2022_v20 = vld [vmem:[%s6414_s9 + $0xc8] sm:$0xff] }
 0x2a6   :  { %v3176_v34 = vld [vmem:[%s6412_s7 + $0x230] sm:$0xff]  ;;  %v1581_v32 = vmul.f32 %v3168_v42, %v5522_v59  ;;  %v1515_v35 = vadd.f32 %v1499_v14, %v1466_v51  ;;  %v2021_v27 = vld [vmem:[%s6414_s9 + $0xc0] sm:$0xff]  ;;  %v2020_v42 = vld [vmem:[%s6414_s9 + $0xb8] sm:$0xff] }
 0x2a7   :  { %v2027_v48 = vld [vmem:[%s6414_s9 + $0xf0] sm:$0xff]  ;;  %v1708_v53 = vadd.f32 %v3484_v57, %v1685_v45  ;;  %v1637_v39 = vadd.f32 %v1621_v54, %v1605_v44  ;;  %v1670_v33 = vmul.f32 %v3176_v34, %v4987_v28  ;;  %v1613_v30 = vadd.f32 %v1433_v38, %v1319_v4  ;;  %v2006_v44 = vld [vmem:[%s6414_s9 + $0x48] sm:$0xff]  ;;  %v2005_v8 = vld [vmem:[%s6414_s9 + $0x40] sm:$0xff] }
 0x2a8   :  { %v1597_v62 = vadd.f32 %v1581_v32, %v1548_v61  ;;  %v3184_v59 = vld [vmem:[%s6412_s7 + $0x270] sm:$0xff]  ;;  %3236 = vmatprep.subr.mxu0 %v2027_v48  ;;  %v2004_v5 = vld [vmem:[%s6414_s9 + $0x38] sm:$0xff]  ;;  %v2018_v46 = vld [vmem:[%s6414_s9 + $0xa8] sm:$0xff] }
 0x2a9   :  { %v1724_v50 = vmax.f32 %v1708_v53, 0.0  ;;  %v1686_v43 = vadd.f32 %v1670_v33, %v1637_v39  ;;  %v1678_v0 = vmul.f32 %v3184_v59, %v5173_v19  ;;  %v2011_v15 = vld [vmem:[%s6414_s9 + $0x70] sm:$0xff]  ;;  %v2002_v45 = vld [vmem:[%s6414_s9 + $0x28] sm:$0xff]  ;;  %v2017_v34 = vld [vmem:[%s6414_s9 + $0xa0] sm:$0xff]  ;;  %v5882_v39 = vmax.f32 %v4790_v52, 0.0 }
 0x2aa   :  { %v1629_v25 = vadd.f32 %v1597_v62, %v1515_v35  ;;  %3237 = vmatpush3.msra.mxu0 %v2011_v15  ;;  %v2023_v63 = vld [vmem:[%s6414_s9 + $0xd0] sm:$0xff]  ;;  %v2001_v26 = vld [vmem:[%s6414_s9 + $0x20] sm:$0xff]  ;;  %v2016_v51 = vld [vmem:[%s6414_s9 + $0x98] sm:$0xff] }
 0x2ab   :  { %1761 = vrot.lane.b32.xlu0 %v1724_v50, %s3509_s17  ;;  %v1709_v55 = vadd.f32 %v3484_v57, %v1686_v43  ;;  %3238 = vmatprep.subr.mxu0 %v2026_v36  ;;  %v2007_v3 = vld [vmem:[%s6414_s9 + $0x50] sm:$0xff]  ;;  %v2000_v14 = vld [vmem:[%s6414_s9 + $0x18] sm:$0xff]  ;;  %v2014_v54 = vld [vmem:[%s6414_s9 + $0x88] sm:$0xff]  ;;  %6687 = vst [vmem:[#allocation64_spill] sm:$0xff] %v5882_v39 }
 0x2ac   :  { %v1645_v2 = vadd.f32 %v1629_v25, %v1613_v30  ;;  %3239 = vmatpush3.msra.mxu0 %v2010_v6  ;;  %v2019_v16 = vld [vmem:[%s6414_s9 + $0xb0] sm:$0xff]  ;;  %v1998_v38 = vld [vmem:[%s6414_s9 + $0x8] sm:$0xff]  ;;  %v2013_v61 = vld [vmem:[%s6414_s9 + $0x80] sm:$0xff] }
 0x2ad   :  { %v1725_v9 = vmax.f32 %v1709_v55, 0.0  ;;  %3240 = vmatprep.subr.mxu0 %v2025_v7  ;;  %v2003_v58 = vld [vmem:[%s6414_s9 + $0x30] sm:$0xff]  ;;  %v1997_v32 = vld [vmem:[%s6414_s9] sm:$0xff]  ;;  %v6688_v33 = vld [vmem:[#allocation50_spill] sm:$0xff] }
 0x2ae   :  { %v1694_v1 = vadd.f32 %v1678_v0, %v1645_v2  ;;  %3241 = vmatpush3.msra.mxu0 %v2009_v18  ;;  %v2015_v11 = vld [vmem:[%s6414_s9 + $0x90] sm:$0xff]  ;;  %v5885_v4 = vmax.f32 %v6688_v33, 0.0  ;;  %v6690_v62 = vld [vmem:[#allocation46_spill] sm:$0xff]  ;;  %v6694_v0 = vld [vmem:[#allocation56_spill] sm:$0xff] }
 0x2af   :  { %1763 = vrot.lane.b32.xlu0 %v1725_v9, %s3509_s17  ;;  %3242 = vmatprep.subr.mxu0 %v2024_v17  ;;  %v1999_v47 = vld [vmem:[%s6414_s9 + $0x10] sm:$0xff]  ;;  %v5888_v50 = vmax.f32 %v6690_v62, 0.0  ;;  %v5899_v52 = vmax.f32 %v6694_v0, 0.0  ;;  %v3485_v15 = vld [vmem:[%s6407_s2] sm:$0x7]  ;;  %v6697_v9 = vld [vmem:[#allocation40_spill] sm:$0xff] }
 0x2b0   :  { %v1717_v29 = vadd.f32 %v3484_v57, %v1694_v1  ;;  %3243 = vmatpush3.msra.mxu0 %v2008_v23  ;;  %6689 = vst [vmem:[#allocation57_spill] sm:$0xff] %v5885_v4  ;;  %v1931_v59 = vadd.f32 %v5882_v39, %v5885_v4  ;;  %v6692_v43 = vld [vmem:[#allocation51_spill] sm:$0xff]  ;;  %v6696_v36 = vld [vmem:[#allocation45_spill] sm:$0xff]  ;;  %v5907_v1 = vmax.f32 %v6697_v9, 0.0  ;;  %v6710_v33 = vld [vmem:[#allocation22_spill] sm:$0xff] }
 0x2b1   :  { %3244 = vmatprep.subr.mxu0 %v2023_v63  ;;  %6691 = vst [vmem:[#allocation67_spill] sm:$0xff] %v5888_v50  ;;  %v5893_v30 = vmax.f32 %v6692_v43, 0.0  ;;  %6695 = vst [vmem:[#allocation75_spill] sm:$0xff] %v5899_v52  ;;  %v92_v6 = vrot.slane %v3485_v15, %v6696_v36  ;;  %v6699_v17 = vld [vmem:[#allocation43_spill] sm:$0xff]  ;;  %v6700_v63 = vld [vmem:[#allocation44_spill] sm:$0xff] }
 0x2b2   :  { %v1733_v24 = vmax.f32 %v1717_v29, 0.0  ;;  %3245 = vmatpush3.msra.mxu0 %v2007_v3  ;;  %v1932_v2 = vadd.f32 %v1931_v59, %v5888_v50  ;;  %6698 = vst [vmem:[#allocation58_spill] sm:$0xff] %v5907_v1  ;;  %v5913_v23 = vmax.f32 %v6699_v17, 0.0  ;;  %v6711_v0 = vld [vmem:[#allocation48_spill] sm:$0xff] }
 0x2b3   :  { %3246 = vmatprep.subr.mxu0 %v2022_v20  ;;  %6693 = vst [vmem:[#allocation49_spill] sm:$0xff] %v5893_v30  ;;  %v1880_v29 = vmax.f32 %v5882_v39, %v5893_v30  ;;  %v6702_v20 = vld [vmem:[#allocation6_spill] sm:$0xff]  ;;  %v266_v62 = vadd.f32 %v6710_v33, %v92_v6  ;;  %v5943_v15 = vmax.f32 %v6711_v0, 0.0  ;;  %v6712_v9 = vld [vmem:[#allocation24_spill] sm:$0xff] }
 0x2b4   :  { %1779 = vrot.lane.b32.xlu0 %v1733_v24, %s3509_s17  ;;  %3247 = vmatpush3.msra.mxu0 %v2006_v44  ;;  %v1933_v7 = vadd.f32 %v1932_v2, %v5893_v30  ;;  %v5916_v24 = vmax.f32 %v6700_v63, 0.0  ;;  %v226_v44 = vadd.f32 %v6702_v20, %v92_v6  ;;  %v6714_v63 = vld [vmem:[#allocation28_spill] sm:$0xff]  ;;  %v6727_v30 = vld [vmem:[#allocation66_spill] sm:$0xff] }
 0x2b5   :  { %3248 = vmatprep.subr.mxu0 %v2021_v27  ;;  %v6703_v27 = vld [vmem:[#allocation8_spill] sm:$0xff]  ;;  %v280_v20 = vadd.f32 %v6714_v63, %v92_v6 }
 0x2b6   :  { %3249 = vmatpush3.msra.mxu0 %v2005_v8  ;;  %v1934_v18 = vadd.f32 %v1933_v7, %v5899_v52  ;;  %6701 = vst [vmem:[#allocation74_spill] sm:$0xff] %v5916_v24  ;;  %v230_v8 = vadd.f32 %v6703_v27, %v92_v6  ;;  %v6715_v27 = vld [vmem:[#allocation47_spill] sm:$0xff]  ;;  %v6720_v33 = vld [vmem:[#allocation32_spill] sm:$0xff] }
 0x2b7   :  { %3250 = vmatprep.subr.mxu0 %v2020_v42  ;;  %v6704_v42 = vld [vmem:[#allocation10_spill] sm:$0xff]  ;;  %v5961_v0 = vadd.f32 %v6720_v33, %v92_v6 }
 0x2b8   :  { %3251 = vmatpush3.msra.mxu0 %v2004_v5  ;;  %v236_v5 = vadd.f32 %v6704_v42, %v92_v6  ;;  %v5949_v42 = vmax.f32 %v6715_v27, 0.0  ;;  %v6723_v27 = vld [vmem:[#allocation35_spill] sm:$0xff] }
 0x2b9   :  { %3252 = vmatprep.subr.mxu0 %v2019_v16  ;;  %v1756_v53 = vpop.permute.xlu0 %1755  ;;  %v6705_v16 = vld [vmem:[#allocation12_spill] sm:$0xff] }
 0x2ba   :  { %3253 = vmatpush3.msra.mxu0 %v2003_v58  ;;  %v240_v58 = vadd.f32 %v6705_v16, %v92_v6  ;;  %6716 = vst [vmem:[#allocation63_spill] sm:$0xff] %v5949_v42  ;;  %v1906_v33 = vmax.f32 %v5943_v15, %v5949_v42 }
 0x2bb   :  { %3254 = vmatprep.subr.mxu0 %v2018_v46 }
 0x2bc   :  { %3255 = vmatpush3.msra.mxu0 %v2002_v45  ;;  %v6706_v45 = vld [vmem:[#allocation14_spill] sm:$0xff] }
 0x2bd   :  { %3256 = vmatprep.subr.mxu0 %v2017_v34  ;;  %v246_v34 = vadd.f32 %v6706_v45, %v92_v6 }
 0x2be   :  { %3257 = vmatpush3.msra.mxu0 %v2001_v26  ;;  %v1879_v26 = vmax.f32 %v5885_v4, %v5888_v50  ;;  %v5984_v50 = vmax.f32 %v6727_v30, 0.0 }
 0x2bf   :  { %3258 = vmatprep.subr.mxu0 %v2016_v51  ;;  %v1882_v51 = vmax.f32 %v1880_v29, %v5907_v1  ;;  %v270_v29 = vadd.f32 %v6712_v9, %v92_v6  ;;  %v6721_v9 = vld [vmem:[#allocation72_spill] sm:$0xff] }
 0x2c0   :  { %3259 = vmatpush3.msra.mxu0 %v2000_v14  ;;  %v1935_v14 = vadd.f32 %v1934_v18, %v5907_v1  ;;  %v1881_v59 = vmax.f32 %v1879_v26, %v5899_v52  ;;  %v6713_v18 = vld [vmem:[#allocation26_spill] sm:$0xff]  ;;  %v6717_v26 = vld [vmem:[#allocation55_spill] sm:$0xff]  ;;  %6728 = vst [vmem:[#allocation62_spill] sm:$0xff] %v5984_v50  ;;  %v6729_v1 = vld [vmem:[#allocation60_spill] sm:$0xff] }
 0x2c1   :  { %3260 = vmatprep.subr.mxu0 %v2015_v11  ;;  %v6707_v11 = vld [vmem:[#allocation16_spill] sm:$0xff]  ;;  %v1884_v2 = vmax.f32 %v1882_v51, %v5916_v24  ;;  %v276_v17 = vadd.f32 %v6713_v18, %v92_v6  ;;  %v6718_v51 = vld [vmem:[#allocation65_spill] sm:$0xff]  ;;  %v5964_v18 = vmax.f32 %v6721_v9, 0.0  ;;  %v5993_v52 = vmax.f32 %v6729_v1, 0.0 }
 0x2c2   :  { %3261 = vmatpush3.msra.mxu0 %v1999_v47  ;;  %v1758_v25 = vpop.permute.xlu0 %1757  ;;  %v5930_v47 = vadd.f32 %v6707_v11, %v92_v6  ;;  %v1936_v43 = vadd.f32 %v1935_v14, %v5913_v23  ;;  %v1883_v16 = vmax.f32 %v1881_v59, %v5913_v23  ;;  %v5954_v14 = vmax.f32 %v6717_v26, 0.0  ;;  %v6724_v26 = vld [vmem:[#allocation37_spill] sm:$0xff] }
 0x2c3   :  { %3262 = vmatprep.subr.mxu0 %v2014_v54  ;;  %v6708_v54 = vld [vmem:[#allocation18_spill] sm:$0xff]  ;;  %v5957_v11 = vmax.f32 %v6718_v51, 0.0  ;;  %6722 = vst [vmem:[#allocation59_spill] sm:$0xff] %v5964_v18  ;;  %v5972_v39 = vadd.f32 %v6724_v26, %v92_v6  ;;  %v6725_v9 = vld [vmem:[#allocation53_spill] sm:$0xff]  ;;  %v1908_v26 = vmax.f32 %v1906_v33, %v5964_v18  ;;  %6730 = vst [vmem:[#allocation71_spill] sm:$0xff] %v5993_v52 }
 0x2c4   :  { %3263 = vmatpush3.msra.mxu0 %v1998_v38  ;;  %v5933_v38 = vadd.f32 %v6708_v54, %v92_v6  ;;  %v1937_v45 = vadd.f32 %v1936_v43, %v5916_v24  ;;  %v6719_v54 = vld [vmem:[#allocation30_spill] sm:$0xff]  ;;  %v5969_v43 = vadd.f32 %v6723_v27, %v92_v6  ;;  %v5974_v51 = vmax.f32 %v1883_v16, %v1884_v2 }
 0x2c5   :  { %3264 = vmatprep.subr.mxu0 %v2013_v61  ;;  %v6709_v61 = vld [vmem:[#allocation20_spill] sm:$0xff]  ;;  %v5981_v4 = vmax.f32 %v6725_v9, 0.0  ;;  %v6731_v9 = vld [vmem:[#allocation42_spill] sm:$0xff]  ;;  %v1910_v33 = vmax.f32 %v1908_v26, %v5984_v50 }
 0x2c6   :  { %3265 = vmatpush3.msra.mxu0 %v1997_v32  ;;  %v5936_v32 = vadd.f32 %v6709_v61, %v92_v6  ;;  %v286_v61 = vadd.f32 %v6719_v54, %v92_v6  ;;  %v1960_v54 = vadd.f32 %v5943_v15, %v5954_v14  ;;  %v1905_v6 = vmax.f32 %v5954_v14, %v5957_v11 }
 0x2c7   :  { %6726 = vst [vmem:[#allocation69_spill] sm:$0xff] %v5981_v4  ;;  %v1802_v30 = vsel %vm164_vm0, %v6731_v9, %v1758_v25 }
 0x2c8   :  { %v1961_v2 = vadd.f32 %v1960_v54, %v5957_v11  ;;  %v1907_v1 = vmax.f32 %v1905_v6, %v5981_v4 }
 0x2ca   :  { %v1962_v54 = vadd.f32 %v1961_v2, %v5949_v42 }
 0x2d3   :  { %v1760_v3 = vpop.permute.xlu0 %1759 }
 0x2e5   :  { %v5875_v48 = vpop.permute.xlu1 %1767 }
 0x2e6   :  { %v1807_v25 = vsel %vm164_vm0, %v5096_v49, %v5875_v48  ;;  %v6732_v49 = vld [vmem:[#allocation52_spill] sm:$0xff] }
 0x2e7   :  { %v1832_v2 = vadd.f32 %v1807_v25, %v266_v62 }
 0x2ea   :  { %v5877_v57 = vpop.permute.xlu1 %1769 }
 0x2f0   :  { %v5879_v35 = vpop.permute.xlu1 %1771 }
 0x2f7   :  { %v5895_v55 = vpop.permute.xlu1 %1773 }
 0x2f8   :  { %v1810_v48 = vsel %vm164_vm0, %v6732_v49, %v5895_v55 }
 0x2fd   :  { %v5922_v46 = vpop.permute.xlu1 %1775 }
 0x2fe   :  { %v1811_v62 = vsel %vm164_vm0, %v5116_v31, %v5922_v46 }
 0x303   :  { %v1766_v63 = vpop.permute.xlu1 %1765 }
 0x309   :  { %v1752_v7 = vpop.permute.xlu0 %1751 }
 0x30a   :  { %v1799_v59 = vsel %vm164_vm0, %v4810_v21, %v1752_v7  ;;  %v1801_v21 = vsel %vm164_vm0, %v4800_v60, %v1756_v53  ;;  %v1938_v7 = vrot.slane %v1937_v45, 4  ;;  %v1803_v53 = vsel %vm164_vm0, %v4824_v13, %v1760_v3 }
 0x30b   :  { %v1816_v16 = vadd.f32 %v1799_v59, %v226_v44  ;;  %v1820_v60 = vadd.f32 %v1801_v21, %v236_v5  ;;  %v1808_v44 = vsel %vm164_vm0, %v5098_v37, %v5877_v57  ;;  %v1822_v5 = vadd.f32 %v1802_v30, %v240_v58 }
 0x30c   :  { %v1809_v13 = vsel %vm164_vm0, %v5112_v41, %v5879_v35  ;;  %v1963_v57 = vadd.f32 %v1962_v54, %v5981_v4  ;;  %v1834_v21 = vadd.f32 %v1808_v44, %v270_v29  ;;  %v1886_v35 = vrot.slane %v5974_v51, 4 }
 0x30d   :  { %v6013_v3 = vmax.f32 %v1816_v16, 0.0  ;;  %v6019_v6 = vmax.f32 %v1820_v60, 0.0  ;;  %v6027_v58 = vadd.f32 %v1938_v7, %v1937_v45  ;;  %v1838_v45 = vadd.f32 %v1810_v48, %v280_v20 }
 0x30e   :  { %v1964_v16 = vadd.f32 %v1963_v57, %v5964_v18  ;;  %v6039_v30 = vmax.f32 %v1834_v21, 0.0  ;;  %v1806_v54 = vsel %vm164_vm0, %v5078_v22, %v1766_v63  ;;  %v1887_v22 = vmax.f32 %v5974_v51, %v1886_v35 }
 0x30f   :  { %v1892_v63 = vmax.f32 %v6013_v3, %v6019_v6  ;;  %v1940_v51 = vrot.slane %v6027_v58, 2 }
 0x310   :  { %v1965_v55 = vadd.f32 %v1964_v16, %v5993_v52 }
 0x314   :  { %v1754_v27 = vpop.permute.xlu0 %1753 }
 0x315   :  { %v1800_v24 = vsel %vm164_vm0, %v4803_v12, %v1754_v27  ;;  %v1778_v12 = vpop.permute.xlu1 %1777  ;;  %v1836_v27 = vadd.f32 %v1809_v13, %v276_v17 }
 0x316   :  { %v1818_v59 = vadd.f32 %v1800_v24, %v230_v8  ;;  %v1909_v24 = vmax.f32 %v1907_v1, %v5993_v52  ;;  %v1824_v8 = vadd.f32 %v1803_v53, %v246_v34  ;;  %v6030_v34 = vmax.f32 %v1822_v5, 0.0 }
 0x317   :  { %v6041_v53 = vmax.f32 %v1832_v2, 0.0  ;;  %v1812_v17 = vsel %vm164_vm0, %v5121_v10, %v1778_v12  ;;  %v6048_v46 = vmax.f32 %v1836_v27, 0.0  ;;  %v6059_v12 = vmax.f32 %v1838_v45, 0.0 }
 0x318   :  { %v6015_v37 = vmax.f32 %v1818_v59, 0.0  ;;  %v1911_v26 = vmax.f32 %v1909_v24, %v1910_v33  ;;  %v6037_v9 = vmax.f32 %v1824_v8, 0.0  ;;  %v1840_v59 = vadd.f32 %v1811_v62, %v286_v61 }
 0x319   :  { %v1782_v7 = vpop.permute.xlu1 %1781  ;;  %6733 = vst [vmem:[#allocation73_spill] sm:$0xff] %v6048_v46  ;;  %v1966_v33 = vadd.f32 %v1965_v55, %v5984_v50  ;;  %6734 = vst [vmem:[#allocation76_spill] sm:$0xff] %v6059_v12  ;;  %v1842_v61 = vadd.f32 %v1812_v17, %v5961_v0 }
 0x31a   :  { %v1944_v41 = vadd.f32 %v6015_v37, %v6013_v3  ;;  %v1912_v1 = vrot.slane %v1911_v26, 4  ;;  %v1814_v25 = vsel %vm164_vm0, %v5184_v40, %v1782_v7  ;;  %v1893_v40 = vmax.f32 %v6015_v37, %v6030_v34 }
 0x31b   :  { %v6071_v24 = vmax.f32 %v1840_v59, 0.0  ;;  %v1846_v8 = vadd.f32 %v1814_v25, %v5972_v39  ;;  %v1967_v48 = vrot.slane %v1966_v33, 4  ;;  %v6081_v35 = vmax.f32 %v1842_v61, 0.0 }
 0x31c   :  { %v1945_v29 = vadd.f32 %v1944_v41, %v6019_v6  ;;  %v1913_v49 = vmax.f32 %v1911_v26, %v1912_v1  ;;  %v1918_v39 = vmax.f32 %v6041_v53, %v6048_v46  ;;  %v1894_v27 = vmax.f32 %v1892_v63, %v6037_v9 }
 0x31d   :  { %v1762_v60 = vpop.permute.xlu0 %1761  ;;  %6735 = vst [vmem:[#allocation68_spill] sm:$0xff] %v6071_v24  ;;  %6736 = vst [vmem:[#allocation70_spill] sm:$0xff] %v6081_v35  ;;  %v6093_v26 = vmax.f32 %v1846_v8, 0.0 }
 0x31e   :  { %v1804_v44 = vsel %vm164_vm0, %v4886_v56, %v1762_v60  ;;  %v1946_v31 = vadd.f32 %v1945_v29, %v6030_v34  ;;  %v1973_v56 = vadd.f32 %v6039_v30, %v6041_v53  ;;  %v1919_v29 = vmax.f32 %v6039_v30, %v6059_v12 }
 0x31f   :  { %v1826_v20 = vadd.f32 %v1804_v44, %v5930_v47  ;;  %v1830_v47 = vadd.f32 %v1806_v54, %v5936_v32  ;;  %6737 = vst [vmem:[#allocation39_spill] sm:$0xff] %v6093_v26  ;;  %v1914_v44 = vrot.slane %v1913_v49, 2  ;;  %v1920_v59 = vmax.f32 %v1918_v39, %v6071_v24 }
 0x320   :  { %v1947_v10 = vadd.f32 %v1946_v31, %v6037_v9  ;;  %v1974_v57 = vadd.f32 %v1973_v56, %v6048_v46  ;;  %v1968_v31 = vadd.f32 %v1967_v48, %v1966_v33  ;;  %v1921_v54 = vmax.f32 %v1919_v29, %v6081_v35 }
 0x321   :  { %v6062_v5 = vmax.f32 %v1826_v20, 0.0  ;;  %v1764_v13 = vpop.permute.xlu0 %1763  ;;  %v6085_v16 = vmax.f32 %v1830_v47, 0.0  ;;  %v1915_v63 = vmax.f32 %v1913_v49, %v1914_v44 }
 0x322   :  { %v1805_v0 = vsel %vm164_vm0, %v4987_v28, %v1764_v13  ;;  %v1975_v41 = vadd.f32 %v1974_v57, %v6059_v12  ;;  %v1923_v56 = vmax.f32 %v1921_v54, %v6093_v26  ;;  %v1969_v13 = vrot.slane %v1968_v31, 2 }
 0x323   :  { %v1895_v32 = vmax.f32 %v1893_v40, %v6062_v5  ;;  %v1948_v21 = vadd.f32 %v1947_v10, %v6062_v5  ;;  %v1828_v2 = vadd.f32 %v1805_v0, %v5933_v38  ;;  %v1888_v10 = vrot.slane %v1887_v22, 2 }
 0x324   :  { %v1976_v38 = vadd.f32 %v1975_v41, %v6071_v24  ;;  %v1941_v40 = vadd.f32 %v1940_v51, %v6027_v58  ;;  %v1970_v29 = vadd.f32 %v1969_v13, %v1968_v31 }
 0x325   :  { %v6087_v28 = vmax.f32 %v1828_v2, 0.0  ;;  %v1897_v45 = vmax.f32 %v1895_v32, %v6085_v16 }
 0x326   :  { %v1780_v62 = vpop.permute.xlu0 %1779  ;;  %v1977_v20 = vadd.f32 %v1976_v38, %v6081_v35 }
 0x327   :  { %v1813_v55 = vsel %vm164_vm0, %v5173_v19, %v1780_v62  ;;  %v1896_v7 = vmax.f32 %v1894_v27, %v6087_v28  ;;  %v1949_v60 = vadd.f32 %v1948_v21, %v6087_v28  ;;  %v1889_v21 = vmax.f32 %v1887_v22, %v1888_v10 }
 0x328   :  { %v1844_v17 = vadd.f32 %v1813_v55, %v5969_v43  ;;  %v1916_v27 = vrot.slane %v1915_v63, 1  ;;  %v1942_v62 = vrot.slane %v1941_v40, 1 }
 0x329   :  { %v1898_v1 = vmax.f32 %v1896_v7, %v1897_v45  ;;  %v1950_v25 = vadd.f32 %v1949_v60, %v6085_v16  ;;  %v1890_v7 = vrot.slane %v1889_v21, 1 }
 0x32a   :  { %v6105_v19 = vmax.f32 %v1844_v17, 0.0  ;;  %v1917_v17 = vmax.f32 %v1915_v63, %v1916_v27  ;;  %v1943_v44 = vadd.f32 %v1942_v62, %v1941_v40  ;;  %v2100_v27 = vld [vmem:[%s6415_s10] sm:$0xff]  ;;  %v3510_v62 = vmov 0.0  }
 0x32b   :  { %v1899_v61 = vrot.slane %v1898_v1, 4  ;;  %v1951_v33 = vrot.slane %v1950_v25, 4 }
 0x32c   :  { %6738 = vst [vmem:[#allocation38_spill] sm:$0xff] %v6105_v19  ;;  %v1922_v47 = vmax.f32 %v1920_v59, %v6105_v19  ;;  %v1978_v43 = vadd.f32 %v1977_v20, %v6105_v19  ;;  %v1971_v59 = vrot.slane %v1970_v29, 1 }
 0x32d   :  { %v1900_v8 = vmax.f32 %v1898_v1, %v1899_v61  ;;  %v1952_v0 = vadd.f32 %v1951_v33, %v1950_v25  ;;  %v1891_v25 = vmax.f32 %v1889_v21, %v1890_v7 }
 0x32e   :  { %v1924_v57 = vmax.f32 %v1922_v47, %v1923_v56  ;;  %v1979_v32 = vadd.f32 %v1978_v43, %v6093_v26  ;;  %v1972_v61 = vadd.f32 %v1971_v59, %v1970_v29 }
 0x32f   :  { %v1901_v48 = vrot.slane %v1900_v8, 2  ;;  %v1953_v41 = vrot.slane %v1952_v0, 2  ;;  %v1989_v47 = vsel %vm1988_vm4, %v1891_v25, %v1917_v17 }
 0x330   :  { %v1925_v2 = vrot.slane %v1924_v57, 4  ;;  %v1980_v39 = vrot.slane %v1979_v32, 4 }
 0x331   :  { %v1902_v38 = vmax.f32 %v1900_v8, %v1901_v48  ;;  %v1954_v45 = vadd.f32 %v1953_v41, %v1952_v0  ;;  %v2103_v48 = vld [vmem:[%s6415_s10 + $0x18] sm:$0xff]  ;;  %v2102_v41 = vld [vmem:[%s6415_s10 + $0x10] sm:$0xff] }
 0x332   :  { %v1926_v55 = vmax.f32 %v1924_v57, %v1925_v2  ;;  %v1981_v49 = vadd.f32 %v1980_v39, %v1979_v32  ;;  %v1958_v57 = vmul.f32 0.015625, %v1943_v44  ;;  %v1986_v32 = vmul.f32 0.015625, %v1972_v61  ;;  %v2101_v39 = vld [vmem:[%s6415_s10 + $0x8] sm:$0xff]  ;;  %2136 = vmatprep.subr.mxu0 %v2103_v48 }
 0x333   :  { %v1955_v51 = vrot.slane %v1954_v45, 1  ;;  %v1903_v22 = vrot.slane %v1902_v38, 1 }
 0x334   :  { %v1927_v58 = vrot.slane %v1926_v55, 2  ;;  %v1982_v60 = vrot.slane %v1981_v49, 2  ;;  %v1992_v40 = vsel %vm1991_vm5, %v1989_v47, %v1958_v57 }
 0x335   :  { %v1956_v20 = vadd.f32 %v1955_v51, %v1954_v45  ;;  %v1904_v43 = vmax.f32 %v1902_v38, %v1903_v22  ;;  %v1995_v21 = vsel %vm1994_vm6, %v1992_v40, %v1986_v32 }
 0x336   :  { %v1928_v54 = vmax.f32 %v1926_v55, %v1927_v58  ;;  %v1983_v1 = vadd.f32 %v1982_v60, %v1981_v49 }
 0x337   :  { %v1959_v31 = vmul.f32 0.015625, %v1956_v20 }
 0x338   :  { %v1929_v10 = vrot.slane %v1928_v54, 1  ;;  %v1984_v56 = vrot.slane %v1983_v1, 1 }
 0x33a   :  { %v1930_v33 = vmax.f32 %v1928_v54, %v1929_v10  ;;  %v1985_v13 = vadd.f32 %v1984_v56, %v1983_v1 }
 0x33c   :  { %v1987_v8 = vmul.f32 0.015625, %v1985_v13  ;;  %v1990_v63 = vsel %vm1988_vm4, %v1904_v43, %v1930_v33 }
 0x33d   :  { %v1993_v0 = vsel %vm1991_vm5, %v1990_v63, %v1959_v31 }
 0x33e   :  { %v1996_v2 = vsel %vm1994_vm6, %v1993_v0, %v1987_v8 }
 0x33f   :  { %2093 = vmatprep.mubr.f32.mxu0 %v1996_v2 }
 0x340   :  { %2094 = vmatmul.mubr.f32.vlgmr.msra.gmra.mxu0 %v1995_v21 }
 0x341   :  { %2172 = vmatprep.mubr.f32.mxu0 %v3510_v62  ;;  %2137 = vmatpush1.msra.mxu0 %v2102_v41 }
 0x342   :  { %2138 = vmatprep.subr.mxu0 %v2101_v39 }
 0x343   :  { %2139 = vmatpush1.msra.mxu0 %v2100_v27 }
 0x400   :  { %v3266_v29 = vpop.f32.mrf.mxu0 }
 0x402   :  { %v3267_v38 = vpop.f32.mrf.mxu0 }
 0x403   :  { %v3268_v55 = vadd.f32 %v3267_v38, %v3266_v29 }
 0x405   :  { %v2099_v45 = vmax.f32 %v3268_v55, 0.0 }
 0x407   :  { %3187 = vmatmul.mubr.msk.f32.vlgmr.msra.gmra.mxu0 %vm2104_vm7, %v2099_v45 }
 0x4c7   :  { %v2174_v49 = vpop.f32.mrf.mxu0 }
 0x4c8   :  { %v2181_v7 = vrot.slane %v2174_v49, 2 }
 0x4c9   :  { %v2176_v58 = vpop.f32.mrf.mxu0 }
 0x4ca   :  { %v2185_v51 = vadd.f32 %v2181_v7, %v2174_v49  ;;  %v2182_v60 = vrot.slane %v2176_v58, 2  ;;  %v6749_v7 = vld [vmem:[#allocation41_spill] sm:$0xff] }
 0x4cc   :  { %v3188_v17 = vmul.f32 -1.442695, %v2185_v51  ;;  %v2186_v44 = vadd.f32 %v2182_v60, %v2176_v58 }
 0x4ce   :  { %3411 = vpow2.f32 %v3188_v17  ;;  %v3189_v59 = vmul.f32 -1.442695, %v2186_v44 }
 0x4d0   :  { %3413 = vpow2.f32 %v3189_v59 }
 0x4db   :  { %v3412_v22 = vpop.eup %3411 }
 0x4dc   :  { %v2193_v54 = vadd.f32 1.0, %v3412_v22 }
 0x4dd   :  { %v3414_v20 = vpop.eup %3413 }
 0x4de   :  { %3415 = vrcp.f32 %v2193_v54  ;;  %v2194_v1 = vadd.f32 1.0, %v3414_v20 }
 0x4e0   :  { %3417 = vrcp.f32 %v2194_v1 }
 0x4eb   :  { %v3416_v25 = vpop.eup %3415 }
 0x4ec   :  { %v2226_v10 = vrot.slane %v3416_v25, %v6696_v36  ;;  %v2202_v17 = vrot.slane %v3416_v25, %v6749_v7 }
 0x4ed   :  { %v3418_v56 = vpop.eup %3417 }
 0x4ee   :  { %v2230_v31 = vrot.slane %v3418_v56, %v6696_v36  ;;  %v6129_v61 = vmul.f32 %v2226_v10, %v5984_v50  ;;  %v6135_v43 = vmul.f32 %v2226_v10, %v5993_v52  ;;  %v6148_v8 = vmul.f32 %v2226_v10, %v5981_v4  ;;  %v6755_v50 = vld [vmem:[#allocation57_spill] sm:$0xff] }
 0x4ef   :  { %v6165_v48 = vmul.f32 %v2226_v10, %v5964_v18  ;;  %v6168_v41 = vmul.f32 %v2226_v10, %v5957_v11  ;;  %v6185_v45 = vmul.f32 %v2226_v10, %v5949_v42  ;;  %v6188_v49 = vmul.f32 %v2226_v10, %v5954_v14 }
 0x4f0   :  { %6739 = vst [vmem:[#allocation54_spill] sm:$0xff] %v6129_v61  ;;  %v6132_v47 = vmul.f32 %v2230_v31, %v6093_v26  ;;  %6741 = vst [vmem:[#allocation33_spill] sm:$0xff] %v6135_v43  ;;  %v6138_v33 = vmul.f32 %v2230_v31, %v6105_v19  ;;  %v6145_v36 = vmul.f32 %v2230_v31, %v6071_v24  ;;  %v6756_v19 = vld [vmem:[#allocation64_spill] sm:$0xff] }
 0x4f1   :  { %6744 = vst [vmem:[#allocation9_spill] sm:$0xff] %v6148_v8  ;;  %v6159_v2 = vmul.f32 %v2230_v31, %v6081_v35  ;;  %v6162_v21 = vmul.f32 %v2230_v31, %v6048_v46  ;;  %6746 = vst [vmem:[#allocation13_spill] sm:$0xff] %v6165_v48  ;;  %v6179_v38 = vmul.f32 %v2230_v31, %v6059_v12 }
 0x4f2   :  { %6740 = vst [vmem:[#allocation61_spill] sm:$0xff] %v6132_v47  ;;  %6742 = vst [vmem:[#allocation5_spill] sm:$0xff] %v6138_v33  ;;  %v2340_v13 = vadd.f32 %v6132_v47, %v6129_v61  ;;  %v2337_v57 = vadd.f32 %v6138_v33, %v6135_v43  ;;  %v2289_v63 = vmax.f32 %v6135_v43, %v6138_v33 }
 0x4f3   :  { %6743 = vst [vmem:[#allocation7_spill] sm:$0xff] %v6145_v36  ;;  %v2331_v40 = vadd.f32 %v6145_v36, %v6148_v8  ;;  %v2292_v0 = vmax.f32 %v6129_v61, %v6132_v47  ;;  %v2283_v32 = vmax.f32 %v6148_v8, %v6145_v36  ;;  %6745 = vst [vmem:[#allocation11_spill] sm:$0xff] %v6159_v2 }
 0x4f4   :  { %2341 = vadd.xlane.f32.xlu1 %v2340_v13  ;;  %2338 = vadd.xlane.f32.xlu0 %v2337_v57  ;;  %v2334_v39 = vadd.f32 %v6159_v2, %v6165_v48  ;;  %v2325_v27 = vadd.f32 %v6162_v21, %v6168_v41  ;;  %v2286_v62 = vmax.f32 %v6165_v48, %v6159_v2 }
 0x4f5   :  { %v2277_v29 = vmax.f32 %v6168_v41, %v6162_v21  ;;  %6747 = vst [vmem:[#allocation15_spill] sm:$0xff] %v6179_v38  ;;  %v6182_v55 = vmul.f32 %v2230_v31, %v6041_v53  ;;  %6748 = vst [vmem:[#allocation17_spill] sm:$0xff] %v6185_v45  ;;  %v2206_v58 = vrot.slane %v3418_v56, %v6749_v7 }
 0x4f6   :  { %v2328_v51 = vadd.f32 %v6179_v38, %v6185_v45  ;;  %v2280_v44 = vmax.f32 %v6185_v45, %v6179_v38  ;;  %v6201_v22 = vmul.f32 %v2230_v31, %v6039_v30  ;;  %v6207_v20 = vmul.f32 %v2226_v10, %v5943_v15 }
 0x4f7   :  { %v2319_v60 = vadd.f32 %v6182_v55, %v6188_v49  ;;  %v2271_v59 = vmax.f32 %v6188_v49, %v6182_v55  ;;  %v6204_v54 = vmul.f32 %v2206_v58, %v6087_v28  ;;  %v6210_v1 = vmul.f32 %v2202_v17, %v5913_v23 }
 0x4f8   :  { %2290 = vmax.xlane.f32.xlu0 %v2289_v63  ;;  %2332 = vadd.xlane.f32.xlu1 %v2331_v40  ;;  %v2322_v25 = vadd.f32 %v6201_v22, %v6207_v20  ;;  %v2274_v31 = vmax.f32 %v6207_v20, %v6201_v22  ;;  %v6221_v10 = vmul.f32 %v2206_v58, %v6085_v16  ;;  %v6750_v63 = vld [vmem:[#allocation74_spill] sm:$0xff] }
 0x4f9   :  { %v2313_v56 = vadd.f32 %v6204_v54, %v6210_v1  ;;  %v2265_v13 = vmax.f32 %v6210_v1, %v6204_v54  ;;  %v6224_v57 = vmul.f32 %v2206_v58, %v6037_v9  ;;  %v6227_v40 = vmul.f32 %v2202_v17, %v6750_v63 }
 0x4fa   :  { %v6241_v7 = vmul.f32 %v2206_v58, %v6062_v5  ;;  %v6284_v52 = vmul.f32 %v2202_v17, %v6756_v19 }
 0x4fc   :  { %2293 = vmax.xlane.f32.xlu0 %v2292_v0  ;;  %2284 = vmax.xlane.f32.xlu1 %v2283_v32  ;;  %v6751_v0 = vld [vmem:[#allocation75_spill] sm:$0xff] }
 0x4fd   :  { %v6230_v32 = vmul.f32 %v2202_v17, %v6751_v0 }
 0x500   :  { %2335 = vadd.xlane.f32.xlu0 %v2334_v39  ;;  %2326 = vadd.xlane.f32.xlu1 %v2325_v27  ;;  %v2316_v39 = vadd.f32 %v6221_v10, %v6227_v40  ;;  %v2307_v27 = vadd.f32 %v6224_v57, %v6230_v32 }
 0x504   :  { %2287 = vmax.xlane.f32.xlu0 %v2286_v62  ;;  %2278 = vmax.xlane.f32.xlu1 %v2277_v29  ;;  %v2268_v62 = vmax.f32 %v6227_v40, %v6221_v10  ;;  %v2259_v29 = vmax.f32 %v6230_v32, %v6224_v57 }
 0x508   :  { %2329 = vadd.xlane.f32.xlu0 %v2328_v51  ;;  %2320 = vadd.xlane.f32.xlu1 %v2319_v60  ;;  %v6244_v51 = vmul.f32 %v2206_v58, %v6019_v6  ;;  %v6752_v60 = vld [vmem:[#allocation58_spill] sm:$0xff] }
 0x50c   :  { %2281 = vmax.xlane.f32.xlu0 %v2280_v44  ;;  %2272 = vmax.xlane.f32.xlu1 %v2271_v59  ;;  %v6247_v44 = vmul.f32 %v2202_v17, %v6752_v60  ;;  %v6753_v59 = vld [vmem:[#allocation67_spill] sm:$0xff] }
 0x510   :  { %2323 = vadd.xlane.f32.xlu0 %v2322_v25  ;;  %2314 = vadd.xlane.f32.xlu1 %v2313_v56  ;;  %v6250_v25 = vmul.f32 %v2202_v17, %v6753_v59  ;;  %v2310_v56 = vadd.f32 %v6241_v7, %v6247_v44 }
 0x514   :  { %2275 = vmax.xlane.f32.xlu0 %v2274_v31  ;;  %2266 = vmax.xlane.f32.xlu1 %v2265_v13  ;;  %v2301_v31 = vadd.f32 %v6244_v51, %v6250_v25  ;;  %v2262_v13 = vmax.f32 %v6247_v44, %v6241_v7 }
 0x518   :  { %2317 = vadd.xlane.f32.xlu0 %v2316_v39  ;;  %2308 = vadd.xlane.f32.xlu1 %v2307_v27  ;;  %v2253_v39 = vmax.f32 %v6250_v25, %v6244_v51  ;;  %v6261_v27 = vmul.f32 %v2206_v58, %v6030_v34 }
 0x51c   :  { %2269 = vmax.xlane.f32.xlu0 %v2268_v62  ;;  %2260 = vmax.xlane.f32.xlu1 %v2259_v29  ;;  %v6264_v62 = vmul.f32 %v2206_v58, %v6013_v3  ;;  %v6754_v29 = vld [vmem:[#allocation49_spill] sm:$0xff] }
 0x51d   :  { %v6267_v26 = vmul.f32 %v2202_v17, %v6754_v29 }
 0x51f   :  { %v2256_v61 = vmax.f32 %v6267_v26, %v6261_v27 }
 0x520   :  { %2311 = vadd.xlane.f32.xlu0 %v2310_v56  ;;  %2302 = vadd.xlane.f32.xlu1 %v2301_v31  ;;  %v6270_v56 = vmul.f32 %v2202_v17, %v6755_v50  ;;  %v2304_v31 = vadd.f32 %v6261_v27, %v6267_v26 }
 0x522   :  { %v2295_v47 = vadd.f32 %v6264_v62, %v6270_v56 }
 0x524   :  { %2263 = vmax.xlane.f32.xlu0 %v2262_v13  ;;  %2254 = vmax.xlane.f32.xlu1 %v2253_v39  ;;  %v2247_v13 = vmax.f32 %v6270_v56, %v6264_v62  ;;  %v6281_v39 = vmul.f32 %v2206_v58, %v6015_v37 }
 0x526   :  { %v2298_v33 = vadd.f32 %v6281_v39, %v6284_v52 }
 0x528   :  { %2305 = vadd.xlane.f32.xlu0 %v2304_v31  ;;  %2296 = vadd.xlane.f32.xlu1 %v2295_v47  ;;  %v2250_v47 = vmax.f32 %v6284_v52, %v6281_v39  ;;  %v3389_v31 = vld [vmem:[%s6416_s11 + $0x4] ss:$8 sps:$4 sm:$0xff]  }
 0x529   :  { %2504 = vmatprep.mubr.bf16.mxu1 %v3389_v31 }
 0x52c   :  { %2257 = vmax.xlane.f32.xlu0 %v2256_v61  ;;  %2248 = vmax.xlane.f32.xlu1 %v2247_v13 }
 0x530   :  { %2299 = vadd.xlane.f32.xlu0 %v2298_v33 }
 0x534   :  { %2251 = vmax.xlane.f32.xlu0 %v2250_v47 }
 0x57d   :  { %v2342_v58 = vpop.xlane.xlu1 %2341  ;;  %v2339_v43 = vpop.xlane.xlu0 %2338 }
 0x57e   :  { %v2359_v61 = vmul.f32 0.00390625, %v2342_v58  ;;  %v2358_v13 = vmul.f32 0.00390625, %v2339_v43 }
 0x580   :  { %v2375_v35 = vpack.c.bf16 %v2359_v61, %v2358_v13 }
 0x581   :  { %v2291_v17 = vpop.xlane.xlu0 %2290  ;;  %v2333_v18 = vpop.xlane.xlu1 %2332 }
 0x582   :  { %3269 = vmatprep.subr.bf16.mxu1 %v2375_v35  ;;  %v2356_v47 = vmul.f32 0.00390625, %v2333_v18 }
 0x585   :  { %v2294_v2 = vpop.xlane.xlu0 %2293  ;;  %v2285_v48 = vpop.xlane.xlu1 %2284 }
 0x586   :  { %v2367_v33 = vpack.c.bf16 %v2294_v2, %v2291_v17 }
 0x588   :  { %3270 = vmatpush3.bf16.msra.mxu1 %v2367_v33 }
 0x589   :  { %v2336_v24 = vpop.xlane.xlu0 %2335  ;;  %v2327_v4 = vpop.xlane.xlu1 %2326 }
 0x58a   :  { %v2357_v36 = vmul.f32 0.00390625, %v2336_v24  ;;  %v2354_v61 = vmul.f32 0.00390625, %v2327_v4 }
 0x58c   :  { %v2374_v8 = vpack.c.bf16 %v2357_v36, %v2356_v47 }
 0x58d   :  { %v2288_v12 = vpop.xlane.xlu0 %2287  ;;  %v2279_v42 = vpop.xlane.xlu1 %2278 }
 0x58e   :  { %v2366_v31 = vpack.c.bf16 %v2288_v12, %v2285_v48  ;;  %3271 = vmatprep.subr.bf16.mxu1 %v2374_v8 }
 0x590   :  { %3272 = vmatpush3.bf16.msra.mxu1 %v2366_v31 }
 0x591   :  { %v2330_v58 = vpop.xlane.xlu0 %2329  ;;  %v2321_v43 = vpop.xlane.xlu1 %2320 }
 0x592   :  { %v2355_v13 = vmul.f32 0.00390625, %v2330_v58  ;;  %v2352_v18 = vmul.f32 0.00390625, %v2321_v43 }
 0x594   :  { %v2373_v38 = vpack.c.bf16 %v2355_v13, %v2354_v61 }
 0x595   :  { %v2282_v35 = vpop.xlane.xlu0 %2281  ;;  %v2273_v45 = vpop.xlane.xlu1 %2272 }
 0x596   :  { %v2365_v46 = vpack.c.bf16 %v2282_v35, %v2279_v42  ;;  %3273 = vmatprep.subr.bf16.mxu1 %v2373_v38 }
 0x598   :  { %3274 = vmatpush3.bf16.msra.mxu1 %v2365_v46 }
 0x599   :  { %v2324_v2 = vpop.xlane.xlu0 %2323  ;;  %v2315_v17 = vpop.xlane.xlu1 %2314 }
 0x59a   :  { %v2353_v24 = vmul.f32 0.00390625, %v2324_v2  ;;  %v2350_v4 = vmul.f32 0.00390625, %v2315_v17 }
 0x59c   :  { %v2372_v36 = vpack.c.bf16 %v2353_v24, %v2352_v18 }
 0x59d   :  { %v2276_v33 = vpop.xlane.xlu0 %2275  ;;  %v2267_v47 = vpop.xlane.xlu1 %2266 }
 0x59e   :  { %v2364_v12 = vpack.c.bf16 %v2276_v33, %v2273_v45  ;;  %3275 = vmatprep.subr.bf16.mxu1 %v2372_v36 }
 0x5a0   :  { %3276 = vmatpush3.bf16.msra.mxu1 %v2364_v12 }
 0x5a1   :  { %v2318_v8 = vpop.xlane.xlu0 %2317  ;;  %v2309_v48 = vpop.xlane.xlu1 %2308 }
 0x5a2   :  { %v2351_v31 = vmul.f32 0.00390625, %v2318_v8  ;;  %v2348_v38 = vmul.f32 0.00390625, %v2309_v48 }
 0x5a4   :  { %v2371_v58 = vpack.c.bf16 %v2351_v31, %v2350_v4 }
 0x5a5   :  { %v2270_v61 = vpop.xlane.xlu0 %2269  ;;  %v2261_v13 = vpop.xlane.xlu1 %2260 }
 0x5a6   :  { %v2363_v42 = vpack.c.bf16 %v2270_v61, %v2267_v47  ;;  %3277 = vmatprep.subr.bf16.mxu1 %v2371_v58 }
 0x5a8   :  { %3278 = vmatpush3.bf16.msra.mxu1 %v2363_v42 }
 0x5a9   :  { %v2312_v46 = vpop.xlane.xlu0 %2311  ;;  %v2303_v35 = vpop.xlane.xlu1 %2302 }
 0x5aa   :  { %v2349_v43 = vmul.f32 0.00390625, %v2312_v46  ;;  %v2346_v33 = vmul.f32 0.00390625, %v2303_v35  ;;  %v3392_v35 = vld [vmem:[%s6416_s11 + $0x10] ss:$8 sps:$4 sm:$0xff]  }
 0x5ac   :  { %v2370_v2 = vpack.c.bf16 %v2349_v43, %v2348_v38  ;;  %v3390_v43 = vld [vmem:[%s6416_s11 + $0x14] ss:$8 sps:$4 sm:$0xff]  }
 0x5ad   :  { %v2264_v18 = vpop.xlane.xlu0 %2263  ;;  %v2255_v45 = vpop.xlane.xlu1 %2254 }
 0x5ae   :  { %v2362_v24 = vpack.c.bf16 %v2264_v18, %v2261_v13  ;;  %3279 = vmatprep.subr.bf16.mxu1 %v2370_v2  ;;  %v3387_v13 = vld [vmem:[%s6416_s11] ss:$8 sps:$4 sm:$0xff]   ;;  %v3393_v2 = vld [vmem:[%s6416_s11 + $0x24] ss:$8 sps:$4 sm:$0xff]  }
 0x5af   :  { %v3395_v18 = vld [vmem:[%s6416_s11 + $0x20] ss:$8 sps:$4 sm:$0xff]  }
 0x5b0   :  { %3280 = vmatpush3.bf16.msra.mxu1 %v2362_v24  ;;  %v3396_v24 = vld [vmem:[%s6416_s11 + $0x34] ss:$8 sps:$4 sm:$0xff]  }
 0x5b1   :  { %v2306_v36 = vpop.xlane.xlu0 %2305  ;;  %v2297_v47 = vpop.xlane.xlu1 %2296 }
 0x5b2   :  { %v2347_v17 = vmul.f32 0.00390625, %v2306_v36  ;;  %v2344_v58 = vmul.f32 0.00390625, %v2297_v47  ;;  %v3399_v36 = vld [vmem:[%s6416_s11 + $0x44] ss:$8 sps:$4 sm:$0xff]   ;;  %v3408_v47 = vld [vmem:[%s6416_s11 + $0x74] ss:$8 sps:$4 sm:$0xff]  }
 0x5b4   :  { %v2369_v12 = vpack.c.bf16 %v2347_v17, %v2346_v33  ;;  %v3401_v33 = vld [vmem:[%s6416_s11 + $0x40] ss:$8 sps:$4 sm:$0xff]   ;;  %v3402_v17 = vld [vmem:[%s6416_s11 + $0x54] ss:$8 sps:$4 sm:$0xff]  }
 0x5b5   :  { %v2258_v8 = vpop.xlane.xlu0 %2257  ;;  %v2249_v42 = vpop.xlane.xlu1 %2248 }
 0x5b6   :  { %v2361_v4 = vpack.c.bf16 %v2258_v8, %v2255_v45  ;;  %3281 = vmatprep.subr.bf16.mxu1 %v2369_v12  ;;  %v3398_v45 = vld [vmem:[%s6416_s11 + $0x30] ss:$8 sps:$4 sm:$0xff]   ;;  %v3405_v8 = vld [vmem:[%s6416_s11 + $0x64] ss:$8 sps:$4 sm:$0xff]  }
 0x5b7   :  { %v3404_v12 = vld [vmem:[%s6416_s11 + $0x50] ss:$8 sps:$4 sm:$0xff]  }
 0x5b8   :  { %3282 = vmatpush3.bf16.msra.mxu1 %v2361_v4  ;;  %v3407_v4 = vld [vmem:[%s6416_s11 + $0x60] ss:$8 sps:$4 sm:$0xff]  }
 0x5b9   :  { %v2300_v31 = vpop.xlane.xlu0 %2299 }
 0x5ba   :  { %v2345_v48 = vmul.f32 0.00390625, %v2300_v31  ;;  %v3410_v31 = vld [vmem:[%s6416_s11 + $0x70] ss:$8 sps:$4 sm:$0xff]   ;;  %s3511_s11 = smov [#allocation2]  }
 0x5bb   :  { %s2878_s15 = sshll.u32 %s3511_s11, 4  ;;  %s2879_s15 = int_to_ptr.vmem [resolvable:$true] %s2878_s15 }
 0x5bc   :  { %v2368_v61 = vpack.c.bf16 %v2345_v48, %v2344_v58  ;;  %s3486_s16 = scalar_lea.vmem %s2879_s15, 4096  ;;  %p3491_p1 = scmp.lt.s32.totalorder %s2879_s15, %s2879_s15 }
 0x5bd   :  { %v2252_v46 = vpop.xlane.xlu0 %2251  ;;  %p3487_p0 = scmp.ne.s32.totalorder %s2879_s15, %s3486_s16  ;;  %p3492_p2 = scmp.lt.s32.totalorder %s3486_s16, %s3486_s16 }
 0x5be   :  { %v2360_v38 = vpack.c.bf16 %v2252_v46, %v2249_v42  ;;  %3283 = vmatprep.subr.bf16.mxu1 %v2368_v61 }
 0x5bf   :  { %p3493_p3 = por %p3492_p2, %p3491_p1 }
 0x5c0   :  { %3284 = vmatpush3.bf16.msra.mxu1 %v2360_v38 }
 0x5c1   :  { %p3494_p4 = pnand %p3493_p3, %p3487_p0 }
 0x5c3   :  { %2505 = vmatmul.mubr.bf16.vlgmr.msra.gmra.mxu1 %v3387_v13 }
 0x5c4   :  { %2512 = vmatprep.mubr.bf16.mxu1 %v3390_v43 }
 0x5cb   :  { %2513 = vmatmul.mubr.bf16.gmra.mxu1 %v3392_v35 }
 0x5cc   :  { %2520 = vmatprep.mubr.bf16.mxu1 %v3393_v2 }
 0x5d3   :  { %2521 = vmatmul.mubr.bf16.gmra.mxu1 %v3395_v18 }
 0x5d4   :  { %2528 = vmatprep.mubr.bf16.mxu1 %v3396_v24 }
 0x5db   :  { %2529 = vmatmul.mubr.bf16.gmra.mxu1 %v3398_v45 }
 0x5dc   :  { %2536 = vmatprep.mubr.bf16.mxu1 %v3399_v36 }
 0x5e3   :  { %2537 = vmatmul.mubr.bf16.gmra.mxu1 %v3401_v33 }
 0x5e4   :  { %2544 = vmatprep.mubr.bf16.mxu1 %v3402_v17 }
 0x5eb   :  { %2545 = vmatmul.mubr.bf16.gmra.mxu1 %v3404_v12 }
 0x5ec   :  { %2552 = vmatprep.mubr.bf16.mxu1 %v3405_v8 }
 0x5f3   :  { %2553 = vmatmul.mubr.bf16.gmra.mxu1 %v3407_v4 }
 0x5f4   :  { %2560 = vmatprep.mubr.bf16.mxu1 %v3408_v47 }
 0x5fb   :  { %2561 = vmatmul.mubr.bf16.gmra.mxu1 %v3410_v31 }
 0x683   :  { %v3285_v58 = vpop.f32.mrf.mxu1 }
 0x685   :  { %v3286_v48 = vpop.f32.mrf.mxu1 }
 0x686   :  { %v3287_v61 = vadd.f32 %v3286_v48, %v3285_v58 }
 0x687   :  { %v3288_v42 = vpop.f32.mrf.mxu1 }
 0x688   :  { %v3206_v46 = vmul.f32 -1.442695, %v3287_v61 }
 0x689   :  { %v3289_v38 = vpop.f32.mrf.mxu1 }
 0x68a   :  { %3419 = vpow2.f32 %v3206_v46  ;;  %v3290_v13 = vadd.f32 %v3289_v38, %v3288_v42 }
 0x68b   :  { %v3291_v43 = vpop.f32.mrf.mxu1 }
 0x68c   :  { %v3207_v35 = vmul.f32 -1.442695, %v3290_v13 }
 0x68d   :  { %v3292_v2 = vpop.f32.mrf.mxu1 }
 0x68e   :  { %3421 = vpow2.f32 %v3207_v35  ;;  %v3293_v18 = vadd.f32 %v3292_v2, %v3291_v43 }
 0x68f   :  { %v3294_v24 = vpop.f32.mrf.mxu1 }
 0x690   :  { %v3208_v45 = vmul.f32 -1.442695, %v3293_v18 }
 0x691   :  { %v3295_v36 = vpop.f32.mrf.mxu1 }
 0x692   :  { %3423 = vpow2.f32 %v3208_v45  ;;  %v3296_v33 = vadd.f32 %v3295_v36, %v3294_v24 }
 0x693   :  { %v3297_v17 = vpop.f32.mrf.mxu1 }
 0x694   :  { %v3209_v12 = vmul.f32 -1.442695, %v3296_v33 }
 0x695   :  { %v3298_v8 = vpop.f32.mrf.mxu1 }
 0x696   :  { %3425 = vpow2.f32 %v3209_v12  ;;  %v3299_v4 = vadd.f32 %v3298_v8, %v3297_v17 }
 0x697   :  { %v3420_v47 = vpop.eup %3419  ;;  %v3300_v31 = vpop.f32.mrf.mxu1 }
 0x698   :  { %v2617_v58 = vadd.f32 1.0, %v3420_v47  ;;  %v3210_v48 = vmul.f32 -1.442695, %v3299_v4 }
 0x699   :  { %v3301_v61 = vpop.f32.mrf.mxu1 }
 0x69a   :  { %3427 = vrcp.f32 %v2617_v58  ;;  %v3302_v42 = vadd.f32 %v3301_v61, %v3300_v31 }
 0x69b   :  { %v3422_v46 = vpop.eup %3421  ;;  %3429 = vpow2.f32 %v3210_v48  ;;  %v3303_v38 = vpop.f32.mrf.mxu1 }
 0x69c   :  { %v2618_v13 = vadd.f32 1.0, %v3422_v46  ;;  %v3211_v43 = vmul.f32 -1.442695, %v3302_v42 }
 0x69d   :  { %v3304_v35 = vpop.f32.mrf.mxu1 }
 0x69e   :  { %3431 = vrcp.f32 %v2618_v13  ;;  %v3305_v2 = vadd.f32 %v3304_v35, %v3303_v38 }
 0x69f   :  { %v3424_v18 = vpop.eup %3423  ;;  %3433 = vpow2.f32 %v3211_v43  ;;  %v3306_v24 = vpop.f32.mrf.mxu1 }
 0x6a0   :  { %v2619_v45 = vadd.f32 1.0, %v3424_v18  ;;  %v3212_v36 = vmul.f32 -1.442695, %v3305_v2 }
 0x6a1   :  { %v3307_v33 = vpop.f32.mrf.mxu1 }
 0x6a2   :  { %3435 = vrcp.f32 %v2619_v45  ;;  %v3308_v17 = vadd.f32 %v3307_v33, %v3306_v24 }
 0x6a3   :  { %v3426_v12 = vpop.eup %3425  ;;  %3437 = vpow2.f32 %v3212_v36  ;;  %v3309_v8 = vpop.f32.mrf.mxu1 }
 0x6a4   :  { %v2620_v4 = vadd.f32 1.0, %v3426_v12  ;;  %v3213_v47 = vmul.f32 -1.442695, %v3308_v17 }
 0x6a5   :  { %v3310_v31 = vpop.f32.mrf.mxu1 }
 0x6a6   :  { %3439 = vrcp.f32 %v2620_v4  ;;  %v3311_v58 = vadd.f32 %v3310_v31, %v3309_v8 }
 0x6a7   :  { %v3428_v48 = vpop.eup %3427  ;;  %3441 = vpow2.f32 %v3213_v47  ;;  %v3312_v61 = vpop.f32.mrf.mxu1 }
 0x6a8   :  { %v3430_v42 = vpop.eup %3429  ;;  %v3214_v46 = vmul.f32 -1.442695, %v3311_v58  ;;  %2667 = vperm.xlu1 %3363, %v3428_v48  }
 0x6a9   :  { %v2621_v38 = vadd.f32 1.0, %v3430_v42  ;;  %v3313_v13 = vpop.f32.mrf.mxu1 }
 0x6aa   :  { %3443 = vpow2.f32 %v3214_v46  ;;  %v3314_v43 = vadd.f32 %v3313_v13, %v3312_v61 }
 0x6ab   :  { %v3432_v35 = vpop.eup %3431  ;;  %3445 = vrcp.f32 %v2621_v38  ;;  %v3315_v2 = vpop.f32.mrf.mxu1 }
 0x6ac   :  { %v3434_v18 = vpop.eup %3433  ;;  %v3215_v24 = vmul.f32 -1.442695, %v3314_v43  ;;  %2672 = vperm.xlu0 %3364, %v3432_v35  }
 0x6ad   :  { %v2622_v45 = vadd.f32 1.0, %v3434_v18  ;;  %v3316_v36 = vpop.f32.mrf.mxu1 }
 0x6ae   :  { %3447 = vpow2.f32 %v3215_v24  ;;  %v3317_v33 = vadd.f32 %v3316_v36, %v3315_v2 }
 0x6af   :  { %v3436_v17 = vpop.eup %3435  ;;  %3449 = vrcp.f32 %v2622_v45  ;;  %v3318_v12 = vpop.f32.mrf.mxu1 }
 0x6b0   :  { %v3438_v8 = vpop.eup %3437  ;;  %v3216_v4 = vmul.f32 -1.442695, %v3317_v33  ;;  %2677 = vperm.xlu1 %3363, %v3436_v17  }
 0x6b1   :  { %v2623_v47 = vadd.f32 1.0, %v3438_v8  ;;  %v3319_v31 = vpop.f32.mrf.mxu1 }
 0x6b2   :  { %3451 = vpow2.f32 %v3216_v4  ;;  %v3320_v58 = vadd.f32 %v3319_v31, %v3318_v12 }
 0x6b3   :  { %v3440_v48 = vpop.eup %3439  ;;  %3453 = vrcp.f32 %v2623_v47  ;;  %v3321_v61 = vpop.f32.mrf.mxu1 }
 0x6b4   :  { %v3442_v42 = vpop.eup %3441  ;;  %v3217_v46 = vmul.f32 -1.442695, %v3320_v58  ;;  %2682 = vperm.xlu1 %3363, %v3440_v48  }
 0x6b5   :  { %v2624_v38 = vadd.f32 1.0, %v3442_v42  ;;  %v3322_v13 = vpop.f32.mrf.mxu1 }
 0x6b6   :  { %3455 = vpow2.f32 %v3217_v46  ;;  %v3323_v43 = vadd.f32 %v3322_v13, %v3321_v61 }
 0x6b7   :  { %v3444_v35 = vpop.eup %3443  ;;  %3457 = vrcp.f32 %v2624_v38  ;;  %v3324_v2 = vpop.f32.mrf.mxu1 }
 0x6b8   :  { %v3446_v18 = vpop.eup %3445  ;;  %v2625_v24 = vadd.f32 1.0, %v3444_v35  ;;  %v3218_v45 = vmul.f32 -1.442695, %v3323_v43 }
 0x6b9   :  { %2687 = vperm.xlu1 %3363, %v3446_v18   ;;  %v3325_v36 = vpop.f32.mrf.mxu1 }
 0x6ba   :  { %3459 = vrcp.f32 %v2625_v24  ;;  %v3326_v33 = vadd.f32 %v3325_v36, %v3324_v2 }
 0x6bb   :  { %v3448_v17 = vpop.eup %3447  ;;  %3461 = vpow2.f32 %v3218_v45  ;;  %v3327_v12 = vpop.f32.mrf.mxu1 }
 0x6bc   :  { %v3450_v8 = vpop.eup %3449  ;;  %v2626_v4 = vadd.f32 1.0, %v3448_v17  ;;  %v3219_v47 = vmul.f32 -1.442695, %v3326_v33 }
 0x6bd   :  { %2692 = vperm.xlu1 %3363, %v3450_v8   ;;  %v3328_v31 = vpop.f32.mrf.mxu1 }
 0x6be   :  { %3463 = vrcp.f32 %v2626_v4  ;;  %v3329_v58 = vadd.f32 %v3328_v31, %v3327_v12 }
 0x6bf   :  { %v3452_v48 = vpop.eup %3451  ;;  %3465 = vpow2.f32 %v3219_v47  ;;  %v3330_v61 = vpop.f32.mrf.mxu1 }
 0x6c0   :  { %v3454_v42 = vpop.eup %3453  ;;  %v2627_v46 = vadd.f32 1.0, %v3452_v48  ;;  %v3220_v38 = vmul.f32 -1.442695, %v3329_v58 }
 0x6c1   :  { %2697 = vperm.xlu1 %3363, %v3454_v42   ;;  %v3331_v13 = vpop.f32.mrf.mxu1 }
 0x6c2   :  { %3467 = vrcp.f32 %v2627_v46  ;;  %v3332_v43 = vadd.f32 %v3331_v13, %v3330_v61 }
 0x6c3   :  { %v3456_v35 = vpop.eup %3455  ;;  %3469 = vpow2.f32 %v3220_v38 }
 0x6c4   :  { %v3458_v2 = vpop.eup %3457  ;;  %v2628_v18 = vadd.f32 1.0, %v3456_v35  ;;  %v3221_v24 = vmul.f32 -1.442695, %v3332_v43 }
 0x6c5   :  { %2702 = vperm.xlu1 %3363, %v3458_v2  }
 0x6c6   :  { %3471 = vrcp.f32 %v2628_v18 }
 0x6c7   :  { %v3460_v45 = vpop.eup %3459  ;;  %3473 = vpow2.f32 %v3221_v24 }
 0x6c8   :  { %v3462_v36 = vpop.eup %3461 }
 0x6c9   :  { %v2629_v33 = vadd.f32 1.0, %v3462_v36  ;;  %2707 = vperm.xlu1 %3363, %v3460_v45  }
 0x6cb   :  { %v3464_v17 = vpop.eup %3463  ;;  %3475 = vrcp.f32 %v2629_v33 }
 0x6cc   :  { %v3466_v12 = vpop.eup %3465 }
 0x6cd   :  { %v2630_v8 = vadd.f32 1.0, %v3466_v12  ;;  %2712 = vperm.xlu1 %3363, %v3464_v17  }
 0x6cf   :  { %v3468_v4 = vpop.eup %3467  ;;  %3477 = vrcp.f32 %v2630_v8 }
 0x6d0   :  { %v3470_v47 = vpop.eup %3469  ;;  %2717 = vperm.xlu0 %3364, %v3468_v4  }
 0x6d1   :  { %v2631_v31 = vadd.f32 1.0, %v3470_v47 }
 0x6d3   :  { %v3472_v58 = vpop.eup %3471  ;;  %3479 = vrcp.f32 %v2631_v31 }
 0x6d4   :  { %v3474_v48 = vpop.eup %3473  ;;  %2722 = vperm.xlu1 %3363, %v3472_v58  }
 0x6d5   :  { %v2632_v61 = vadd.f32 1.0, %v3474_v48 }
 0x6d7   :  { %3481 = vrcp.f32 %v2632_v61 }
 0x6d8   :  { %v3476_v42 = vpop.eup %3475 }
 0x6d9   :  { %2727 = vperm.xlu0 %3364, %v3476_v42  }
 0x6dc   :  { %v3478_v46 = vpop.eup %3477 }
 0x6dd   :  { %2732 = vperm.xlu1 %3363, %v3478_v46  }
 0x6e0   :  { %v3480_v38 = vpop.eup %3479 }
 0x6e1   :  { %2737 = vperm.xlu0 %3364, %v3480_v38  }
 0x6e4   :  { %v3482_v13 = vpop.eup %3481 }
 0x6e5   :  { %2742 = vperm.xlu1 %3363, %v3482_v13  }
 0x723   :  { %v2668_v43 = vpop.permute.xlu1 %2667 }
 0x724   :  { %v2745_v35 = vmul.f32 %v2668_v43, %v6270_v56  ;;  %v2746_v2 = vmul.f32 %v2668_v43, %v6264_v62 }
 0x726   :  { %v2777_v18 = vadd.f32 %v2745_v35, %v6755_v50  ;;  %v2778_v24 = vadd.f32 %v2746_v2, %v6013_v3 }
 0x727   :  { %v2673_v45 = vpop.permute.xlu0 %2672 }
 0x728   :  { %v2809_v36 = vmax.f32 %v2777_v18, 0.0  ;;  %v2810_v33 = vmax.f32 %v2778_v24, 0.0  ;;  %v2747_v17 = vmul.f32 %v2673_v45, %v6284_v52  ;;  %v2748_v12 = vmul.f32 %v2673_v45, %v6281_v39 }
 0x72a   :  { %2841 = vst [vmem:[#allocation2] sm:$0xff] %v2809_v36  ;;  %2842 = vst [vmem:[#allocation2 + $0x8] sm:$0xff] %v2810_v33  ;;  %v2779_v8 = vadd.f32 %v2747_v17, %v6756_v19  ;;  %v2780_v4 = vadd.f32 %v2748_v12, %v6015_v37 }
 0x72b   :  { %v2678_v56 = vpop.permute.xlu1 %2677 }
 0x72c   :  { %v2811_v47 = vmax.f32 %v2779_v8, 0.0  ;;  %v2812_v62 = vmax.f32 %v2780_v4, 0.0  ;;  %v2749_v50 = vmul.f32 %v2678_v56, %v6250_v25  ;;  %v2750_v3 = vmul.f32 %v2678_v56, %v6244_v51 }
 0x72e   :  { %2843 = vst [vmem:[#allocation2 + $0x10] sm:$0xff] %v2811_v47  ;;  %2844 = vst [vmem:[#allocation2 + $0x18] sm:$0xff] %v2812_v62  ;;  %v2781_v31 = vadd.f32 %v2749_v50, %v6753_v59  ;;  %v2782_v52 = vadd.f32 %v2750_v3, %v6019_v6 }
 0x72f   :  { %v2683_v39 = vpop.permute.xlu1 %2682 }
 0x730   :  { %v2813_v58 = vmax.f32 %v2781_v31, 0.0  ;;  %v2814_v48 = vmax.f32 %v2782_v52, 0.0  ;;  %v2751_v19 = vmul.f32 %v2683_v39, %v6267_v26  ;;  %v2752_v37 = vmul.f32 %v2683_v39, %v6261_v27  ;;  %v6757_v31 = vld [vmem:[#allocation73_spill] sm:$0xff] }
 0x732   :  { %2845 = vst [vmem:[#allocation2 + $0x20] sm:$0xff] %v2813_v58  ;;  %2846 = vst [vmem:[#allocation2 + $0x28] sm:$0xff] %v2814_v48  ;;  %v2783_v61 = vadd.f32 %v2751_v19, %v6754_v29  ;;  %v2784_v25 = vadd.f32 %v2752_v37, %v6030_v34  ;;  %v6758_v58 = vld [vmem:[#allocation17_spill] sm:$0xff]  ;;  %v6759_v48 = vld [vmem:[#allocation15_spill] sm:$0xff] }
 0x734   :  { %v2815_v51 = vmax.f32 %v2783_v61, 0.0  ;;  %v2816_v42 = vmax.f32 %v2784_v25, 0.0  ;;  %v2688_v46 = vpop.permute.xlu1 %2687 }
 0x735   :  { %v2753_v59 = vmul.f32 %v2688_v46, %v6230_v32  ;;  %v2754_v6 = vmul.f32 %v2688_v46, %v6224_v57  ;;  %v6763_v46 = vld [vmem:[#allocation7_spill] sm:$0xff] }
 0x736   :  { %2847 = vst [vmem:[#allocation2 + $0x30] sm:$0xff] %v2815_v51  ;;  %2848 = vst [vmem:[#allocation2 + $0x38] sm:$0xff] %v2816_v42  ;;  %v6762_v51 = vld [vmem:[#allocation9_spill] sm:$0xff] }
 0x737   :  { %v2785_v38 = vadd.f32 %v2753_v59, %v6751_v0  ;;  %v2786_v26 = vadd.f32 %v2754_v6, %v6037_v9  ;;  %v6764_v6 = vld [vmem:[#allocation69_spill] sm:$0xff] }
 0x738   :  { %v2693_v27 = vpop.permute.xlu1 %2692 }
 0x739   :  { %v2817_v13 = vmax.f32 %v2785_v38, 0.0  ;;  %v2818_v43 = vmax.f32 %v2786_v26, 0.0  ;;  %v2755_v29 = vmul.f32 %v2693_v27, %v6247_v44  ;;  %v2756_v34 = vmul.f32 %v2693_v27, %v6241_v7  ;;  %v6765_v26 = vld [vmem:[#allocation68_spill] sm:$0xff] }
 0x73b   :  { %2849 = vst [vmem:[#allocation2 + $0x40] sm:$0xff] %v2817_v13  ;;  %2850 = vst [vmem:[#allocation2 + $0x48] sm:$0xff] %v2818_v43  ;;  %v2787_v35 = vadd.f32 %v2755_v29, %v6752_v60  ;;  %v2788_v32 = vadd.f32 %v2756_v34, %v6062_v5  ;;  %v6766_v34 = vld [vmem:[#allocation13_spill] sm:$0xff] }
 0x73c   :  { %v2698_v57 = vpop.permute.xlu1 %2697 }
 0x73d   :  { %v2819_v2 = vmax.f32 %v2787_v35, 0.0  ;;  %v2820_v18 = vmax.f32 %v2788_v32, 0.0  ;;  %v2757_v0 = vmul.f32 %v2698_v57, %v6210_v1  ;;  %v2758_v9 = vmul.f32 %v2698_v57, %v6204_v54  ;;  %v6767_v32 = vld [vmem:[#allocation11_spill] sm:$0xff] }
 0x73f   :  { %2851 = vst [vmem:[#allocation2 + $0x50] sm:$0xff] %v2819_v2  ;;  %2852 = vst [vmem:[#allocation2 + $0x58] sm:$0xff] %v2820_v18  ;;  %v2789_v24 = vadd.f32 %v2757_v0, %v5913_v23  ;;  %v2790_v44 = vadd.f32 %v2758_v9, %v6087_v28  ;;  %v6768_v2 = vld [vmem:[#allocation59_spill] sm:$0xff]  ;;  %v6769_v0 = vld [vmem:[#allocation70_spill] sm:$0xff] }
 0x740   :  { %v2703_v7 = vpop.permute.xlu1 %2702 }
 0x741   :  { %v2821_v45 = vmax.f32 %v2789_v24, 0.0  ;;  %v2822_v36 = vmax.f32 %v2790_v44, 0.0  ;;  %v2759_v60 = vmul.f32 %v2703_v7, %v6227_v40  ;;  %v2760_v5 = vmul.f32 %v2703_v7, %v6221_v10 }
 0x743   :  { %2853 = vst [vmem:[#allocation2 + $0x60] sm:$0xff] %v2821_v45  ;;  %2854 = vst [vmem:[#allocation2 + $0x68] sm:$0xff] %v2822_v36  ;;  %v2791_v33 = vadd.f32 %v2759_v60, %v6750_v63  ;;  %v2792_v1 = vadd.f32 %v2760_v5, %v6085_v16  ;;  %v6770_v45 = vld [vmem:[#allocation33_spill] sm:$0xff] }
 0x744   :  { %v2708_v54 = vpop.permute.xlu1 %2707  ;;  %v6771_v60 = vld [vmem:[#allocation5_spill] sm:$0xff] }
 0x745   :  { %v2823_v17 = vmax.f32 %v2791_v33, 0.0  ;;  %v2824_v12 = vmax.f32 %v2792_v1, 0.0  ;;  %v2761_v23 = vmul.f32 %v2708_v54, %v6188_v49  ;;  %v2762_v28 = vmul.f32 %v2708_v54, %v6182_v55  ;;  %v6772_v33 = vld [vmem:[#allocation71_spill] sm:$0xff]  ;;  %v6773_v54 = vld [vmem:[#allocation38_spill] sm:$0xff] }
 0x747   :  { %2855 = vst [vmem:[#allocation2 + $0x70] sm:$0xff] %v2823_v17  ;;  %2856 = vst [vmem:[#allocation2 + $0x78] sm:$0xff] %v2824_v12  ;;  %v2793_v8 = vadd.f32 %v2761_v23, %v5954_v14  ;;  %v2794_v40 = vadd.f32 %v2762_v28, %v6041_v53 }
 0x748   :  { %v2713_v10 = vpop.permute.xlu1 %2712 }
 0x749   :  { %v2825_v4 = vmax.f32 %v2793_v8, 0.0  ;;  %v2826_v56 = vmax.f32 %v2794_v40, 0.0  ;;  %v2763_v63 = vmul.f32 %v2713_v10, %v6207_v20  ;;  %v2764_v16 = vmul.f32 %v2713_v10, %v6201_v22  ;;  %v6774_v8 = vld [vmem:[#allocation54_spill] sm:$0xff]  ;;  %v6775_v10 = vld [vmem:[#allocation61_spill] sm:$0xff] }
 0x74b   :  { %2857 = vst [vmem:[#allocation2 + $0x80] sm:$0xff] %v2825_v4  ;;  %2858 = vst [vmem:[#allocation2 + $0x88] sm:$0xff] %v2826_v56  ;;  %v2795_v47 = vadd.f32 %v2763_v63, %v5943_v15  ;;  %v2796_v49 = vadd.f32 %v2764_v16, %v6039_v30  ;;  %v2718_v55 = vpop.permute.xlu0 %2717  ;;  %v6776_v56 = vld [vmem:[#allocation62_spill] sm:$0xff]  ;;  %v6777_v16 = vld [vmem:[#allocation39_spill] sm:$0xff] }
 0x74c   :  { %v2765_v62 = vmul.f32 %v2718_v55, %v6168_v41  ;;  %v2766_v14 = vmul.f32 %v2718_v55, %v6162_v21  ;;  %v6760_v41 = vld [vmem:[#allocation63_spill] sm:$0xff]  ;;  %v6761_v21 = vld [vmem:[#allocation76_spill] sm:$0xff] }
 0x74d   :  { %v2827_v50 = vmax.f32 %v2795_v47, 0.0  ;;  %v2828_v53 = vmax.f32 %v2796_v49, 0.0 }
 0x74e   :  { %v2797_v3 = vadd.f32 %v2765_v62, %v5957_v11  ;;  %v2798_v52 = vadd.f32 %v2766_v14, %v6757_v31 }
 0x74f   :  { %2859 = vst [vmem:[#allocation2 + $0x90] sm:$0xff] %v2827_v50  ;;  %2860 = vst [vmem:[#allocation2 + $0x98] sm:$0xff] %v2828_v53  ;;  %v2723_v22 = vpop.permute.xlu1 %2722 }
 0x750   :  { %v2829_v20 = vmax.f32 %v2797_v3, 0.0  ;;  %v2830_v39 = vmax.f32 %v2798_v52, 0.0  ;;  %v2767_v15 = vmul.f32 %v2723_v22, %v6758_v58  ;;  %v2768_v30 = vmul.f32 %v2723_v22, %v6759_v48 }
 0x752   :  { %2861 = vst [vmem:[#allocation2 + $0xa0] sm:$0xff] %v2829_v20  ;;  %2862 = vst [vmem:[#allocation2 + $0xa8] sm:$0xff] %v2830_v39  ;;  %v2799_v19 = vadd.f32 %v2767_v15, %v6760_v41  ;;  %v2800_v37 = vadd.f32 %v2768_v30, %v6761_v21 }
 0x754   :  { %v2831_v61 = vmax.f32 %v2799_v19, 0.0  ;;  %v2832_v25 = vmax.f32 %v2800_v37, 0.0  ;;  %v2728_v11 = vpop.permute.xlu0 %2727 }
 0x755   :  { %v2769_v42 = vmul.f32 %v2728_v11, %v6762_v51  ;;  %v2770_v59 = vmul.f32 %v2728_v11, %v6763_v46 }
 0x756   :  { %2863 = vst [vmem:[#allocation2 + $0xb0] sm:$0xff] %v2831_v61  ;;  %2864 = vst [vmem:[#allocation2 + $0xb8] sm:$0xff] %v2832_v25 }
 0x757   :  { %v2801_v38 = vadd.f32 %v2769_v42, %v6764_v6  ;;  %v2802_v27 = vadd.f32 %v2770_v59, %v6765_v26 }
 0x758   :  { %v2733_v13 = vpop.permute.xlu1 %2732 }
 0x759   :  { %v2833_v43 = vmax.f32 %v2801_v38, 0.0  ;;  %v2834_v29 = vmax.f32 %v2802_v27, 0.0  ;;  %v2771_v35 = vmul.f32 %v2733_v13, %v6766_v34  ;;  %v2772_v57 = vmul.f32 %v2733_v13, %v6767_v32 }
 0x75b   :  { %2865 = vst [vmem:[#allocation2 + $0xc0] sm:$0xff] %v2833_v43  ;;  %2866 = vst [vmem:[#allocation2 + $0xc8] sm:$0xff] %v2834_v29  ;;  %v2803_v18 = vadd.f32 %v2771_v35, %v6768_v2  ;;  %v2804_v9 = vadd.f32 %v2772_v57, %v6769_v0 }
 0x75c   :  { %v2738_v24 = vpop.permute.xlu0 %2737 }
 0x75d   :  { %v2835_v44 = vmax.f32 %v2803_v18, 0.0  ;;  %v2836_v7 = vmax.f32 %v2804_v9, 0.0  ;;  %v2773_v36 = vmul.f32 %v2738_v24, %v6770_v45  ;;  %v2774_v5 = vmul.f32 %v2738_v24, %v6771_v60 }
 0x75f   :  { %2867 = vst [vmem:[#allocation2 + $0xd0] sm:$0xff] %v2835_v44  ;;  %2868 = vst [vmem:[#allocation2 + $0xd8] sm:$0xff] %v2836_v7  ;;  %v2805_v1 = vadd.f32 %v2773_v36, %v6772_v33  ;;  %v2806_v17 = vadd.f32 %v2774_v5, %v6773_v54 }
 0x760   :  { %v2743_v12 = vpop.permute.xlu1 %2742 }
 0x761   :  { %v2837_v23 = vmax.f32 %v2805_v1, 0.0  ;;  %v2838_v28 = vmax.f32 %v2806_v17, 0.0  ;;  %v2775_v40 = vmul.f32 %v2743_v12, %v6774_v8  ;;  %v2776_v4 = vmul.f32 %v2743_v12, %v6775_v10 }
 0x763   :  { %2869 = vst [vmem:[#allocation2 + $0xe0] sm:$0xff] %v2837_v23  ;;  %2870 = vst [vmem:[#allocation2 + $0xe8] sm:$0xff] %v2838_v28  ;;  %v2807_v63 = vadd.f32 %v2775_v40, %v6776_v56  ;;  %v2808_v47 = vadd.f32 %v2776_v4, %v6777_v16 }
 0x765   :  { %v2839_v49 = vmax.f32 %v2807_v63, 0.0  ;;  %v2840_v55 = vmax.f32 %v2808_v47, 0.0 }
 0x767   :  { %2871 = vst [vmem:[#allocation2 + $0xf0] sm:$0xff] %v2839_v49  ;;  %2872 = vst [vmem:[#allocation2 + $0xf8] sm:$0xff] %v2840_v55 }
 0x768   :  { %3497 = shalt.err (!%p3494_p4)
}
 0x769   :  { %s3512_s18 = smov 256   ;;  %s3513_s19 = smov 16  }
 0x76a   :  { %2884 = dma.vmem_to_hbm [thread:$0]  %s2879_s15, 4096, %s6417_s12, [#allocation3], %s3512_s18, %s3512_s18, %s3513_s19  }
 0x76b   :  { %3506 = dma.done.wait [#allocation3], 4096  }
 0x76c   :  { %3507 = vsyncadd [#allocation3], 4294963200 }
 0x76d   :  { %2888 = vsyncpa [#allocation3], 1 }

</bundles_post_ra>
